<compile_context>
chip_gen: v5e
topology: v5e:2x2
jax: 0.10.0
libtpu: 0.0.40
codegen_flags: <defaults>
</compile_context>

<pallas_src>
import jax
import jax.numpy as jnp
from jax.experimental import pallas as pl
from jax.experimental.pallas import tpu as pltpu


# ---------------------------------------------------------------------------
# VMEM budgeting helpers
# ---------------------------------------------------------------------------
def _vmem_capacity_bytes():
    try:
        info = pltpu.get_tpu_info()
        for attr in ("vmem_capacity_bytes", "vmem_size_bytes", "vmem_bytes"):
            v = getattr(info, attr, None)
            if v:
                return int(v)
    except Exception:
        pass
    return 64 * 1024 * 1024  # conservative default (v7x per-core VMEM)


def _pick_rows_tile(rows, bytes_per_row, fixed_bytes, budget_bytes,
                    min_tile=8, max_tile=1024):
    """Largest multiple-of-8 row tile that fits the VMEM budget, capped so the
    grid has >= 2 steps when rows allow (so v7x's 2 TensorCores both get work)."""
    if rows <= min_tile:
        return rows
    avail = max(budget_bytes - fixed_bytes, bytes_per_row * min_tile)
    tb = int(avail // max(bytes_per_row, 1))
    half = ((rows + 1) // 2 // min_tile) * min_tile   # prefer >= 2 grid steps
    if half >= min_tile:
        tb = min(tb, half)
    tb = max(min_tile, min(tb, max_tile, rows))
    tb = (tb // min_tile) * min_tile
    if tb >= rows:
        return rows
    return tb


# ---------------------------------------------------------------------------
# Kernel 1: fused GAP + Linear classifiers (all 3 branches in one MXU pass).
# ---------------------------------------------------------------------------
def gap_fc_kernel(x0_ref, x1_ref, x2_ref, w_ref, b_ref, o_ref):
    # x*_ref: (TB, C*HW) bf16/f32    w_ref: (3, C*HW, 128)    b_ref: (1, 128) f32
    # o_ref : (TB, 128) f32
    # GAP is folded into the weights (rows pre-divided by HW); branch i's
    # classifier occupies lanes [i*NC, (i+1)*NC) -> block-diagonal accumulate.
    acc = jnp.dot(x0_ref[...], w_ref[0], preferred_element_type=jnp.float32)
    acc = acc + jnp.dot(x1_ref[...], w_ref[1], preferred_element_type=jnp.float32)
    acc = acc + jnp.dot(x2_ref[...], w_ref[2], preferred_element_type=jnp.float32)
    o_ref[...] = acc + b_ref[...]


def network_group_forward(branches, cls_w, cls_b):
    """Default Network_Group.forward path after the (external) backbone:
        branch = GAP(branch); branch = branch.view(B, -1)
        return [classifier_many(x[2]), classifier_medium(x[1]), classifier_few(x[0])]

    branches: list/tuple of 3 arrays (B, C, H, W), branch order [few, medium, many].
    cls_w:    (3, C, NC) stacked [W_few, W_medium, W_many], pre-transposed (y = x @ W).
    cls_b:    (3, NC)    stacked biases.
    Returns [x_many, x_medium, x_few], each (B, NC) float32.
    """
    x0, x1, x2 = branches
    B, C, H, W = x0.shape
    HW = H * W
    CHW = C * HW
    NC = cls_w.shape[-1]
    NCP = 128
    # TODO(synk): for 3*NC > 128 (e.g. ImageNet num_classes=1000) fold the branch
    # axis into M instead of packing all three classifiers into one lane tile.
    assert 3 * NC <= NCP, "packed classifier outputs must fit one 128-lane tile"

    in_dtype = x0.dtype
    xs = [b.reshape(B, CHW) for b in branches]   # contiguous reshape: free, no copy

    # GAP fused into the weights: W_hw[c*HW + s, i*NC + n] = cls_w[i, c, n] / HW,
    # packed block-diagonally across the 3 branches in the 128 output lanes.
    w_exp = jnp.repeat(cls_w.astype(jnp.float32) / HW, HW, axis=1)   # (3, C*HW, NC)
    w_blk = jnp.zeros((3, CHW, NCP), jnp.float32)
    b_blk = jnp.zeros((1, NCP), jnp.float32)
    for i in range(3):
        w_blk = w_blk.at[i, :, i * NC:(i + 1) * NC].set(w_exp[i])
        b_blk = b_blk.at[0, i * NC:(i + 1) * NC].set(cls_b[i].astype(jnp.float32))
    w_blk = w_blk.astype(in_dtype if in_dtype == jnp.bfloat16 else jnp.float32)

    # Generation-aware VMEM budgeting (v5e/v6e 128 MiB, v7x 64 MiB).
    cap = _vmem_capacity_bytes()
    budget = int(cap * 0.45)
    vmem_limit = int(cap * 0.75)
    in_item = jnp.dtype(in_dtype).itemsize
    w_item = jnp.dtype(w_blk.dtype).itemsize
    fixed = 2 * 3 * CHW * NCP * w_item + 2 * NCP * 4          # resident weights + bias
    per_row = 2 * 3 * CHW * in_item + 2 * NCP * 4             # dbl-buffered in + out
    TB = _pick_rows_tile(B, per_row, fixed, budget)
    grid = (pl.cdiv(B, TB),)

    out = pl.pallas_call(
        gap_fc_kernel,
        out_shape=jax.ShapeDtypeStruct((B, NCP), jnp.float32),
        grid=grid,
        in_specs=[
            pl.BlockSpec((TB, CHW), lambda i: (i, 0)),
            pl.BlockSpec((TB, CHW), lambda i: (i, 0)),
            pl.BlockSpec((TB, CHW), lambda i: (i, 0)),
            pl.BlockSpec((3, CHW, NCP), lambda i: (0, 0, 0)),
            pl.BlockSpec((1, NCP), lambda i: (0, 0)),
        ],
        out_specs=pl.BlockSpec((TB, NCP), lambda i: (i, 0)),
        compiler_params=pltpu.CompilerParams(
            dimension_semantics=("parallel",),
            vmem_limit_bytes=vmem_limit),
    )(xs[0], xs[1], xs[2], w_blk, b_blk)

    x_few = out[:, 0 * NC:1 * NC]
    x_medium = out[:, 1 * NC:2 * NC]
    x_many = out[:, 2 * NC:3 * NC]
    # torch order: [classifier_many(x[2]), classifier_medium(x[1]), classifier_few(x[0])]
    return [x_many, x_medium, x_few]


# ---------------------------------------------------------------------------
# Kernel 2: SubGroup = three chained 1x1 Conv1d, folded into one affine and
# applied in the NATIVE (B, C, L) layout (no wrapper transposes).
# ---------------------------------------------------------------------------
def subgroup_kernel(x_ref, w_ref, b_ref, o_ref):
    # x_ref/o_ref: (TB, C, TL)   w_ref: (C, C) folded   b_ref: (C, 1) f32
    w = w_ref[...]
    b = b_ref[...]

    def body(i, carry):
        y = jnp.dot(w, x_ref[i], preferred_element_type=jnp.float32) + b
        o_ref[i] = y.astype(o_ref.dtype)
        return carry

    jax.lax.fori_loop(0, x_ref.shape[0], body, 0, unroll=True)


def subgroup_forward(x, w1, b1, w2, b2, w3, b3):
    """x: (B, C, L); w*: (C, C) Conv1d weights (k=1 dim squeezed); b*: (C,).
    Returns (B, C, L) (input dtype) equal to feat3(feat2(feat1(x)))."""
    B, C, L = x.shape
    f32 = jnp.float32
    w1f, w2f, w3f = (w.astype(f32) for w in (w1, w2, w3))
    b1f, b2f, b3f = (b.astype(f32) for b in (b1, b2, b3))

    # Fold the pure affine chain once in the wrapper (tiny CxC matmuls).
    w_fold = w3f @ w2f @ w1f                         # (C, C)
    b_fold = w3f @ (w2f @ b1f + b2f) + b3f           # (C,)

    wk = w_fold.astype(jnp.bfloat16) if x.dtype == jnp.bfloat16 else w_fold
    bk = b_fold.reshape(C, 1)

    cap = _vmem_capacity_bytes()
    budget = int(cap * 0.45)
    vmem_limit = int(cap * 0.75)

    TL = L if L <= 512 else 512                      # lane tile (multiple of 128 when tiled)
    itemsize = jnp.dtype(x.dtype).itemsize
    per_b = 2 * C * TL * (itemsize + itemsize)       # dbl-buffered in + out per batch row
    fixed = 2 * C * C * jnp.dtype(wk.dtype).itemsize + 2 * C * 4
    TB = max(1, min(8, B, int(max(budget - fixed, per_b) // per_b)))

    grid = (pl.cdiv(B, TB), pl.cdiv(L, TL))          # ragged last blocks handled by Pallas

    y = pl.pallas_call(
        subgroup_kernel,
        out_shape=jax.ShapeDtypeStruct((B, C, L), x.dtype),
        grid=grid,
        in_specs=[
            pl.BlockSpec((TB, C, TL), lambda i, j: (i, 0, j)),
            pl.BlockSpec((C, C), lambda i, j: (0, 0)),
            pl.BlockSpec((C, 1), lambda i, j: (0, 0)),
        ],
        out_specs=pl.BlockSpec((TB, C, TL), lambda i, j: (i, 0, j)),
        compiler_params=pltpu.CompilerParams(
            dimension_semantics=("parallel", "parallel"),
            vmem_limit_bytes=vmem_limit),
    )(x, wk, bk)
    return y


# ---------------------------------------------------------------------------
if __name__ == "__main__":
    key = jax.random.PRNGKey(0)
    B, C, H, W, NC, L = 2, 64, 8, 8, 10, 8   # cifar-style: num_features=64

    k_feat, k_w, k_b, k_x1d, k_sub = jax.random.split(key, 5)

    # TODO(synk): the ResNet backbone is external to this file; we feed the
    # 3-branch backbone output directly (branch order [few, medium, many]).
    kb = jax.random.split(k_feat, 3)
    branches = [jax.random.normal(kb[i], (B, C, H, W), jnp.float32).astype(jnp.bfloat16)
                for i in range(3)]

    # Classifier params (nn.Linear default-style uniform init), stacked
    # [few, medium, many] and pre-transposed to (C, NC); weights kept in bf16.
    bound = 1.0 / (C ** 0.5)
    cls_w = jax.random.uniform(k_w, (3, C, NC), jnp.float32, -bound, bound).astype(jnp.bfloat16)
    cls_b = jax.random.uniform(k_b, (3, NC), jnp.float32, -bound, bound)

    outs = jax.block_until_ready(network_group_forward(branches, cls_w, cls_b))

    # Reference (plain JAX, f32 math on the same bf16-quantized values).
    xb = jnp.stack([b.astype(jnp.float32).reshape(B, C, H * W) for b in branches])
    pooled = jnp.mean(xb, axis=-1)                                           # (3, B, C)
    ref = jnp.einsum("ibc,icn->ibn", pooled, cls_w.astype(jnp.float32)) + cls_b[:, None, :]
    ref_list = [ref[2], ref[1], ref[0]]
    for got, want in zip(outs, ref_list):
        assert got.shape == (B, NC)
        assert jnp.allclose(got, want, atol=2e-2, rtol=2e-2), "GAP+FC mismatch"

    # SubGroup (three 1x1 Conv1d, no nonlinearity in between -> folded affine).
    x1d = jax.random.normal(k_x1d, (B, C, L), jnp.float32)
    ksub = jax.random.split(k_sub, 3)
    gain = (6.0 / (C + C)) ** 0.5  # xavier_uniform bound
    w1 = jax.random.uniform(ksub[0], (C, C), jnp.float32, -gain, gain)
    w2 = jax.random.uniform(ksub[1], (C, C), jnp.float32, -gain, gain)
    w3 = jax.random.uniform(ksub[2], (C, C), jnp.float32, -gain, gain)
    b1 = jnp.full((C,), 0.01, jnp.float32)
    b2 = jnp.full((C,), 0.01, jnp.float32)
    b3 = jnp.full((C,), 0.01, jnp.float32)

    y = jax.block_until_ready(subgroup_forward(x1d, w1, b1, w2, b2, w3, b3))

    def conv1x1_ref(x, w, b):  # x: (B,C,L), w: (C,C), b: (C,)
        return jnp.einsum("oc,bcl->bol", w, x) + b[None, :, None]

    y_ref = conv1x1_ref(conv1x1_ref(conv1x1_ref(x1d, w1, b1), w2, b2), w3, b3)
    assert y.shape == (B, C, L)
    assert jnp.allclose(y, y_ref, atol=1e-3, rtol=1e-3), "SubGroup mismatch"

    print("KERNEL_OK")
</pallas_src>

<mosaic_0001>
module attributes {stable_mosaic.version = 11 : i64} {
  func.func @gap_fc_kernel(%arg0: i32, %arg1: memref<2x4096xbf16, #tpu.memory_space<vmem>>, %arg2: memref<2x4096xbf16, #tpu.memory_space<vmem>>, %arg3: memref<2x4096xbf16, #tpu.memory_space<vmem>>, %arg4: memref<3x4096x128xbf16, #tpu.memory_space<vmem>>, %arg5: memref<1x128xf32, #tpu.memory_space<vmem>>, %arg6: memref<2x128xf32, #tpu.memory_space<vmem>>) attributes {dimension_semantics = [#tpu.dimension_semantics<parallel>], iteration_bounds = array<i64: 1>, scalar_prefetch = 0 : i64, scratch_operands = 0 : i64, tpu.core_type = #tpu.core_type<tc>, window_params = [{transform_indices = @transform_0, window_bounds = array<i64: 2, 4096>}, {transform_indices = @transform_1, window_bounds = array<i64: 2, 4096>}, {transform_indices = @transform_2, window_bounds = array<i64: 2, 4096>}, {pipeline_mode = #tpu.pipeline_mode<synchronous>, transform_indices = @transform_3, window_bounds = array<i64: 3, 4096, 128>}, {pipeline_mode = #tpu.pipeline_mode<synchronous>, transform_indices = @transform_4, window_bounds = array<i64: 1, 128>}, {transform_indices = @transform_5, window_bounds = array<i64: 2, 128>}]} {
    %c0 = arith.constant 0 : index
    %c0_0 = arith.constant 0 : index
    %0 = vector.load %arg1[%c0, %c0_0] : memref<2x4096xbf16, #tpu.memory_space<vmem>>, vector<2x4096xbf16>
    %c0_1 = arith.constant 0 : index
    %c0_2 = arith.constant 0 : index
    %c0_3 = arith.constant 0 : index
    %1 = vector.load %arg4[%c0_1, %c0_2, %c0_3] : memref<3x4096x128xbf16, #tpu.memory_space<vmem>>, vector<1x4096x128xbf16>
    %2 = vector.shape_cast %1 : vector<1x4096x128xbf16> to vector<4096x128xbf16>
    %cst = arith.constant dense<0.000000e+00> : vector<2x128xf32>
    %3 = tpu.matmul %0, %2, %cst {dimension_numbers = #tpu.dot_dimension_numbers<[1], [0], [0], [1], [0, 0, 1, 1], [], []>} : vector<2x4096xbf16>, vector<4096x128xbf16>, vector<2x128xf32> -> vector<2x128xf32>
    %c0_4 = arith.constant 0 : index
    %c0_5 = arith.constant 0 : index
    %4 = vector.load %arg2[%c0_4, %c0_5] : memref<2x4096xbf16, #tpu.memory_space<vmem>>, vector<2x4096xbf16>
    %c1 = arith.constant 1 : index
    %c0_6 = arith.constant 0 : index
    %c0_7 = arith.constant 0 : index
    %5 = vector.load %arg4[%c1, %c0_6, %c0_7] : memref<3x4096x128xbf16, #tpu.memory_space<vmem>>, vector<1x4096x128xbf16>
    %6 = vector.shape_cast %5 : vector<1x4096x128xbf16> to vector<4096x128xbf16>
    %cst_8 = arith.constant dense<0.000000e+00> : vector<2x128xf32>
    %7 = tpu.matmul %4, %6, %cst_8 {dimension_numbers = #tpu.dot_dimension_numbers<[1], [0], [0], [1], [0, 0, 1, 1], [], []>} : vector<2x4096xbf16>, vector<4096x128xbf16>, vector<2x128xf32> -> vector<2x128xf32>
    %8 = arith.addf %3, %7 : vector<2x128xf32>
    %c0_9 = arith.constant 0 : index
    %c0_10 = arith.constant 0 : index
    %9 = vector.load %arg3[%c0_9, %c0_10] : memref<2x4096xbf16, #tpu.memory_space<vmem>>, vector<2x4096xbf16>
    %c2 = arith.constant 2 : index
    %c0_11 = arith.constant 0 : index
    %c0_12 = arith.constant 0 : index
    %10 = vector.load %arg4[%c2, %c0_11, %c0_12] : memref<3x4096x128xbf16, #tpu.memory_space<vmem>>, vector<1x4096x128xbf16>
    %11 = vector.shape_cast %10 : vector<1x4096x128xbf16> to vector<4096x128xbf16>
    %cst_13 = arith.constant dense<0.000000e+00> : vector<2x128xf32>
    %12 = tpu.matmul %9, %11, %cst_13 {dimension_numbers = #tpu.dot_dimension_numbers<[1], [0], [0], [1], [0, 0, 1, 1], [], []>} : vector<2x4096xbf16>, vector<4096x128xbf16>, vector<2x128xf32> -> vector<2x128xf32>
    %13 = arith.addf %8, %12 : vector<2x128xf32>
    %c0_14 = arith.constant 0 : index
    %c0_15 = arith.constant 0 : index
    %14 = vector.load %arg5[%c0_14, %c0_15] : memref<1x128xf32, #tpu.memory_space<vmem>>, vector<1x128xf32>
    %15 = vector.broadcast %14 : vector<1x128xf32> to vector<2x128xf32>
    %16 = arith.addf %13, %15 : vector<2x128xf32>
    %c0_16 = arith.constant 0 : index
    %c0_17 = arith.constant 0 : index
    %17 = vector.load %arg6[%c0_16, %c0_17] : memref<2x128xf32, #tpu.memory_space<vmem>>, vector<2x128xf32>
    tpu.vector_store %arg6[%c0_16, %c0_17], %16 {strides = array<i32>} : memref<2x128xf32, #tpu.memory_space<vmem>>, vector<2x128xf32>,
    return
  }
  func.func @transform_0(%arg0: i32) -> (i32, i32) {
    %c0_i32 = arith.constant 0 : i32
    %c0_i32_0 = arith.constant 0 : i32
    return %arg0, %c0_i32 : i32, i32
  }
  func.func @transform_1(%arg0: i32) -> (i32, i32) {
    %c0_i32 = arith.constant 0 : i32
    %c0_i32_0 = arith.constant 0 : i32
    return %arg0, %c0_i32 : i32, i32
  }
  func.func @transform_2(%arg0: i32) -> (i32, i32) {
    %c0_i32 = arith.constant 0 : i32
    %c0_i32_0 = arith.constant 0 : i32
    return %arg0, %c0_i32 : i32, i32
  }
  func.func @transform_3(%arg0: i32) -> (i32, i32, i32) {
    %c0_i32 = arith.constant 0 : i32
    %c0_i32_0 = arith.constant 0 : i32
    %c0_i32_1 = arith.constant 0 : i32
    %c0_i32_2 = arith.constant 0 : i32
    return %c0_i32, %c0_i32_0, %c0_i32_1 : i32, i32, i32
  }
  func.func @transform_4(%arg0: i32) -> (i32, i32) {
    %c0_i32 = arith.constant 0 : i32
    %c0_i32_0 = arith.constant 0 : i32
    %c0_i32_1 = arith.constant 0 : i32
    return %c0_i32, %c0_i32_0 : i32, i32
  }
  func.func @transform_5(%arg0: i32) -> (i32, i32) {
    %c0_i32 = arith.constant 0 : i32
    %c0_i32_0 = arith.constant 0 : i32
    return %arg0, %c0_i32 : i32, i32
  }
}

</mosaic_0001>

<bundles_post_ra>
// kernel: tpu_custom_call.1
= control target key start
LH: loop header
LB: loop body
LE: loop exit
PB: predicated region body
PF: predicated region fallthrough
CT: control target
= control target key end

     0   :  { %10 = vsyncpa [#allocation3], 0  ;;  %s11823_s0 = inlined_call_operand.hbm [shape: bf16[2,4096], index: 0, kind: input, shape index: {}]   ;;  %s11824_s1 = inlined_call_operand.hbm [shape: bf16[2,4096], index: 1, kind: input, shape index: {}]   ;;  %s11825_s2 = inlined_call_operand.hbm [shape: bf16[2,4096], index: 2, kind: input, shape index: {}]   ;;  %s11826_s3 = inlined_call_operand.hbm [shape: bf16[3,4096,128], index: 3, kind: input, shape index: {}]   ;;  %s11827_s4 = inlined_call_operand.hbm [shape: f32[1,128], index: 4, kind: input, shape index: {}]   ;;  %s11828_s5 = inlined_call_operand.hbm [shape: f32[2,128], index: 5, kind: output, shape index: {}]  }
   0x1   :  { %11 = vsyncpa [#allocation6], 0 }
   0x2   :  { %12 = vsyncpa [#allocation9], 0  ;;  %s30_s20 = sshll.u32 %s11824_s1, 4  ;;  %s31_s20 = int_to_ptr.hbm [resolvable:$true] %s30_s20 }
   0x3   :  { %13 = vsyncpa [#allocation4], 0  ;;  %s11740_s21 = smov [#allocation5]   ;;  %s51_s25 = sshll.u32 %s11826_s3, 4  ;;  %s52_s25 = int_to_ptr.hbm [resolvable:$true] %s51_s25 }
   0x4   :  { %s32_s22 = sshll.u32 %s11740_s21, 4  ;;  %s11741_s26 = smov [#allocation8]   ;;  %s33_s22 = int_to_ptr.vmem [resolvable:$true] %s32_s22 }
   0x5   :  { %35 = dma.hbm_to_vmem [thread:$0]  %s31_s20, 512, %s33_s22, [#allocation6]  }
   0x6   :  { %s53_s27 = sshll.u32 %s11741_s26, 4  ;;  %s11742_s28 = smov 64   ;;  %s54_s27 = int_to_ptr.vmem [resolvable:$true] %s53_s27 }
   0x7   :  { %s11743_s29 = smov 4   ;;  %s19_s1 = sshll.u32 %s11823_s0, 4  ;;  %s20_s1 = int_to_ptr.hbm [resolvable:$true] %s19_s1 }
   0x8   :  { %59 = dma.hbm_to_vmem [thread:$0]  %s52_s25, 98304, %s54_s27, [#allocation9], %s11742_s28, %s11742_s28, %s11743_s29  }
   0x9   :  { %s11744_s7 = smov [#allocation2]   ;;  %s41_s3 = sshll.u32 %s11825_s2, 4  ;;  %s42_s3 = int_to_ptr.hbm [resolvable:$true] %s41_s3 }
   0xa   :  { %s21_s8 = sshll.u32 %s11744_s7, 4  ;;  %s11745_s11 = smov [#allocation7]   ;;  %s22_s8 = int_to_ptr.vmem [resolvable:$true] %s21_s8 }
   0xb   :  { %24 = dma.hbm_to_vmem [thread:$0]  %s20_s1, 512, %s22_s8, [#allocation3]  }
   0xc   :  { %s43_s12 = sshll.u32 %s11745_s11, 4  ;;  %s65_s15 = sshll.u32 %s11827_s4, 4  ;;  %s44_s12 = int_to_ptr.vmem [resolvable:$true] %s43_s12  ;;  %s66_s15 = int_to_ptr.hbm [resolvable:$true] %s65_s15 }
   0xd   :  { %46 = dma.hbm_to_vmem [thread:$0]  %s42_s3, 512, %s44_s12, [#allocation6]  }
   0xe   :  { %s11746_s0 = smov [#allocation10]  }
   0xf   :  { %s67_s16 = sshll.u32 %s11746_s0, 4  ;;  %s68_s16 = int_to_ptr.vmem [resolvable:$true] %s67_s16 }
  0x10   :  { %70 = dma.hbm_to_vmem [thread:$0]  %s66_s15, 16, %s68_s16, [#allocation9]  }
  0x11   :  { %11732 = dma.done.wait [#allocation3], 512  }
  0x12   :  { %11733 = vsyncadd [#allocation3], 4294966784 }
  0x13   :  { %11734 = dma.done.wait [#allocation6], 1024  }
  0x14   :  { %11735 = vsyncadd [#allocation6], 4294966272 }
  0x15   :  { %11736 = dma.done.wait [#allocation9], 98320  }
  0x16   :  { %11737 = vsyncadd [#allocation9], 4294868976  ;;  %v11074_v0 = vld [vmem:[#allocation8 + $0x838] sm:$0xff]  ;;  %v11073_v4 = vld [vmem:[#allocation8 + $0x830] sm:$0xff]  ;;  %s11747_s2 = smov [#allocation11]   ;;  %s7727_s19 = sshll.u32 %s11828_s5, 4  ;;  %s7728_s19 = int_to_ptr.hbm [resolvable:$true] %s7727_s19 }
  0x17   :  { %v11082_v1 = vld [vmem:[#allocation8 + $0x878] sm:$0xff]  ;;  %2732 = vmatpush.bf16.msra.mxu0 %v11074_v0  ;;  %v11081_v5 = vld [vmem:[#allocation8 + $0x870] sm:$0xff]  ;;  %v11072_v8 = vld [vmem:[#allocation8 + $0x828] sm:$0xff]  ;;  %s7725_s4 = sshll.u32 %s11747_s2, 4  ;;  %s7726_s4 = int_to_ptr.vmem [resolvable:$true] %s7725_s4 }
  0x18   :  { %v11090_v2 = vld [vmem:[#allocation8 + $0x8b8] sm:$0xff]  ;;  %2745 = vmatpush.bf16.msra.mxu1 %v11082_v1  ;;  %v11089_v6 = vld [vmem:[#allocation8 + $0x8b0] sm:$0xff]  ;;  %v11080_v9 = vld [vmem:[#allocation8 + $0x868] sm:$0xff] }
  0x19   :  { %v11098_v3 = vld [vmem:[#allocation8 + $0x8f8] sm:$0xff]  ;;  %2758 = vmatpush.bf16.msra.mxu2 %v11090_v2  ;;  %v11097_v7 = vld [vmem:[#allocation8 + $0x8f0] sm:$0xff]  ;;  %v11088_v10 = vld [vmem:[#allocation8 + $0x8a8] sm:$0xff] }
  0x1a   :  { %2771 = vmatpush.bf16.msra.mxu3 %v11098_v3  ;;  %v11096_v11 = vld [vmem:[#allocation8 + $0x8e8] sm:$0xff]  ;;  %v11071_v12 = vld [vmem:[#allocation8 + $0x820] sm:$0xff]  ;;  %v11070_v16 = vld [vmem:[#allocation8 + $0x818] sm:$0xff] }
  0x1b   :  { %2733 = vmatpush.bf16.msra.mxu0 %v11073_v4  ;;  %v11079_v13 = vld [vmem:[#allocation8 + $0x860] sm:$0xff]  ;;  %v11078_v17 = vld [vmem:[#allocation8 + $0x858] sm:$0xff]  ;;  %v11069_v21 = vld [vmem:[#allocation8 + $0x810] sm:$0xff] }
  0x1c   :  { %2746 = vmatpush.bf16.msra.mxu1 %v11081_v5  ;;  %v11087_v14 = vld [vmem:[#allocation8 + $0x8a0] sm:$0xff]  ;;  %v11086_v18 = vld [vmem:[#allocation8 + $0x898] sm:$0xff]  ;;  %v11077_v22 = vld [vmem:[#allocation8 + $0x850] sm:$0xff] }
  0x1d   :  { %2759 = vmatpush.bf16.msra.mxu2 %v11089_v6  ;;  %v11095_v15 = vld [vmem:[#allocation8 + $0x8e0] sm:$0xff]  ;;  %v11094_v19 = vld [vmem:[#allocation8 + $0x8d8] sm:$0xff]  ;;  %v11085_v23 = vld [vmem:[#allocation8 + $0x890] sm:$0xff] }
  0x1e   :  { %2772 = vmatpush.bf16.msra.mxu3 %v11097_v7  ;;  %v607_v20 = vld [vmem:[#allocation5] sm:$0xff]  ;;  %v11093_v24 = vld [vmem:[#allocation8 + $0x8d0] sm:$0xff]  ;;  %v11068_v25 = vld [vmem:[#allocation8 + $0x808] sm:$0xff] }
  0x1f   :  { %2734 = vmatpush.bf16.msra.mxu0 %v11072_v8  ;;  %1125 = vst [vmem:[#allocation1] ss:$9 sm:$0xff] %v607_v20  ;;  %v11076_v26 = vld [vmem:[#allocation8 + $0x848] sm:$0xff]  ;;  %v11067_v29 = vld [vmem:[#allocation8 + $0x800] sm:$0xff]  ;;  %v11106_v33 = vld [vmem:[#allocation8 + $0x938] sm:$0xff] }
  0x20   :  { %2747 = vmatpush.bf16.msra.mxu1 %v11080_v9  ;;  %v11084_v27 = vld [vmem:[#allocation8 + $0x888] sm:$0xff]  ;;  %v11075_v30 = vld [vmem:[#allocation8 + $0x840] sm:$0xff]  ;;  %v11114_v34 = vld [vmem:[#allocation8 + $0x978] sm:$0xff] }
  0x21   :  { %2760 = vmatpush.bf16.msra.mxu2 %v11088_v10  ;;  %v11092_v28 = vld [vmem:[#allocation8 + $0x8c8] sm:$0xff]  ;;  %v11083_v31 = vld [vmem:[#allocation8 + $0x880] sm:$0xff]  ;;  %v11122_v35 = vld [vmem:[#allocation8 + $0x9b8] sm:$0xff] }
  0x22   :  { %2773 = vmatpush.bf16.msra.mxu3 %v11096_v11  ;;  %v11091_v32 = vld [vmem:[#allocation8 + $0x8c0] sm:$0xff]  ;;  %v11130_v36 = vld [vmem:[#allocation8 + $0x9f8] sm:$0xff]  ;;  %v11105_v37 = vld [vmem:[#allocation8 + $0x930] sm:$0xff] }
  0x23   :  { %2735 = vmatpush.bf16.msra.mxu0 %v11071_v12  ;;  %v11113_v40 = vld [vmem:[#allocation8 + $0x970] sm:$0xff]  ;;  %v11104_v45 = vld [vmem:[#allocation8 + $0x928] sm:$0xff]  ;;  %v11103_v49 = vld [vmem:[#allocation8 + $0x920] sm:$0xff] }
  0x24   :  { %2748 = vmatpush.bf16.msra.mxu1 %v11079_v13  ;;  %v11121_v43 = vld [vmem:[#allocation8 + $0x9b0] sm:$0xff]  ;;  %v11112_v46 = vld [vmem:[#allocation8 + $0x968] sm:$0xff]  ;;  %v11111_v50 = vld [vmem:[#allocation8 + $0x960] sm:$0xff] }
  0x25   :  { %2761 = vmatpush.bf16.msra.mxu2 %v11087_v14  ;;  %v11129_v44 = vld [vmem:[#allocation8 + $0x9f0] sm:$0xff]  ;;  %v11120_v47 = vld [vmem:[#allocation8 + $0x9a8] sm:$0xff]  ;;  %v11119_v51 = vld [vmem:[#allocation8 + $0x9a0] sm:$0xff] }
  0x26   :  { %2774 = vmatpush.bf16.msra.mxu3 %v11095_v15  ;;  %v1128_v38 = vld [vmem:[#allocation1 + $0x12] sm:$0xff]  ;;  %v1126_v39 = vld [vmem:[#allocation1] sm:$0xff]  ;;  %v1127_v42 = vld [vmem:[#allocation1 + $0x9] sm:$0xff] }
  0x27   :  { %2736 = vmatpush.bf16.msra.mxu0 %v11070_v16  ;;  %v1129_v41 = vld [vmem:[#allocation1 + $0x1b] sm:$0xff]  ;;  %v11128_v48 = vld [vmem:[#allocation8 + $0x9e8] sm:$0xff]  ;;  %v11127_v52 = vld [vmem:[#allocation8 + $0x9e0] sm:$0xff] }
  0x28   :  { %2749 = vmatpush.bf16.msra.mxu1 %v11078_v17  ;;  %v11102_v53 = vld [vmem:[#allocation8 + $0x918] sm:$0xff]  ;;  %v11101_v57 = vld [vmem:[#allocation8 + $0x910] sm:$0xff]  ;;  %v11100_v61 = vld [vmem:[#allocation8 + $0x908] sm:$0xff] }
  0x29   :  { %2762 = vmatpush.bf16.msra.mxu2 %v11086_v18  ;;  %v11110_v54 = vld [vmem:[#allocation8 + $0x958] sm:$0xff]  ;;  %v11109_v58 = vld [vmem:[#allocation8 + $0x950] sm:$0xff]  ;;  %v11108_v62 = vld [vmem:[#allocation8 + $0x948] sm:$0xff] }
  0x2a   :  { %2775 = vmatpush.bf16.msra.mxu3 %v11094_v19  ;;  %v11118_v55 = vld [vmem:[#allocation8 + $0x998] sm:$0xff]  ;;  %v11117_v59 = vld [vmem:[#allocation8 + $0x990] sm:$0xff]  ;;  %v11116_v63 = vld [vmem:[#allocation8 + $0x988] sm:$0xff] }
  0x2b   :  { %2737 = vmatpush.bf16.msra.mxu0 %v11069_v21  ;;  %v11126_v56 = vld [vmem:[#allocation8 + $0x9d8] sm:$0xff]  ;;  %v11125_v60 = vld [vmem:[#allocation8 + $0x9d0] sm:$0xff]  ;;  %v11124_v0 = vld [vmem:[#allocation8 + $0x9c8] sm:$0xff] }
  0x2c   :  { %2750 = vmatpush.bf16.msra.mxu1 %v11077_v22  ;;  %v1132_v1 = vld [vmem:[#allocation1 + $0x36] sm:$0xff]  ;;  %v1130_v2 = vld [vmem:[#allocation1 + $0x24] sm:$0xff]  ;;  %v1131_v4 = vld [vmem:[#allocation1 + $0x2d] sm:$0xff] }
  0x2d   :  { %2763 = vmatpush.bf16.msra.mxu2 %v11085_v23  ;;  %v1133_v3 = vld [vmem:[#allocation1 + $0x3f] sm:$0xff]  ;;  %v608_v5 = vld [vmem:[#allocation5 + $0x8] sm:$0xff]  ;;  %v11099_v6 = vld [vmem:[#allocation8 + $0x900] sm:$0xff] }
  0x2e   :  { %2776 = vmatpush.bf16.msra.mxu3 %v11093_v24  ;;  %1135 = vst [vmem:[#allocation1] ss:$9 sm:$0xff] %v608_v5  ;;  %v11107_v7 = vld [vmem:[#allocation8 + $0x940] sm:$0xff]  ;;  %v11138_v10 = vld [vmem:[#allocation8 + $0xa38] sm:$0xff]  ;;  %v11137_v14 = vld [vmem:[#allocation8 + $0xa30] sm:$0xff] }
  0x2f   :  { %2738 = vmatpush.bf16.msra.mxu0 %v11068_v25  ;;  %v11115_v8 = vld [vmem:[#allocation8 + $0x980] sm:$0xff]  ;;  %v11146_v11 = vld [vmem:[#allocation8 + $0xa78] sm:$0xff]  ;;  %v11145_v15 = vld [vmem:[#allocation8 + $0xa70] sm:$0xff] }
  0x30   :  { %2751 = vmatpush.bf16.msra.mxu1 %v11076_v26  ;;  %v11123_v9 = vld [vmem:[#allocation8 + $0x9c0] sm:$0xff]  ;;  %v11154_v12 = vld [vmem:[#allocation8 + $0xab8] sm:$0xff]  ;;  %v11153_v16 = vld [vmem:[#allocation8 + $0xab0] sm:$0xff] }
  0x31   :  { %2764 = vmatpush.bf16.msra.mxu2 %v11084_v27  ;;  %v11162_v13 = vld [vmem:[#allocation8 + $0xaf8] sm:$0xff]  ;;  %v11161_v17 = vld [vmem:[#allocation8 + $0xaf0] sm:$0xff]  ;;  %v11136_v18 = vld [vmem:[#allocation8 + $0xa28] sm:$0xff] }
  0x32   :  { %2777 = vmatpush.bf16.msra.mxu3 %v11092_v28  ;;  %v11144_v19 = vld [vmem:[#allocation8 + $0xa68] sm:$0xff]  ;;  %v11135_v22 = vld [vmem:[#allocation8 + $0xa20] sm:$0xff]  ;;  %v11134_v26 = vld [vmem:[#allocation8 + $0xa18] sm:$0xff] }
  0x33   :  { %2739 = vmatpush.bf16.msra.mxu0 %v11067_v29  ;;  %v11152_v20 = vld [vmem:[#allocation8 + $0xaa8] sm:$0xff]  ;;  %v11143_v23 = vld [vmem:[#allocation8 + $0xa60] sm:$0xff]  ;;  %v11142_v27 = vld [vmem:[#allocation8 + $0xa58] sm:$0xff] }
  0x34   :  { %2752 = vmatpush.bf16.msra.mxu1 %v11075_v30  ;;  %v11160_v21 = vld [vmem:[#allocation8 + $0xae8] sm:$0xff]  ;;  %v11151_v24 = vld [vmem:[#allocation8 + $0xaa0] sm:$0xff]  ;;  %v11150_v28 = vld [vmem:[#allocation8 + $0xa98] sm:$0xff] }
  0x35   :  { %2765 = vmatpush.bf16.msra.mxu2 %v11083_v31  ;;  %v11159_v25 = vld [vmem:[#allocation8 + $0xae0] sm:$0xff]  ;;  %v11158_v29 = vld [vmem:[#allocation8 + $0xad8] sm:$0xff]  ;;  %v11133_v30 = vld [vmem:[#allocation8 + $0xa10] sm:$0xff] }
  0x36   :  { %2778 = vmatpush.bf16.msra.mxu3 %v11091_v32  ;;  %2740 = vmatmul.bf16.vlgmr.msra.gmra.mxu0 %v1126_v39  ;;  %v11141_v31 = vld [vmem:[#allocation8 + $0xa50] sm:$0xff]  ;;  %v11139_v39 = vld [vmem:[#allocation8 + $0xa40] sm:$0xff] }
  0x37   :  { %2784 = vmatpush.bf16.msrb.mxu0 %v11106_v33  ;;  %2753 = vmatmul.bf16.vlgmr.msra.gmra.mxu1 %v1127_v42  ;;  %v11149_v32 = vld [vmem:[#allocation8 + $0xa90] sm:$0xff]  ;;  %v11170_v42 = vld [vmem:[#allocation8 + $0xb38] sm:$0xff] }
  0x38   :  { %2797 = vmatpush.bf16.msrb.mxu1 %v11114_v34  ;;  %2766 = vmatmul.bf16.vlgmr.msra.gmra.mxu2 %v1128_v38  ;;  %v11157_v33 = vld [vmem:[#allocation8 + $0xad0] sm:$0xff]  ;;  %v11132_v34 = vld [vmem:[#allocation8 + $0xa08] sm:$0xff]  ;;  %v11131_v38 = vld [vmem:[#allocation8 + $0xa00] sm:$0xff] }
  0x39   :  { %2810 = vmatpush.bf16.msrb.mxu2 %v11122_v35  ;;  %2779 = vmatmul.bf16.vlgmr.msra.gmra.mxu3 %v1129_v41  ;;  %v11140_v35 = vld [vmem:[#allocation8 + $0xa48] sm:$0xff]  ;;  %v11155_v41 = vld [vmem:[#allocation8 + $0xac0] sm:$0xff]  ;;  %v11189_v5 = vld [vmem:[#allocation8 + $0xbd0] sm:$0xff] }
  0x3a   :  { %2823 = vmatpush.bf16.msrb.mxu3 %v11130_v36  ;;  %v11148_v36 = vld [vmem:[#allocation8 + $0xa88] sm:$0xff] }
  0x3b   :  { %2785 = vmatpush.bf16.msrb.mxu0 %v11105_v37  ;;  %v11156_v37 = vld [vmem:[#allocation8 + $0xac8] sm:$0xff] }
  0x3c   :  { %2798 = vmatpush.bf16.msrb.mxu1 %v11113_v40  ;;  %v11147_v40 = vld [vmem:[#allocation8 + $0xa80] sm:$0xff] }
  0x3d   :  { %2811 = vmatpush.bf16.msrb.mxu2 %v11121_v43  ;;  %v11178_v43 = vld [vmem:[#allocation8 + $0xb78] sm:$0xff] }
  0x3e   :  { %2824 = vmatpush.bf16.msrb.mxu3 %v11129_v44  ;;  %v11186_v44 = vld [vmem:[#allocation8 + $0xbb8] sm:$0xff] }
  0x3f   :  { %2786 = vmatpush.bf16.msrb.mxu0 %v11104_v45  ;;  %v11194_v45 = vld [vmem:[#allocation8 + $0xbf8] sm:$0xff] }
  0x40   :  { %2799 = vmatpush.bf16.msrb.mxu1 %v11112_v46  ;;  %v1136_v46 = vld [vmem:[#allocation1] sm:$0xff] }
  0x41   :  { %2812 = vmatpush.bf16.msrb.mxu2 %v11120_v47  ;;  %v1138_v47 = vld [vmem:[#allocation1 + $0x12] sm:$0xff] }
  0x42   :  { %2825 = vmatpush.bf16.msrb.mxu3 %v11128_v48  ;;  %v1137_v48 = vld [vmem:[#allocation1 + $0x9] sm:$0xff] }
  0x43   :  { %2787 = vmatpush.bf16.msrb.mxu0 %v11103_v49  ;;  %v1139_v49 = vld [vmem:[#allocation1 + $0x1b] sm:$0xff] }
  0x44   :  { %2800 = vmatpush.bf16.msrb.mxu1 %v11111_v50  ;;  %v11169_v50 = vld [vmem:[#allocation8 + $0xb30] sm:$0xff] }
  0x45   :  { %2813 = vmatpush.bf16.msrb.mxu2 %v11119_v51  ;;  %v11177_v51 = vld [vmem:[#allocation8 + $0xb70] sm:$0xff] }
  0x46   :  { %2826 = vmatpush.bf16.msrb.mxu3 %v11127_v52  ;;  %v11185_v52 = vld [vmem:[#allocation8 + $0xbb0] sm:$0xff] }
  0x47   :  { %2788 = vmatpush.bf16.msrb.mxu0 %v11102_v53  ;;  %v11193_v53 = vld [vmem:[#allocation8 + $0xbf0] sm:$0xff] }
  0x48   :  { %2801 = vmatpush.bf16.msrb.mxu1 %v11110_v54  ;;  %v11168_v54 = vld [vmem:[#allocation8 + $0xb28] sm:$0xff] }
  0x49   :  { %2814 = vmatpush.bf16.msrb.mxu2 %v11118_v55  ;;  %v11176_v55 = vld [vmem:[#allocation8 + $0xb68] sm:$0xff] }
  0x4a   :  { %2827 = vmatpush.bf16.msrb.mxu3 %v11126_v56  ;;  %v11184_v56 = vld [vmem:[#allocation8 + $0xba8] sm:$0xff] }
  0x4b   :  { %2789 = vmatpush.bf16.msrb.mxu0 %v11101_v57  ;;  %v11192_v57 = vld [vmem:[#allocation8 + $0xbe8] sm:$0xff] }
  0x4c   :  { %2802 = vmatpush.bf16.msrb.mxu1 %v11109_v58  ;;  %v11167_v58 = vld [vmem:[#allocation8 + $0xb20] sm:$0xff] }
  0x4d   :  { %2815 = vmatpush.bf16.msrb.mxu2 %v11117_v59  ;;  %v11175_v59 = vld [vmem:[#allocation8 + $0xb60] sm:$0xff] }
  0x4e   :  { %2828 = vmatpush.bf16.msrb.mxu3 %v11125_v60  ;;  %v11183_v60 = vld [vmem:[#allocation8 + $0xba0] sm:$0xff] }
  0x4f   :  { %2790 = vmatpush.bf16.msrb.mxu0 %v11100_v61  ;;  %v11191_v61 = vld [vmem:[#allocation8 + $0xbe0] sm:$0xff] }
  0x50   :  { %2803 = vmatpush.bf16.msrb.mxu1 %v11108_v62  ;;  %v11166_v62 = vld [vmem:[#allocation8 + $0xb18] sm:$0xff] }
  0x51   :  { %2816 = vmatpush.bf16.msrb.mxu2 %v11116_v63  ;;  %v11174_v63 = vld [vmem:[#allocation8 + $0xb58] sm:$0xff] }
  0x52   :  { %2829 = vmatpush.bf16.msrb.mxu3 %v11124_v0  ;;  %v11182_v0 = vld [vmem:[#allocation8 + $0xb98] sm:$0xff] }
  0x53   :  { %2791 = vmatpush.bf16.msrb.mxu0 %v11099_v6  ;;  %v11164_v6 = vld [vmem:[#allocation8 + $0xb08] sm:$0xff] }
  0x54   :  { %2804 = vmatpush.bf16.msrb.mxu1 %v11107_v7  ;;  %v11172_v7 = vld [vmem:[#allocation8 + $0xb48] sm:$0xff] }
  0x55   :  { %2817 = vmatpush.bf16.msrb.mxu2 %v11115_v8  ;;  %v11180_v8 = vld [vmem:[#allocation8 + $0xb88] sm:$0xff] }
  0x56   :  { %2830 = vmatpush.bf16.msrb.mxu3 %v11123_v9  ;;  %2792 = vmatmul.bf16.vlgmr.msrb.gmra.mxu0 %v1130_v2  ;;  %v11165_v2 = vld [vmem:[#allocation8 + $0xb10] sm:$0xff]  ;;  %v11188_v9 = vld [vmem:[#allocation8 + $0xbc8] sm:$0xff] }
  0x57   :  { %2836 = vmatpush.bf16.msra.mxu0 %v11138_v10  ;;  %2805 = vmatmul.bf16.vlgmr.msrb.gmra.mxu1 %v1131_v4  ;;  %v11181_v4 = vld [vmem:[#allocation8 + $0xb90] sm:$0xff]  ;;  %v1140_v10 = vld [vmem:[#allocation1 + $0x24] sm:$0xff] }
  0x58   :  { %2849 = vmatpush.bf16.msra.mxu1 %v11146_v11  ;;  %2818 = vmatmul.bf16.vlgmr.msrb.gmra.mxu2 %v1132_v1  ;;  %v11190_v1 = vld [vmem:[#allocation8 + $0xbd8] sm:$0xff]  ;;  %v1142_v11 = vld [vmem:[#allocation1 + $0x36] sm:$0xff] }
  0x59   :  { %2862 = vmatpush.bf16.msra.mxu2 %v11154_v12  ;;  %2831 = vmatmul.bf16.vlgmr.msrb.gmra.mxu3 %v1133_v3  ;;  %v11173_v3 = vld [vmem:[#allocation8 + $0xb50] sm:$0xff]  ;;  %v1141_v12 = vld [vmem:[#allocation1 + $0x2d] sm:$0xff] }
  0x5a   :  { %2875 = vmatpush.bf16.msra.mxu3 %v11162_v13  ;;  %v1143_v13 = vld [vmem:[#allocation1 + $0x3f] sm:$0xff] }
  0x5b   :  { %2837 = vmatpush.bf16.msra.mxu0 %v11137_v14  ;;  %v609_v14 = vld [vmem:[#allocation5 + $0x10] sm:$0xff] }
  0x5c   :  { %2850 = vmatpush.bf16.msra.mxu1 %v11145_v15  ;;  %1145 = vst [vmem:[#allocation1] ss:$9 sm:$0xff] %v609_v14  ;;  %v11163_v15 = vld [vmem:[#allocation8 + $0xb00] sm:$0xff] }
  0x5d   :  { %2863 = vmatpush.bf16.msra.mxu2 %v11153_v16  ;;  %v11171_v16 = vld [vmem:[#allocation8 + $0xb40] sm:$0xff] }
  0x5e   :  { %2876 = vmatpush.bf16.msra.mxu3 %v11161_v17  ;;  %v11179_v17 = vld [vmem:[#allocation8 + $0xb80] sm:$0xff] }
  0x5f   :  { %2838 = vmatpush.bf16.msra.mxu0 %v11136_v18  ;;  %v11187_v18 = vld [vmem:[#allocation8 + $0xbc0] sm:$0xff] }
  0x60   :  { %2851 = vmatpush.bf16.msra.mxu1 %v11144_v19  ;;  %v11202_v19 = vld [vmem:[#allocation8 + $0xc38] sm:$0xff] }
  0x61   :  { %2864 = vmatpush.bf16.msra.mxu2 %v11152_v20  ;;  %v11210_v20 = vld [vmem:[#allocation8 + $0xc78] sm:$0xff] }
  0x62   :  { %2877 = vmatpush.bf16.msra.mxu3 %v11160_v21  ;;  %v11218_v21 = vld [vmem:[#allocation8 + $0xcb8] sm:$0xff] }
  0x63   :  { %2839 = vmatpush.bf16.msra.mxu0 %v11135_v22  ;;  %v11226_v22 = vld [vmem:[#allocation8 + $0xcf8] sm:$0xff] }
  0x64   :  { %2852 = vmatpush.bf16.msra.mxu1 %v11143_v23  ;;  %v11201_v23 = vld [vmem:[#allocation8 + $0xc30] sm:$0xff] }
  0x65   :  { %2865 = vmatpush.bf16.msra.mxu2 %v11151_v24  ;;  %v11209_v24 = vld [vmem:[#allocation8 + $0xc70] sm:$0xff] }
  0x66   :  { %2878 = vmatpush.bf16.msra.mxu3 %v11159_v25  ;;  %v11217_v25 = vld [vmem:[#allocation8 + $0xcb0] sm:$0xff] }
  0x67   :  { %2840 = vmatpush.bf16.msra.mxu0 %v11134_v26  ;;  %v11225_v26 = vld [vmem:[#allocation8 + $0xcf0] sm:$0xff] }
  0x68   :  { %2853 = vmatpush.bf16.msra.mxu1 %v11142_v27  ;;  %v11200_v27 = vld [vmem:[#allocation8 + $0xc28] sm:$0xff] }
  0x69   :  { %2866 = vmatpush.bf16.msra.mxu2 %v11150_v28  ;;  %v11208_v28 = vld [vmem:[#allocation8 + $0xc68] sm:$0xff] }
  0x6a   :  { %2879 = vmatpush.bf16.msra.mxu3 %v11158_v29  ;;  %v11216_v29 = vld [vmem:[#allocation8 + $0xca8] sm:$0xff] }
  0x6b   :  { %2841 = vmatpush.bf16.msra.mxu0 %v11133_v30  ;;  %v11224_v30 = vld [vmem:[#allocation8 + $0xce8] sm:$0xff] }
  0x6c   :  { %2854 = vmatpush.bf16.msra.mxu1 %v11141_v31  ;;  %v11199_v31 = vld [vmem:[#allocation8 + $0xc20] sm:$0xff] }
  0x6d   :  { %2867 = vmatpush.bf16.msra.mxu2 %v11149_v32  ;;  %v11207_v32 = vld [vmem:[#allocation8 + $0xc60] sm:$0xff] }
  0x6e   :  { %2880 = vmatpush.bf16.msra.mxu3 %v11157_v33  ;;  %v11215_v33 = vld [vmem:[#allocation8 + $0xca0] sm:$0xff] }
  0x6f   :  { %2842 = vmatpush.bf16.msra.mxu0 %v11132_v34  ;;  %v11223_v34 = vld [vmem:[#allocation8 + $0xce0] sm:$0xff] }
  0x70   :  { %2855 = vmatpush.bf16.msra.mxu1 %v11140_v35  ;;  %v11198_v35 = vld [vmem:[#allocation8 + $0xc18] sm:$0xff] }
  0x71   :  { %2868 = vmatpush.bf16.msra.mxu2 %v11148_v36  ;;  %v11206_v36 = vld [vmem:[#allocation8 + $0xc58] sm:$0xff] }
  0x72   :  { %2881 = vmatpush.bf16.msra.mxu3 %v11156_v37  ;;  %v11214_v37 = vld [vmem:[#allocation8 + $0xc98] sm:$0xff] }
  0x73   :  { %2843 = vmatpush.bf16.msra.mxu0 %v11131_v38  ;;  %v11222_v38 = vld [vmem:[#allocation8 + $0xcd8] sm:$0xff] }
  0x74   :  { %2856 = vmatpush.bf16.msra.mxu1 %v11139_v39  ;;  %v11197_v39 = vld [vmem:[#allocation8 + $0xc10] sm:$0xff] }
  0x75   :  { %2869 = vmatpush.bf16.msra.mxu2 %v11147_v40  ;;  %v11205_v40 = vld [vmem:[#allocation8 + $0xc50] sm:$0xff] }
  0x76   :  { %2882 = vmatpush.bf16.msra.mxu3 %v11155_v41  ;;  %2844 = vmatmul.bf16.vlgmr.msra.gmra.mxu0 %v1136_v46  ;;  %v11213_v41 = vld [vmem:[#allocation8 + $0xc90] sm:$0xff]  ;;  %v11220_v46 = vld [vmem:[#allocation8 + $0xcc8] sm:$0xff] }
  0x77   :  { %2888 = vmatpush.bf16.msrb.mxu0 %v11170_v42  ;;  %2857 = vmatmul.bf16.vlgmr.msra.gmra.mxu1 %v1137_v48  ;;  %v11221_v42 = vld [vmem:[#allocation8 + $0xcd0] sm:$0xff]  ;;  %v11203_v48 = vld [vmem:[#allocation8 + $0xc40] sm:$0xff] }
  0x78   :  { %2901 = vmatpush.bf16.msrb.mxu1 %v11178_v43  ;;  %2870 = vmatmul.bf16.vlgmr.msra.gmra.mxu2 %v1138_v47  ;;  %v11196_v43 = vld [vmem:[#allocation8 + $0xc08] sm:$0xff]  ;;  %v11195_v47 = vld [vmem:[#allocation8 + $0xc00] sm:$0xff] }
  0x79   :  { %2914 = vmatpush.bf16.msrb.mxu2 %v11186_v44  ;;  %2883 = vmatmul.bf16.vlgmr.msra.gmra.mxu3 %v1139_v49  ;;  %v11204_v44 = vld [vmem:[#allocation8 + $0xc48] sm:$0xff]  ;;  %v11211_v49 = vld [vmem:[#allocation8 + $0xc80] sm:$0xff] }
  0x7a   :  { %2927 = vmatpush.bf16.msrb.mxu3 %v11194_v45  ;;  %v11212_v45 = vld [vmem:[#allocation8 + $0xc88] sm:$0xff] }
  0x7b   :  { %2889 = vmatpush.bf16.msrb.mxu0 %v11169_v50  ;;  %v11219_v50 = vld [vmem:[#allocation8 + $0xcc0] sm:$0xff] }
  0x7c   :  { %2902 = vmatpush.bf16.msrb.mxu1 %v11177_v51  ;;  %v11234_v51 = vld [vmem:[#allocation8 + $0xd38] sm:$0xff] }
  0x7d   :  { %2915 = vmatpush.bf16.msrb.mxu2 %v11185_v52  ;;  %v11242_v52 = vld [vmem:[#allocation8 + $0xd78] sm:$0xff] }
  0x7e   :  { %2928 = vmatpush.bf16.msrb.mxu3 %v11193_v53  ;;  %v11250_v53 = vld [vmem:[#allocation8 + $0xdb8] sm:$0xff] }
  0x7f   :  { %2890 = vmatpush.bf16.msrb.mxu0 %v11168_v54  ;;  %v11258_v54 = vld [vmem:[#allocation8 + $0xdf8] sm:$0xff] }
  0x80   :  { %2903 = vmatpush.bf16.msrb.mxu1 %v11176_v55  ;;  %v1146_v55 = vld [vmem:[#allocation1] sm:$0xff] }
  0x81   :  { %2916 = vmatpush.bf16.msrb.mxu2 %v11184_v56  ;;  %v1148_v56 = vld [vmem:[#allocation1 + $0x12] sm:$0xff] }
  0x82   :  { %2929 = vmatpush.bf16.msrb.mxu3 %v11192_v57  ;;  %v1147_v57 = vld [vmem:[#allocation1 + $0x9] sm:$0xff] }
  0x83   :  { %2891 = vmatpush.bf16.msrb.mxu0 %v11167_v58  ;;  %v1149_v58 = vld [vmem:[#allocation1 + $0x1b] sm:$0xff] }
  0x84   :  { %2904 = vmatpush.bf16.msrb.mxu1 %v11175_v59  ;;  %v11233_v59 = vld [vmem:[#allocation8 + $0xd30] sm:$0xff] }
  0x85   :  { %2917 = vmatpush.bf16.msrb.mxu2 %v11183_v60  ;;  %v11241_v60 = vld [vmem:[#allocation8 + $0xd70] sm:$0xff] }
  0x86   :  { %2930 = vmatpush.bf16.msrb.mxu3 %v11191_v61  ;;  %v11249_v61 = vld [vmem:[#allocation8 + $0xdb0] sm:$0xff] }
  0x87   :  { %2892 = vmatpush.bf16.msrb.mxu0 %v11166_v62  ;;  %v11257_v62 = vld [vmem:[#allocation8 + $0xdf0] sm:$0xff] }
  0x88   :  { %2905 = vmatpush.bf16.msrb.mxu1 %v11174_v63  ;;  %v11232_v63 = vld [vmem:[#allocation8 + $0xd28] sm:$0xff] }
  0x89   :  { %2918 = vmatpush.bf16.msrb.mxu2 %v11182_v0  ;;  %v11240_v0 = vld [vmem:[#allocation8 + $0xd68] sm:$0xff] }
  0x8a   :  { %2931 = vmatpush.bf16.msrb.mxu3 %v11190_v1  ;;  %v11248_v1 = vld [vmem:[#allocation8 + $0xda8] sm:$0xff] }
  0x8b   :  { %2893 = vmatpush.bf16.msrb.mxu0 %v11165_v2  ;;  %v11256_v2 = vld [vmem:[#allocation8 + $0xde8] sm:$0xff] }
  0x8c   :  { %2906 = vmatpush.bf16.msrb.mxu1 %v11173_v3 }
  0x8d   :  { %2919 = vmatpush.bf16.msrb.mxu2 %v11181_v4  ;;  %v11231_v4 = vld [vmem:[#allocation8 + $0xd20] sm:$0xff] }
  0x8e   :  { %2932 = vmatpush.bf16.msrb.mxu3 %v11189_v5  ;;  %v11239_v5 = vld [vmem:[#allocation8 + $0xd60] sm:$0xff] }
  0x8f   :  { %2894 = vmatpush.bf16.msrb.mxu0 %v11164_v6 }
  0x90   :  { %2907 = vmatpush.bf16.msrb.mxu1 %v11172_v7  ;;  %v11247_v7 = vld [vmem:[#allocation8 + $0xda0] sm:$0xff] }
  0x91   :  { %2920 = vmatpush.bf16.msrb.mxu2 %v11180_v8  ;;  %v11255_v8 = vld [vmem:[#allocation8 + $0xde0] sm:$0xff] }
  0x92   :  { %2933 = vmatpush.bf16.msrb.mxu3 %v11188_v9 }
  0x93   :  { %2895 = vmatpush.bf16.msrb.mxu0 %v11163_v15 }
  0x94   :  { %2908 = vmatpush.bf16.msrb.mxu1 %v11171_v16 }
  0x95   :  { %2921 = vmatpush.bf16.msrb.mxu2 %v11179_v17 }
  0x96   :  { %2934 = vmatpush.bf16.msrb.mxu3 %v11187_v18  ;;  %2896 = vmatmul.bf16.vlgmr.msrb.gmra.mxu0 %v1140_v10  ;;  %v11230_v10 = vld [vmem:[#allocation8 + $0xd18] sm:$0xff]  ;;  %v11229_v18 = vld [vmem:[#allocation8 + $0xd10] sm:$0xff] }
  0x97   :  { %2940 = vmatpush.bf16.msra.mxu0 %v11202_v19  ;;  %2909 = vmatmul.bf16.vlgmr.msrb.gmra.mxu1 %v1141_v12  ;;  %v11246_v12 = vld [vmem:[#allocation8 + $0xd98] sm:$0xff]  ;;  %v11237_v19 = vld [vmem:[#allocation8 + $0xd50] sm:$0xff] }
  0x98   :  { %2953 = vmatpush.bf16.msra.mxu1 %v11210_v20  ;;  %2922 = vmatmul.bf16.vlgmr.msrb.gmra.mxu2 %v1142_v11  ;;  %v11238_v11 = vld [vmem:[#allocation8 + $0xd58] sm:$0xff] }
  0x99   :  { %2966 = vmatpush.bf16.msra.mxu2 %v11218_v21  ;;  %2935 = vmatmul.bf16.vlgmr.msrb.gmra.mxu3 %v1143_v13  ;;  %v11254_v13 = vld [vmem:[#allocation8 + $0xdd8] sm:$0xff] }
  0x9a   :  { %2979 = vmatpush.bf16.msra.mxu3 %v11226_v22  ;;  %v11245_v22 = vld [vmem:[#allocation8 + $0xd90] sm:$0xff] }
  0x9b   :  { %2941 = vmatpush.bf16.msra.mxu0 %v11201_v23  ;;  %v11253_v23 = vld [vmem:[#allocation8 + $0xdd0] sm:$0xff] }
  0x9c   :  { %2954 = vmatpush.bf16.msra.mxu1 %v11209_v24  ;;  %v11228_v24 = vld [vmem:[#allocation8 + $0xd08] sm:$0xff] }
  0x9d   :  { %2967 = vmatpush.bf16.msra.mxu2 %v11217_v25  ;;  %v11236_v25 = vld [vmem:[#allocation8 + $0xd48] sm:$0xff] }
  0x9e   :  { %2980 = vmatpush.bf16.msra.mxu3 %v11225_v26  ;;  %v11244_v26 = vld [vmem:[#allocation8 + $0xd88] sm:$0xff] }
  0x9f   :  { %2942 = vmatpush.bf16.msra.mxu0 %v11200_v27  ;;  %v11252_v27 = vld [vmem:[#allocation8 + $0xdc8] sm:$0xff] }
  0xa0   :  { %2955 = vmatpush.bf16.msra.mxu1 %v11208_v28  ;;  %v1150_v28 = vld [vmem:[#allocation1 + $0x24] sm:$0xff] }
  0xa1   :  { %2968 = vmatpush.bf16.msra.mxu2 %v11216_v29  ;;  %v1152_v29 = vld [vmem:[#allocation1 + $0x36] sm:$0xff] }
  0xa2   :  { %2981 = vmatpush.bf16.msra.mxu3 %v11224_v30 }
  0xa3   :  { %2943 = vmatpush.bf16.msra.mxu0 %v11199_v31  ;;  %v1151_v31 = vld [vmem:[#allocation1 + $0x2d] sm:$0xff] }
  0xa4   :  { %2956 = vmatpush.bf16.msra.mxu1 %v11207_v32  ;;  %v1153_v32 = vld [vmem:[#allocation1 + $0x3f] sm:$0xff] }
  0xa5   :  { %2969 = vmatpush.bf16.msra.mxu2 %v11215_v33 }
  0xa6   :  { %2982 = vmatpush.bf16.msra.mxu3 %v11223_v34  ;;  %v610_v34 = vld [vmem:[#allocation5 + $0x18] sm:$0xff] }
  0xa7   :  { %2944 = vmatpush.bf16.msra.mxu0 %v11198_v35  ;;  %1155 = vst [vmem:[#allocation1] ss:$9 sm:$0xff] %v610_v34  ;;  %v11227_v35 = vld [vmem:[#allocation8 + $0xd00] sm:$0xff]  ;;  %v11320_v34 = vld [vmem:[#allocation8 + $0xfe8] sm:$0xff] }
  0xa8   :  { %2957 = vmatpush.bf16.msra.mxu1 %v11206_v36  ;;  %v11235_v36 = vld [vmem:[#allocation8 + $0xd40] sm:$0xff] }
  0xa9   :  { %2970 = vmatpush.bf16.msra.mxu2 %v11214_v37  ;;  %v11243_v37 = vld [vmem:[#allocation8 + $0xd80] sm:$0xff] }
  0xaa   :  { %2983 = vmatpush.bf16.msra.mxu3 %v11222_v38  ;;  %v11251_v38 = vld [vmem:[#allocation8 + $0xdc0] sm:$0xff] }
  0xab   :  { %2945 = vmatpush.bf16.msra.mxu0 %v11197_v39  ;;  %v11266_v39 = vld [vmem:[#allocation8 + $0xe38] sm:$0xff] }
  0xac   :  { %2958 = vmatpush.bf16.msra.mxu1 %v11205_v40  ;;  %v11274_v40 = vld [vmem:[#allocation8 + $0xe78] sm:$0xff] }
  0xad   :  { %2971 = vmatpush.bf16.msra.mxu2 %v11213_v41  ;;  %v11282_v41 = vld [vmem:[#allocation8 + $0xeb8] sm:$0xff] }
  0xae   :  { %2984 = vmatpush.bf16.msra.mxu3 %v11221_v42  ;;  %v11290_v42 = vld [vmem:[#allocation8 + $0xef8] sm:$0xff] }
  0xaf   :  { %2946 = vmatpush.bf16.msra.mxu0 %v11196_v43  ;;  %v11265_v43 = vld [vmem:[#allocation8 + $0xe30] sm:$0xff] }
  0xb0   :  { %2959 = vmatpush.bf16.msra.mxu1 %v11204_v44  ;;  %v11273_v44 = vld [vmem:[#allocation8 + $0xe70] sm:$0xff] }
  0xb1   :  { %2972 = vmatpush.bf16.msra.mxu2 %v11212_v45  ;;  %v11281_v45 = vld [vmem:[#allocation8 + $0xeb0] sm:$0xff] }
  0xb2   :  { %2985 = vmatpush.bf16.msra.mxu3 %v11220_v46  ;;  %v11289_v46 = vld [vmem:[#allocation8 + $0xef0] sm:$0xff] }
  0xb3   :  { %2947 = vmatpush.bf16.msra.mxu0 %v11195_v47  ;;  %v2741_v3 = vpop.f32.mrf.mxu0  ;;  %v11264_v47 = vld [vmem:[#allocation8 + $0xe28] sm:$0xff] }
  0xb4   :  { %2960 = vmatpush.bf16.msra.mxu1 %v11203_v48  ;;  %v2754_v6 = vpop.f32.mrf.mxu1  ;;  %v11272_v48 = vld [vmem:[#allocation8 + $0xe68] sm:$0xff] }
  0xb5   :  { %2973 = vmatpush.bf16.msra.mxu2 %v11211_v49  ;;  %v2755_v9 = vadd.f32 %v2754_v6, %v2741_v3  ;;  %v11280_v49 = vld [vmem:[#allocation8 + $0xea8] sm:$0xff]  ;;  %v11261_v3 = vld [vmem:[#allocation8 + $0xe10] sm:$0xff] }
  0xb6   :  { %2986 = vmatpush.bf16.msra.mxu3 %v11219_v50  ;;  %2948 = vmatmul.bf16.vlgmr.msra.gmra.mxu0 %v1146_v55  ;;  %v11288_v50 = vld [vmem:[#allocation8 + $0xee8] sm:$0xff] }
  0xb7   :  { %2992 = vmatpush.bf16.msrb.mxu0 %v11234_v51  ;;  %2961 = vmatmul.bf16.vlgmr.msra.gmra.mxu1 %v1147_v57  ;;  %v11287_v57 = vld [vmem:[#allocation8 + $0xee0] sm:$0xff] }
  0xb8   :  { %3005 = vmatpush.bf16.msrb.mxu1 %v11242_v52  ;;  %2974 = vmatmul.bf16.vlgmr.msra.gmra.mxu2 %v1148_v56  ;;  %v11263_v52 = vld [vmem:[#allocation8 + $0xe20] sm:$0xff] }
  0xb9   :  { %3018 = vmatpush.bf16.msrb.mxu2 %v11250_v53  ;;  %2987 = vmatmul.bf16.vlgmr.msra.gmra.mxu3 %v1149_v58  ;;  %v11271_v53 = vld [vmem:[#allocation8 + $0xe60] sm:$0xff] }
  0xba   :  { %3031 = vmatpush.bf16.msrb.mxu3 %v11258_v54  ;;  %v11279_v56 = vld [vmem:[#allocation8 + $0xea0] sm:$0xff] }
  0xbb   :  { %2993 = vmatpush.bf16.msrb.mxu0 %v11233_v59  ;;  %v2767_v14 = vpop.f32.mrf.mxu2  ;;  %v2743_v17 = vpop.f32.mrf.mxu0  ;;  %v11262_v59 = vld [vmem:[#allocation8 + $0xe18] sm:$0xff] }
  0xbc   :  { %3006 = vmatpush.bf16.msrb.mxu1 %v11241_v60  ;;  %v2768_v15 = vadd.f32 %v2767_v14, %v2755_v9  ;;  %v2780_v16 = vpop.f32.mrf.mxu3  ;;  %v2756_v21 = vpop.f32.mrf.mxu1  ;;  %v11270_v60 = vld [vmem:[#allocation8 + $0xe58] sm:$0xff]  ;;  %v11260_v9 = vld [vmem:[#allocation8 + $0xe08] sm:$0xff]  ;;  %v11275_v17 = vld [vmem:[#allocation8 + $0xe80] sm:$0xff] }
  0xbd   :  { %3019 = vmatpush.bf16.msrb.mxu2 %v11249_v61  ;;  %v11278_v61 = vld [vmem:[#allocation8 + $0xe98] sm:$0xff] }
  0xbe   :  { %3032 = vmatpush.bf16.msrb.mxu3 %v11257_v62  ;;  %v11793_v20 = vadd.f32 %v2780_v16, %v2768_v15  ;;  %v11286_v62 = vld [vmem:[#allocation8 + $0xed8] sm:$0xff]  ;;  %v11259_v15 = vld [vmem:[#allocation8 + $0xe00] sm:$0xff] }
  0xbf   :  { %2994 = vmatpush.bf16.msrb.mxu0 %v11232_v63  ;;  %v11267_v16 = vld [vmem:[#allocation8 + $0xe40] sm:$0xff]  ;;  %v11314_v21 = vld [vmem:[#allocation8 + $0xfb8] sm:$0xff] }
  0xc0   :  { %3007 = vmatpush.bf16.msrb.mxu1 %v11240_v0 }
  0xc1   :  { %3020 = vmatpush.bf16.msrb.mxu2 %v11248_v1 }
  0xc2   :  { %3033 = vmatpush.bf16.msrb.mxu3 %v11256_v2 }
  0xc3   :  { %2995 = vmatpush.bf16.msrb.mxu0 %v11231_v4  ;;  %v2769_v30 = vpop.f32.mrf.mxu2  ;;  %v11269_v4 = vld [vmem:[#allocation8 + $0xe50] sm:$0xff] }
  0xc4   :  { %3008 = vmatpush.bf16.msrb.mxu1 %v11239_v5  ;;  %v2782_v33 = vpop.f32.mrf.mxu3  ;;  %v11321_v30 = vld [vmem:[#allocation8 + $0xff0] sm:$0xff] }
  0xc5   :  { %3021 = vmatpush.bf16.msrb.mxu2 %v11247_v7  ;;  %v11277_v7 = vld [vmem:[#allocation8 + $0xe90] sm:$0xff]  ;;  %v11312_v33 = vld [vmem:[#allocation8 + $0xfa8] sm:$0xff] }
  0xc6   :  { %3034 = vmatpush.bf16.msrb.mxu3 %v11255_v8  ;;  %v11285_v8 = vld [vmem:[#allocation8 + $0xed0] sm:$0xff] }
  0xc7   :  { %2996 = vmatpush.bf16.msrb.mxu0 %v11230_v10  ;;  %v11268_v10 = vld [vmem:[#allocation8 + $0xe48] sm:$0xff] }
  0xc8   :  { %3009 = vmatpush.bf16.msrb.mxu1 %v11238_v11  ;;  %v11276_v11 = vld [vmem:[#allocation8 + $0xe88] sm:$0xff] }
  0xc9   :  { %3022 = vmatpush.bf16.msrb.mxu2 %v11246_v12  ;;  %v11284_v12 = vld [vmem:[#allocation8 + $0xec8] sm:$0xff] }
  0xca   :  { %3035 = vmatpush.bf16.msrb.mxu3 %v11254_v13 }
  0xcb   :  { %2997 = vmatpush.bf16.msrb.mxu0 %v11229_v18  ;;  %v11283_v18 = vld [vmem:[#allocation8 + $0xec0] sm:$0xff] }
  0xcc   :  { %3010 = vmatpush.bf16.msrb.mxu1 %v11237_v19  ;;  %v11298_v19 = vld [vmem:[#allocation8 + $0xf38] sm:$0xff] }
  0xcd   :  { %3023 = vmatpush.bf16.msrb.mxu2 %v11245_v22  ;;  %v11322_v22 = vld [vmem:[#allocation8 + $0xff8] sm:$0xff] }
  0xce   :  { %3036 = vmatpush.bf16.msrb.mxu3 %v11253_v23  ;;  %v1156_v23 = vld [vmem:[#allocation1] sm:$0xff] }
  0xcf   :  { %2998 = vmatpush.bf16.msrb.mxu0 %v11228_v24  ;;  %v1158_v24 = vld [vmem:[#allocation1 + $0x12] sm:$0xff] }
  0xd0   :  { %3011 = vmatpush.bf16.msrb.mxu1 %v11236_v25  ;;  %v1157_v25 = vld [vmem:[#allocation1 + $0x9] sm:$0xff] }
  0xd1   :  { %3024 = vmatpush.bf16.msrb.mxu2 %v11244_v26  ;;  %v1159_v26 = vld [vmem:[#allocation1 + $0x1b] sm:$0xff] }
  0xd2   :  { %3037 = vmatpush.bf16.msrb.mxu3 %v11252_v27  ;;  %v11297_v27 = vld [vmem:[#allocation8 + $0xf30] sm:$0xff] }
  0xd3   :  { %2999 = vmatpush.bf16.msrb.mxu0 %v11227_v35  ;;  %v2793_v51 = vpop.f32.mrf.mxu0 }
  0xd4   :  { %3012 = vmatpush.bf16.msrb.mxu1 %v11235_v36  ;;  %v2794_v54 = vadd.f32 %v2793_v51, %v11793_v20  ;;  %v2806_v55 = vpop.f32.mrf.mxu1  ;;  %v11306_v20 = vld [vmem:[#allocation8 + $0xf78] sm:$0xff] }
  0xd5   :  { %3025 = vmatpush.bf16.msrb.mxu2 %v11243_v37  ;;  %v11295_v37 = vld [vmem:[#allocation8 + $0xf20] sm:$0xff] }
  0xd6   :  { %3038 = vmatpush.bf16.msrb.mxu3 %v11251_v38  ;;  %3000 = vmatmul.bf16.vlgmr.msrb.gmra.mxu0 %v1150_v28  ;;  %v2807_v58 = vadd.f32 %v2806_v55, %v2794_v54  ;;  %v11305_v28 = vld [vmem:[#allocation8 + $0xf70] sm:$0xff]  ;;  %v11303_v38 = vld [vmem:[#allocation8 + $0xf60] sm:$0xff] }
  0xd7   :  { %3044 = vmatpush.bf16.msra.mxu0 %v11266_v39  ;;  %3013 = vmatmul.bf16.vlgmr.msrb.gmra.mxu1 %v1151_v31  ;;  %v11296_v31 = vld [vmem:[#allocation8 + $0xf28] sm:$0xff]  ;;  %v11309_v55 = vld [vmem:[#allocation8 + $0xf90] sm:$0xff] }
  0xd8   :  { %3057 = vmatpush.bf16.msra.mxu1 %v11274_v40  ;;  %3026 = vmatmul.bf16.vlgmr.msrb.gmra.mxu2 %v1152_v29  ;;  %v11313_v29 = vld [vmem:[#allocation8 + $0xfb0] sm:$0xff]  ;;  %v11311_v40 = vld [vmem:[#allocation8 + $0xfa0] sm:$0xff] }
  0xd9   :  { %3070 = vmatpush.bf16.msra.mxu2 %v11282_v41  ;;  %3039 = vmatmul.bf16.vlgmr.msrb.gmra.mxu3 %v1153_v32  ;;  %v11304_v32 = vld [vmem:[#allocation8 + $0xf68] sm:$0xff]  ;;  %v11319_v41 = vld [vmem:[#allocation8 + $0xfe0] sm:$0xff] }
  0xda   :  { %3083 = vmatpush.bf16.msra.mxu3 %v11290_v42 }
  0xdb   :  { %3045 = vmatpush.bf16.msra.mxu0 %v11265_v43  ;;  %v2819_v63 = vpop.f32.mrf.mxu2  ;;  %v2795_v2 = vpop.f32.mrf.mxu0  ;;  %v11294_v43 = vld [vmem:[#allocation8 + $0xf18] sm:$0xff] }
  0xdc   :  { %3058 = vmatpush.bf16.msra.mxu1 %v11273_v44  ;;  %v2820_v0 = vadd.f32 %v2819_v63, %v2807_v58  ;;  %v2832_v1 = vpop.f32.mrf.mxu3  ;;  %v2808_v6 = vpop.f32.mrf.mxu1  ;;  %v11302_v44 = vld [vmem:[#allocation8 + $0xf58] sm:$0xff]  ;;  %v11300_v58 = vld [vmem:[#allocation8 + $0xf48] sm:$0xff] }
  0xdd   :  { %3071 = vmatpush.bf16.msra.mxu2 %v11281_v45  ;;  %v11310_v45 = vld [vmem:[#allocation8 + $0xf98] sm:$0xff]  ;;  %v11307_v6 = vld [vmem:[#allocation8 + $0xf80] sm:$0xff] }
  0xde   :  { %3084 = vmatpush.bf16.msra.mxu3 %v11289_v46  ;;  %v2833_v5 = vadd.f32 %v2832_v1, %v2820_v0  ;;  %v11318_v46 = vld [vmem:[#allocation8 + $0xfd8] sm:$0xff]  ;;  %v1161_v0 = vld [vmem:[#allocation1 + $0x2d] sm:$0xff] }
  0xdf   :  { %3046 = vmatpush.bf16.msra.mxu0 %v11264_v47  ;;  %v1163_v1 = vld [vmem:[#allocation1 + $0x3f] sm:$0xff] }
  0xe0   :  { %3059 = vmatpush.bf16.msra.mxu1 %v11272_v48 }
  0xe1   :  { %3072 = vmatpush.bf16.msra.mxu2 %v11280_v49 }
  0xe2   :  { %3085 = vmatpush.bf16.msra.mxu3 %v11288_v50 }
  0xe3   :  { %3047 = vmatpush.bf16.msra.mxu0 %v11263_v52  ;;  %v2821_v13 = vpop.f32.mrf.mxu2  ;;  %v11293_v52 = vld [vmem:[#allocation8 + $0xf10] sm:$0xff] }
  0xe4   :  { %3060 = vmatpush.bf16.msra.mxu1 %v11271_v53  ;;  %v2834_v14 = vpop.f32.mrf.mxu3  ;;  %v11301_v53 = vld [vmem:[#allocation8 + $0xf50] sm:$0xff] }
  0xe5   :  { %3073 = vmatpush.bf16.msra.mxu2 %v11279_v56  ;;  %v11317_v56 = vld [vmem:[#allocation8 + $0xfd0] sm:$0xff] }
  0xe6   :  { %3086 = vmatpush.bf16.msra.mxu3 %v11287_v57  ;;  %v11292_v57 = vld [vmem:[#allocation8 + $0xf08] sm:$0xff]  ;;  %v10825_v13 = vld [vmem:[#allocation8 + $0x70] sm:$0xff] }
  0xe7   :  { %3048 = vmatpush.bf16.msra.mxu0 %v11262_v59  ;;  %v11308_v59 = vld [vmem:[#allocation8 + $0xf88] sm:$0xff]  ;;  %v10833_v14 = vld [vmem:[#allocation8 + $0xb0] sm:$0xff] }
  0xe8   :  { %3061 = vmatpush.bf16.msra.mxu1 %v11270_v60  ;;  %v11316_v60 = vld [vmem:[#allocation8 + $0xfc8] sm:$0xff] }
  0xe9   :  { %3074 = vmatpush.bf16.msra.mxu2 %v11278_v61  ;;  %v1160_v61 = vld [vmem:[#allocation1 + $0x24] sm:$0xff] }
  0xea   :  { %3087 = vmatpush.bf16.msra.mxu3 %v11286_v62  ;;  %v1162_v62 = vld [vmem:[#allocation1 + $0x36] sm:$0xff] }
  0xeb   :  { %3049 = vmatpush.bf16.msra.mxu0 %v11261_v3  ;;  %v91_v3 = vld [vmem:[#allocation2] sm:$0xff] }
  0xec   :  { %3062 = vmatpush.bf16.msra.mxu1 %v11269_v4  ;;  %3149 = vst [vmem:[#allocation1] ss:$9 sm:$0xff] %v91_v3  ;;  %v11291_v4 = vld [vmem:[#allocation8 + $0xf00] sm:$0xff]  ;;  %v10872_v3 = vld [vmem:[#allocation8 + $0x1e8] sm:$0xff] }
  0xed   :  { %3075 = vmatpush.bf16.msra.mxu2 %v11277_v7  ;;  %v11315_v7 = vld [vmem:[#allocation8 + $0xfc0] sm:$0xff] }
  0xee   :  { %3088 = vmatpush.bf16.msra.mxu3 %v11285_v8  ;;  %v10818_v8 = vld [vmem:[#allocation8 + $0x38] sm:$0xff] }
  0xef   :  { %3050 = vmatpush.bf16.msra.mxu0 %v11260_v9  ;;  %v10826_v9 = vld [vmem:[#allocation8 + $0x78] sm:$0xff] }
  0xf0   :  { %3063 = vmatpush.bf16.msra.mxu1 %v11268_v10  ;;  %v10834_v10 = vld [vmem:[#allocation8 + $0xb8] sm:$0xff] }
  0xf1   :  { %3076 = vmatpush.bf16.msra.mxu2 %v11276_v11  ;;  %v10842_v11 = vld [vmem:[#allocation8 + $0xf8] sm:$0xff] }
  0xf2   :  { %3089 = vmatpush.bf16.msra.mxu3 %v11284_v12  ;;  %v10817_v12 = vld [vmem:[#allocation8 + $0x30] sm:$0xff] }
  0xf3   :  { %3051 = vmatpush.bf16.msra.mxu0 %v11259_v15  ;;  %v2845_v35 = vpop.f32.mrf.mxu0  ;;  %v10841_v15 = vld [vmem:[#allocation8 + $0xf0] sm:$0xff] }
  0xf4   :  { %3064 = vmatpush.bf16.msra.mxu1 %v11267_v16  ;;  %v2846_v36 = vadd.f32 %v2845_v35, %v2833_v5  ;;  %v2858_v39 = vpop.f32.mrf.mxu1  ;;  %v11299_v5 = vld [vmem:[#allocation8 + $0xf40] sm:$0xff]  ;;  %v10816_v16 = vld [vmem:[#allocation8 + $0x28] sm:$0xff] }
  0xf5   :  { %3077 = vmatpush.bf16.msra.mxu2 %v11275_v17  ;;  %v10824_v17 = vld [vmem:[#allocation8 + $0x68] sm:$0xff] }
  0xf6   :  { %3090 = vmatpush.bf16.msra.mxu3 %v11283_v18  ;;  %3052 = vmatmul.bf16.vlgmr.msra.gmra.mxu0 %v1156_v23  ;;  %v2859_v42 = vadd.f32 %v2858_v39, %v2846_v36  ;;  %v10832_v18 = vld [vmem:[#allocation8 + $0xa8] sm:$0xff]  ;;  %v10823_v23 = vld [vmem:[#allocation8 + $0x60] sm:$0xff] }
  0xf7   :  { %3096 = vmatpush.bf16.msrb.mxu0 %v11298_v19  ;;  %3065 = vmatmul.bf16.vlgmr.msra.gmra.mxu1 %v1157_v25  ;;  %v10840_v19 = vld [vmem:[#allocation8 + $0xe8] sm:$0xff]  ;;  %v10831_v25 = vld [vmem:[#allocation8 + $0xa0] sm:$0xff] }
  0xf8   :  { %3109 = vmatpush.bf16.msrb.mxu1 %v11306_v20  ;;  %3078 = vmatmul.bf16.vlgmr.msra.gmra.mxu2 %v1158_v24 }
  0xf9   :  { %3122 = vmatpush.bf16.msrb.mxu2 %v11314_v21  ;;  %3091 = vmatmul.bf16.vlgmr.msra.gmra.mxu3 %v1159_v26  ;;  %v10839_v26 = vld [vmem:[#allocation8 + $0xe0] sm:$0xff] }
  0xfa   :  { %3135 = vmatpush.bf16.msrb.mxu3 %v11322_v22  ;;  %v10815_v22 = vld [vmem:[#allocation8 + $0x20] sm:$0xff] }
  0xfb   :  { %3097 = vmatpush.bf16.msrb.mxu0 %v11297_v27  ;;  %v2871_v47 = vpop.f32.mrf.mxu2  ;;  %v2847_v50 = vpop.f32.mrf.mxu0 }
  0xfc   :  { %3110 = vmatpush.bf16.msrb.mxu1 %v11305_v28  ;;  %v2872_v48 = vadd.f32 %v2871_v47, %v2859_v42  ;;  %v2884_v49 = vpop.f32.mrf.mxu3  ;;  %v2860_v54 = vpop.f32.mrf.mxu1  ;;  %v10814_v28 = vld [vmem:[#allocation8 + $0x18] sm:$0xff]  ;;  %v10812_v42 = vld [vmem:[#allocation8 + $0x8] sm:$0xff]  ;;  %v10827_v50 = vld [vmem:[#allocation8 + $0x80] sm:$0xff] }
  0xfd   :  { %3123 = vmatpush.bf16.msrb.mxu2 %v11313_v29  ;;  %v10822_v29 = vld [vmem:[#allocation8 + $0x58] sm:$0xff] }
  0xfe   :  { %3136 = vmatpush.bf16.msrb.mxu3 %v11321_v30  ;;  %v11796_v51 = vadd.f32 %v2884_v49, %v2872_v48  ;;  %v10830_v30 = vld [vmem:[#allocation8 + $0x98] sm:$0xff]  ;;  %v10811_v48 = vld [vmem:[#allocation8] sm:$0xff] }
  0xff   :  { %3098 = vmatpush.bf16.msrb.mxu0 %v11296_v31  ;;  %v10838_v31 = vld [vmem:[#allocation8 + $0xd8] sm:$0xff]  ;;  %v10819_v49 = vld [vmem:[#allocation8 + $0x40] sm:$0xff] }
 0x100   :  { %3111 = vmatpush.bf16.msrb.mxu1 %v11304_v32  ;;  %v10866_v54 = vld [vmem:[#allocation8 + $0x1b8] sm:$0xff] }
 0x101   :  { %3124 = vmatpush.bf16.msrb.mxu2 %v11312_v33 }
 0x102   :  { %3137 = vmatpush.bf16.msrb.mxu3 %v11320_v34 }
 0x103   :  { %3099 = vmatpush.bf16.msrb.mxu0 %v11295_v37  ;;  %v2873_v63 = vpop.f32.mrf.mxu2  ;;  %v10813_v37 = vld [vmem:[#allocation8 + $0x10] sm:$0xff] }
 0x104   :  { %3112 = vmatpush.bf16.msrb.mxu1 %v11303_v38  ;;  %v2886_v2 = vpop.f32.mrf.mxu3  ;;  %v10821_v38 = vld [vmem:[#allocation8 + $0x50] sm:$0xff] }
 0x105   :  { %3125 = vmatpush.bf16.msrb.mxu2 %v11311_v40  ;;  %v10829_v40 = vld [vmem:[#allocation8 + $0x90] sm:$0xff]  ;;  %v10864_v2 = vld [vmem:[#allocation8 + $0x1a8] sm:$0xff] }
 0x106   :  { %3138 = vmatpush.bf16.msrb.mxu3 %v11319_v41  ;;  %v10837_v41 = vld [vmem:[#allocation8 + $0xd0] sm:$0xff] }
 0x107   :  { %3100 = vmatpush.bf16.msrb.mxu0 %v11294_v43  ;;  %v10820_v43 = vld [vmem:[#allocation8 + $0x48] sm:$0xff]  ;;  %v10873_v63 = vld [vmem:[#allocation8 + $0x1f0] sm:$0xff] }
 0x108   :  { %3113 = vmatpush.bf16.msrb.mxu1 %v11302_v44  ;;  %v10828_v44 = vld [vmem:[#allocation8 + $0x88] sm:$0xff] }
 0x109   :  { %3126 = vmatpush.bf16.msrb.mxu2 %v11310_v45  ;;  %v10836_v45 = vld [vmem:[#allocation8 + $0xc8] sm:$0xff] }
 0x10a   :  { %3139 = vmatpush.bf16.msrb.mxu3 %v11318_v46 }
 0x10b   :  { %3101 = vmatpush.bf16.msrb.mxu0 %v11293_v52  ;;  %v10850_v52 = vld [vmem:[#allocation8 + $0x138] sm:$0xff] }
 0x10c   :  { %3114 = vmatpush.bf16.msrb.mxu1 %v11301_v53  ;;  %v10858_v53 = vld [vmem:[#allocation8 + $0x178] sm:$0xff] }
 0x10d   :  { %3127 = vmatpush.bf16.msrb.mxu2 %v11309_v55  ;;  %v10874_v55 = vld [vmem:[#allocation8 + $0x1f8] sm:$0xff] }
 0x10e   :  { %3140 = vmatpush.bf16.msrb.mxu3 %v11317_v56  ;;  %v3150_v56 = vld [vmem:[#allocation1] sm:$0xff] }
 0x10f   :  { %3102 = vmatpush.bf16.msrb.mxu0 %v11292_v57  ;;  %v3152_v57 = vld [vmem:[#allocation1 + $0x12] sm:$0xff] }
 0x110   :  { %3115 = vmatpush.bf16.msrb.mxu1 %v11300_v58  ;;  %v3151_v58 = vld [vmem:[#allocation1 + $0x9] sm:$0xff] }
 0x111   :  { %3128 = vmatpush.bf16.msrb.mxu2 %v11308_v59  ;;  %v3153_v59 = vld [vmem:[#allocation1 + $0x1b] sm:$0xff] }
 0x112   :  { %3141 = vmatpush.bf16.msrb.mxu3 %v11316_v60  ;;  %v10849_v60 = vld [vmem:[#allocation8 + $0x130] sm:$0xff] }
 0x113   :  { %3103 = vmatpush.bf16.msrb.mxu0 %v11291_v4  ;;  %v2897_v20 = vpop.f32.mrf.mxu0 }
 0x114   :  { %3116 = vmatpush.bf16.msrb.mxu1 %v11299_v5  ;;  %v2898_v21 = vadd.f32 %v2897_v20, %v11796_v51  ;;  %v2910_v24 = vpop.f32.mrf.mxu1  ;;  %v10835_v51 = vld [vmem:[#allocation8 + $0xc0] sm:$0xff] }
 0x115   :  { %3129 = vmatpush.bf16.msrb.mxu2 %v11307_v6  ;;  %v10847_v6 = vld [vmem:[#allocation8 + $0x120] sm:$0xff] }
 0x116   :  { %3142 = vmatpush.bf16.msrb.mxu3 %v11315_v7  ;;  %3104 = vmatmul.bf16.vlgmr.msrb.gmra.mxu0 %v1160_v61  ;;  %v2911_v27 = vadd.f32 %v2910_v24, %v2898_v21  ;;  %v10857_v61 = vld [vmem:[#allocation8 + $0x170] sm:$0xff]  ;;  %v10855_v7 = vld [vmem:[#allocation8 + $0x160] sm:$0xff] }
 0x117   :  { %4756 = vmatpush.bf16.msra.mxu0 %v10818_v8  ;;  %3117 = vmatmul.bf16.vlgmr.msrb.gmra.mxu1 %v1161_v0  ;;  %v10848_v0 = vld [vmem:[#allocation8 + $0x128] sm:$0xff]  ;;  %v10845_v21 = vld [vmem:[#allocation8 + $0x110] sm:$0xff] }
 0x118   :  { %4769 = vmatpush.bf16.msra.mxu1 %v10826_v9  ;;  %3130 = vmatmul.bf16.vlgmr.msrb.gmra.mxu2 %v1162_v62  ;;  %v10865_v62 = vld [vmem:[#allocation8 + $0x1b0] sm:$0xff]  ;;  %v10863_v9 = vld [vmem:[#allocation8 + $0x1a0] sm:$0xff] }
 0x119   :  { %4782 = vmatpush.bf16.msra.mxu2 %v10834_v10  ;;  %3143 = vmatmul.bf16.vlgmr.msrb.gmra.mxu3 %v1163_v1  ;;  %v10856_v1 = vld [vmem:[#allocation8 + $0x168] sm:$0xff]  ;;  %v10871_v10 = vld [vmem:[#allocation8 + $0x1e0] sm:$0xff]  ;;  %v10861_v24 = vld [vmem:[#allocation8 + $0x190] sm:$0xff] }
 0x11a   :  { %4795 = vmatpush.bf16.msra.mxu3 %v10842_v11 }
 0x11b   :  { %4757 = vmatpush.bf16.msra.mxu0 %v10817_v12  ;;  %v2923_v32 = vpop.f32.mrf.mxu2  ;;  %v2899_v35 = vpop.f32.mrf.mxu0  ;;  %v10846_v12 = vld [vmem:[#allocation8 + $0x118] sm:$0xff] }
 0x11c   :  { %4770 = vmatpush.bf16.msra.mxu1 %v10825_v13  ;;  %v2924_v33 = vadd.f32 %v2923_v32, %v2911_v27  ;;  %v2936_v34 = vpop.f32.mrf.mxu3  ;;  %v2912_v39 = vpop.f32.mrf.mxu1  ;;  %v10854_v13 = vld [vmem:[#allocation8 + $0x158] sm:$0xff]  ;;  %v10852_v27 = vld [vmem:[#allocation8 + $0x148] sm:$0xff] }
 0x11d   :  { %4783 = vmatpush.bf16.msra.mxu2 %v10833_v14  ;;  %v10862_v14 = vld [vmem:[#allocation8 + $0x198] sm:$0xff]  ;;  %v10859_v39 = vld [vmem:[#allocation8 + $0x180] sm:$0xff] }
 0x11e   :  { %4796 = vmatpush.bf16.msra.mxu3 %v10841_v15  ;;  %v2937_v36 = vadd.f32 %v2936_v34, %v2924_v33  ;;  %v10870_v15 = vld [vmem:[#allocation8 + $0x1d8] sm:$0xff]  ;;  %v3155_v33 = vld [vmem:[#allocation1 + $0x2d] sm:$0xff] }
 0x11f   :  { %4758 = vmatpush.bf16.msra.mxu0 %v10816_v16  ;;  %v3157_v34 = vld [vmem:[#allocation1 + $0x3f] sm:$0xff] }
 0x120   :  { %4771 = vmatpush.bf16.msra.mxu1 %v10824_v17 }
 0x121   :  { %4784 = vmatpush.bf16.msra.mxu2 %v10832_v18 }
 0x122   :  { %4797 = vmatpush.bf16.msra.mxu3 %v10840_v19 }
 0x123   :  { %4759 = vmatpush.bf16.msra.mxu0 %v10815_v22  ;;  %v2925_v46 = vpop.f32.mrf.mxu2  ;;  %v10853_v22 = vld [vmem:[#allocation8 + $0x150] sm:$0xff] }
 0x124   :  { %4772 = vmatpush.bf16.msra.mxu1 %v10823_v23  ;;  %v2938_v47 = vpop.f32.mrf.mxu3  ;;  %v10889_v46 = vld [vmem:[#allocation8 + $0x270] sm:$0xff] }
 0x125   :  { %4785 = vmatpush.bf16.msra.mxu2 %v10831_v25  ;;  %v10869_v25 = vld [vmem:[#allocation8 + $0x1d0] sm:$0xff] }
 0x126   :  { %4798 = vmatpush.bf16.msra.mxu3 %v10839_v26  ;;  %v10844_v26 = vld [vmem:[#allocation8 + $0x108] sm:$0xff]  ;;  %v10897_v47 = vld [vmem:[#allocation8 + $0x2b0] sm:$0xff] }
 0x127   :  { %4760 = vmatpush.bf16.msra.mxu0 %v10814_v28  ;;  %v10860_v28 = vld [vmem:[#allocation8 + $0x188] sm:$0xff] }
 0x128   :  { %4773 = vmatpush.bf16.msra.mxu1 %v10822_v29  ;;  %v10868_v29 = vld [vmem:[#allocation8 + $0x1c8] sm:$0xff] }
 0x129   :  { %4786 = vmatpush.bf16.msra.mxu2 %v10830_v30  ;;  %v3154_v30 = vld [vmem:[#allocation1 + $0x24] sm:$0xff] }
 0x12a   :  { %4799 = vmatpush.bf16.msra.mxu3 %v10838_v31  ;;  %v3156_v31 = vld [vmem:[#allocation1 + $0x36] sm:$0xff] }
 0x12b   :  { %4761 = vmatpush.bf16.msra.mxu0 %v10813_v37  ;;  %v10843_v37 = vld [vmem:[#allocation8 + $0x100] sm:$0xff] }
 0x12c   :  { %4774 = vmatpush.bf16.msra.mxu1 %v10821_v38  ;;  %v10851_v38 = vld [vmem:[#allocation8 + $0x140] sm:$0xff] }
 0x12d   :  { %4787 = vmatpush.bf16.msra.mxu2 %v10829_v40  ;;  %v10867_v40 = vld [vmem:[#allocation8 + $0x1c0] sm:$0xff] }
 0x12e   :  { %4800 = vmatpush.bf16.msra.mxu3 %v10837_v41  ;;  %v10882_v41 = vld [vmem:[#allocation8 + $0x238] sm:$0xff] }
 0x12f   :  { %4762 = vmatpush.bf16.msra.mxu0 %v10812_v42  ;;  %v10890_v42 = vld [vmem:[#allocation8 + $0x278] sm:$0xff] }
 0x130   :  { %4775 = vmatpush.bf16.msra.mxu1 %v10820_v43  ;;  %v10898_v43 = vld [vmem:[#allocation8 + $0x2b8] sm:$0xff] }
 0x131   :  { %4788 = vmatpush.bf16.msra.mxu2 %v10828_v44  ;;  %v10906_v44 = vld [vmem:[#allocation8 + $0x2f8] sm:$0xff] }
 0x132   :  { %4801 = vmatpush.bf16.msra.mxu3 %v10836_v45  ;;  %v10881_v45 = vld [vmem:[#allocation8 + $0x230] sm:$0xff] }
 0x133   :  { %4763 = vmatpush.bf16.msra.mxu0 %v10811_v48  ;;  %v2949_v4 = vpop.f32.mrf.mxu0  ;;  %v10905_v48 = vld [vmem:[#allocation8 + $0x2f0] sm:$0xff] }
 0x134   :  { %4776 = vmatpush.bf16.msra.mxu1 %v10819_v49  ;;  %v2950_v5 = vadd.f32 %v2949_v4, %v2937_v36  ;;  %v2962_v8 = vpop.f32.mrf.mxu1  ;;  %v92_v36 = vld [vmem:[#allocation2 + $0x8] sm:$0xff] }
 0x135   :  { %4789 = vmatpush.bf16.msra.mxu2 %v10827_v50  ;;  %3159 = vst [vmem:[#allocation1] ss:$9 sm:$0xff] %v92_v36  ;;  %v10880_v49 = vld [vmem:[#allocation8 + $0x228] sm:$0xff] }
 0x136   :  { %4802 = vmatpush.bf16.msra.mxu3 %v10835_v51  ;;  %4764 = vmatmul.bf16.vlgmr.msra.gmra.mxu0 %v3150_v56  ;;  %v2963_v11 = vadd.f32 %v2962_v8, %v2950_v5  ;;  %v10888_v50 = vld [vmem:[#allocation8 + $0x268] sm:$0xff]  ;;  %v10887_v56 = vld [vmem:[#allocation8 + $0x260] sm:$0xff] }
 0x137   :  { %4808 = vmatpush.bf16.msrb.mxu0 %v10850_v52  ;;  %4777 = vmatmul.bf16.vlgmr.msra.gmra.mxu1 %v3151_v58  ;;  %v10896_v51 = vld [vmem:[#allocation8 + $0x2a8] sm:$0xff]  ;;  %v10895_v58 = vld [vmem:[#allocation8 + $0x2a0] sm:$0xff] }
 0x138   :  { %4821 = vmatpush.bf16.msrb.mxu1 %v10858_v53  ;;  %4790 = vmatmul.bf16.vlgmr.msra.gmra.mxu2 %v3152_v57  ;;  %v10904_v52 = vld [vmem:[#allocation8 + $0x2e8] sm:$0xff] }
 0x139   :  { %4834 = vmatpush.bf16.msrb.mxu2 %v10866_v54  ;;  %4803 = vmatmul.bf16.vlgmr.msra.gmra.mxu3 %v3153_v59  ;;  %v10903_v59 = vld [vmem:[#allocation8 + $0x2e0] sm:$0xff]  ;;  %v10936_v36 = vld [vmem:[#allocation8 + $0x3e8] sm:$0xff] }
 0x13a   :  { %4847 = vmatpush.bf16.msrb.mxu3 %v10874_v55  ;;  %v10879_v55 = vld [vmem:[#allocation8 + $0x220] sm:$0xff] }
 0x13b   :  { %4809 = vmatpush.bf16.msrb.mxu0 %v10849_v60  ;;  %v2975_v16 = vpop.f32.mrf.mxu2  ;;  %v2951_v19 = vpop.f32.mrf.mxu0 }
 0x13c   :  { %4822 = vmatpush.bf16.msrb.mxu1 %v10857_v61  ;;  %v2976_v17 = vadd.f32 %v2975_v16, %v2963_v11  ;;  %v2988_v18 = vpop.f32.mrf.mxu3  ;;  %v2964_v23 = vpop.f32.mrf.mxu1  ;;  %v10878_v61 = vld [vmem:[#allocation8 + $0x218] sm:$0xff]  ;;  %v10876_v11 = vld [vmem:[#allocation8 + $0x208] sm:$0xff]  ;;  %v10891_v19 = vld [vmem:[#allocation8 + $0x280] sm:$0xff] }
 0x13d   :  { %4835 = vmatpush.bf16.msrb.mxu2 %v10865_v62  ;;  %v10886_v62 = vld [vmem:[#allocation8 + $0x258] sm:$0xff] }
 0x13e   :  { %4848 = vmatpush.bf16.msrb.mxu3 %v10873_v63  ;;  %v11799_v20 = vadd.f32 %v2988_v18, %v2976_v17  ;;  %v10894_v63 = vld [vmem:[#allocation8 + $0x298] sm:$0xff]  ;;  %v10875_v17 = vld [vmem:[#allocation8 + $0x200] sm:$0xff] }
 0x13f   :  { %4810 = vmatpush.bf16.msrb.mxu0 %v10848_v0  ;;  %v10902_v0 = vld [vmem:[#allocation8 + $0x2d8] sm:$0xff]  ;;  %v10883_v18 = vld [vmem:[#allocation8 + $0x240] sm:$0xff] }
 0x140   :  { %4823 = vmatpush.bf16.msrb.mxu1 %v10856_v1  ;;  %v10930_v23 = vld [vmem:[#allocation8 + $0x3b8] sm:$0xff] }
 0x141   :  { %4836 = vmatpush.bf16.msrb.mxu2 %v10864_v2 }
 0x142   :  { %4849 = vmatpush.bf16.msrb.mxu3 %v10872_v3 }
 0x143   :  { %4811 = vmatpush.bf16.msrb.mxu0 %v10847_v6  ;;  %v2977_v32 = vpop.f32.mrf.mxu2  ;;  %v10877_v6 = vld [vmem:[#allocation8 + $0x210] sm:$0xff] }
 0x144   :  { %4824 = vmatpush.bf16.msrb.mxu1 %v10855_v7  ;;  %v2990_v35 = vpop.f32.mrf.mxu3  ;;  %v10885_v7 = vld [vmem:[#allocation8 + $0x250] sm:$0xff] }
 0x145   :  { %4837 = vmatpush.bf16.msrb.mxu2 %v10863_v9  ;;  %v10893_v9 = vld [vmem:[#allocation8 + $0x290] sm:$0xff]  ;;  %v10928_v35 = vld [vmem:[#allocation8 + $0x3a8] sm:$0xff] }
 0x146   :  { %4850 = vmatpush.bf16.msrb.mxu3 %v10871_v10  ;;  %v10901_v10 = vld [vmem:[#allocation8 + $0x2d0] sm:$0xff] }
 0x147   :  { %4812 = vmatpush.bf16.msrb.mxu0 %v10846_v12  ;;  %v10884_v12 = vld [vmem:[#allocation8 + $0x248] sm:$0xff]  ;;  %v10937_v32 = vld [vmem:[#allocation8 + $0x3f0] sm:$0xff] }
 0x148   :  { %4825 = vmatpush.bf16.msrb.mxu1 %v10854_v13  ;;  %v10892_v13 = vld [vmem:[#allocation8 + $0x288] sm:$0xff] }
 0x149   :  { %4838 = vmatpush.bf16.msrb.mxu2 %v10862_v14  ;;  %v10900_v14 = vld [vmem:[#allocation8 + $0x2c8] sm:$0xff] }
 0x14a   :  { %4851 = vmatpush.bf16.msrb.mxu3 %v10870_v15 }
 0x14b   :  { %4813 = vmatpush.bf16.msrb.mxu0 %v10845_v21  ;;  %v10914_v21 = vld [vmem:[#allocation8 + $0x338] sm:$0xff] }
 0x14c   :  { %4826 = vmatpush.bf16.msrb.mxu1 %v10853_v22  ;;  %v10922_v22 = vld [vmem:[#allocation8 + $0x378] sm:$0xff] }
 0x14d   :  { %4839 = vmatpush.bf16.msrb.mxu2 %v10861_v24  ;;  %v10938_v24 = vld [vmem:[#allocation8 + $0x3f8] sm:$0xff] }
 0x14e   :  { %4852 = vmatpush.bf16.msrb.mxu3 %v10869_v25  ;;  %v3160_v25 = vld [vmem:[#allocation1] sm:$0xff] }
 0x14f   :  { %4814 = vmatpush.bf16.msrb.mxu0 %v10844_v26  ;;  %v3162_v26 = vld [vmem:[#allocation1 + $0x12] sm:$0xff] }
 0x150   :  { %4827 = vmatpush.bf16.msrb.mxu1 %v10852_v27  ;;  %v3161_v27 = vld [vmem:[#allocation1 + $0x9] sm:$0xff] }
 0x151   :  { %4840 = vmatpush.bf16.msrb.mxu2 %v10860_v28  ;;  %v3163_v28 = vld [vmem:[#allocation1 + $0x1b] sm:$0xff] }
 0x152   :  { %4853 = vmatpush.bf16.msrb.mxu3 %v10868_v29  ;;  %v10913_v29 = vld [vmem:[#allocation8 + $0x330] sm:$0xff] }
 0x153   :  { %4815 = vmatpush.bf16.msrb.mxu0 %v10843_v37  ;;  %v3001_v53 = vpop.f32.mrf.mxu0 }
 0x154   :  { %4828 = vmatpush.bf16.msrb.mxu1 %v10851_v38  ;;  %v3002_v54 = vadd.f32 %v3001_v53, %v11799_v20  ;;  %v3014_v57 = vpop.f32.mrf.mxu1  ;;  %v10899_v20 = vld [vmem:[#allocation8 + $0x2c0] sm:$0xff] }
 0x155   :  { %4841 = vmatpush.bf16.msrb.mxu2 %v10859_v39  ;;  %v10911_v39 = vld [vmem:[#allocation8 + $0x320] sm:$0xff] }
 0x156   :  { %4854 = vmatpush.bf16.msrb.mxu3 %v10867_v40  ;;  %4816 = vmatmul.bf16.vlgmr.msrb.gmra.mxu0 %v3154_v30  ;;  %v3015_v60 = vadd.f32 %v3014_v57, %v3002_v54  ;;  %v10921_v30 = vld [vmem:[#allocation8 + $0x370] sm:$0xff]  ;;  %v10919_v40 = vld [vmem:[#allocation8 + $0x360] sm:$0xff] }
 0x157   :  { %4860 = vmatpush.bf16.msra.mxu0 %v10882_v41  ;;  %4829 = vmatmul.bf16.vlgmr.msrb.gmra.mxu1 %v3155_v33  ;;  %v10912_v33 = vld [vmem:[#allocation8 + $0x328] sm:$0xff]  ;;  %v10909_v54 = vld [vmem:[#allocation8 + $0x310] sm:$0xff] }
 0x158   :  { %4873 = vmatpush.bf16.msra.mxu1 %v10890_v42  ;;  %4842 = vmatmul.bf16.vlgmr.msrb.gmra.mxu2 %v3156_v31  ;;  %v10929_v31 = vld [vmem:[#allocation8 + $0x3b0] sm:$0xff]  ;;  %v10927_v42 = vld [vmem:[#allocation8 + $0x3a0] sm:$0xff] }
 0x159   :  { %4886 = vmatpush.bf16.msra.mxu2 %v10898_v43  ;;  %4855 = vmatmul.bf16.vlgmr.msrb.gmra.mxu3 %v3157_v34  ;;  %v10920_v34 = vld [vmem:[#allocation8 + $0x368] sm:$0xff]  ;;  %v10935_v43 = vld [vmem:[#allocation8 + $0x3e0] sm:$0xff]  ;;  %v10925_v57 = vld [vmem:[#allocation8 + $0x390] sm:$0xff] }
 0x15a   :  { %4899 = vmatpush.bf16.msra.mxu3 %v10906_v44 }
 0x15b   :  { %4861 = vmatpush.bf16.msra.mxu0 %v10881_v45  ;;  %v3027_v1 = vpop.f32.mrf.mxu2  ;;  %v3003_v4 = vpop.f32.mrf.mxu0  ;;  %v10910_v45 = vld [vmem:[#allocation8 + $0x318] sm:$0xff] }
 0x15c   :  { %4874 = vmatpush.bf16.msra.mxu1 %v10889_v46  ;;  %v3028_v2 = vadd.f32 %v3027_v1, %v3015_v60  ;;  %v3040_v3 = vpop.f32.mrf.mxu3  ;;  %v3016_v8 = vpop.f32.mrf.mxu1  ;;  %v10918_v46 = vld [vmem:[#allocation8 + $0x358] sm:$0xff]  ;;  %v10916_v60 = vld [vmem:[#allocation8 + $0x348] sm:$0xff] }
 0x15d   :  { %4887 = vmatpush.bf16.msra.mxu2 %v10897_v47  ;;  %v10926_v47 = vld [vmem:[#allocation8 + $0x398] sm:$0xff]  ;;  %v10923_v8 = vld [vmem:[#allocation8 + $0x380] sm:$0xff] }
 0x15e   :  { %4900 = vmatpush.bf16.msra.mxu3 %v10905_v48  ;;  %v3041_v5 = vadd.f32 %v3040_v3, %v3028_v2  ;;  %v10934_v48 = vld [vmem:[#allocation8 + $0x3d8] sm:$0xff]  ;;  %v3165_v2 = vld [vmem:[#allocation1 + $0x2d] sm:$0xff] }
 0x15f   :  { %4862 = vmatpush.bf16.msra.mxu0 %v10880_v49  ;;  %v3167_v3 = vld [vmem:[#allocation1 + $0x3f] sm:$0xff] }
 0x160   :  { %4875 = vmatpush.bf16.msra.mxu1 %v10888_v50 }
 0x161   :  { %4888 = vmatpush.bf16.msra.mxu2 %v10896_v51 }
 0x162   :  { %4901 = vmatpush.bf16.msra.mxu3 %v10904_v52 }
 0x163   :  { %4863 = vmatpush.bf16.msra.mxu0 %v10879_v55  ;;  %v3029_v15 = vpop.f32.mrf.mxu2  ;;  %v10917_v55 = vld [vmem:[#allocation8 + $0x350] sm:$0xff] }
 0x164   :  { %4876 = vmatpush.bf16.msra.mxu1 %v10887_v56  ;;  %v3042_v16 = vpop.f32.mrf.mxu3  ;;  %v10953_v15 = vld [vmem:[#allocation8 + $0x470] sm:$0xff] }
 0x165   :  { %4889 = vmatpush.bf16.msra.mxu2 %v10895_v58  ;;  %v10933_v58 = vld [vmem:[#allocation8 + $0x3d0] sm:$0xff] }
 0x166   :  { %4902 = vmatpush.bf16.msra.mxu3 %v10903_v59  ;;  %v10908_v59 = vld [vmem:[#allocation8 + $0x308] sm:$0xff]  ;;  %v10961_v16 = vld [vmem:[#allocation8 + $0x4b0] sm:$0xff] }
 0x167   :  { %4864 = vmatpush.bf16.msra.mxu0 %v10878_v61  ;;  %v10924_v61 = vld [vmem:[#allocation8 + $0x388] sm:$0xff] }
 0x168   :  { %4877 = vmatpush.bf16.msra.mxu1 %v10886_v62  ;;  %v10932_v62 = vld [vmem:[#allocation8 + $0x3c8] sm:$0xff] }
 0x169   :  { %4890 = vmatpush.bf16.msra.mxu2 %v10894_v63  ;;  %v3164_v63 = vld [vmem:[#allocation1 + $0x24] sm:$0xff] }
 0x16a   :  { %4903 = vmatpush.bf16.msra.mxu3 %v10902_v0  ;;  %v3166_v0 = vld [vmem:[#allocation1 + $0x36] sm:$0xff] }
 0x16b   :  { %4865 = vmatpush.bf16.msra.mxu0 %v10877_v6  ;;  %v10907_v6 = vld [vmem:[#allocation8 + $0x300] sm:$0xff] }
 0x16c   :  { %4878 = vmatpush.bf16.msra.mxu1 %v10885_v7  ;;  %v10915_v7 = vld [vmem:[#allocation8 + $0x340] sm:$0xff] }
 0x16d   :  { %4891 = vmatpush.bf16.msra.mxu2 %v10893_v9  ;;  %v10931_v9 = vld [vmem:[#allocation8 + $0x3c0] sm:$0xff] }
 0x16e   :  { %4904 = vmatpush.bf16.msra.mxu3 %v10901_v10  ;;  %v10946_v10 = vld [vmem:[#allocation8 + $0x438] sm:$0xff] }
 0x16f   :  { %4866 = vmatpush.bf16.msra.mxu0 %v10876_v11  ;;  %v10954_v11 = vld [vmem:[#allocation8 + $0x478] sm:$0xff] }
 0x170   :  { %4879 = vmatpush.bf16.msra.mxu1 %v10884_v12  ;;  %v10962_v12 = vld [vmem:[#allocation8 + $0x4b8] sm:$0xff] }
 0x171   :  { %4892 = vmatpush.bf16.msra.mxu2 %v10892_v13  ;;  %v10970_v13 = vld [vmem:[#allocation8 + $0x4f8] sm:$0xff] }
 0x172   :  { %4905 = vmatpush.bf16.msra.mxu3 %v10900_v14  ;;  %v10945_v14 = vld [vmem:[#allocation8 + $0x430] sm:$0xff] }
 0x173   :  { %4867 = vmatpush.bf16.msra.mxu0 %v10875_v17  ;;  %v3053_v37 = vpop.f32.mrf.mxu0  ;;  %v10969_v17 = vld [vmem:[#allocation8 + $0x4f0] sm:$0xff] }
 0x174   :  { %4880 = vmatpush.bf16.msra.mxu1 %v10883_v18  ;;  %v3054_v38 = vadd.f32 %v3053_v37, %v3041_v5  ;;  %v3066_v41 = vpop.f32.mrf.mxu1  ;;  %v93_v5 = vld [vmem:[#allocation2 + $0x10] sm:$0xff]  ;;  %v10944_v18 = vld [vmem:[#allocation8 + $0x428] sm:$0xff] }
 0x175   :  { %4893 = vmatpush.bf16.msra.mxu2 %v10891_v19  ;;  %3169 = vst [vmem:[#allocation1] ss:$9 sm:$0xff] %v93_v5  ;;  %v10952_v19 = vld [vmem:[#allocation8 + $0x468] sm:$0xff] }
 0x176   :  { %4906 = vmatpush.bf16.msra.mxu3 %v10899_v20  ;;  %4868 = vmatmul.bf16.vlgmr.msra.gmra.mxu0 %v3160_v25  ;;  %v3067_v44 = vadd.f32 %v3066_v41, %v3054_v38  ;;  %v10960_v20 = vld [vmem:[#allocation8 + $0x4a8] sm:$0xff]  ;;  %v10951_v25 = vld [vmem:[#allocation8 + $0x460] sm:$0xff] }
 0x177   :  { %4912 = vmatpush.bf16.msrb.mxu0 %v10914_v21  ;;  %4881 = vmatmul.bf16.vlgmr.msra.gmra.mxu1 %v3161_v27  ;;  %v10968_v21 = vld [vmem:[#allocation8 + $0x4e8] sm:$0xff]  ;;  %v10959_v27 = vld [vmem:[#allocation8 + $0x4a0] sm:$0xff] }
 0x178   :  { %4925 = vmatpush.bf16.msrb.mxu1 %v10922_v22  ;;  %4894 = vmatmul.bf16.vlgmr.msra.gmra.mxu2 %v3162_v26  ;;  %v11000_v5 = vld [vmem:[#allocation8 + $0x5e8] sm:$0xff] }
 0x179   :  { %4938 = vmatpush.bf16.msrb.mxu2 %v10930_v23  ;;  %4907 = vmatmul.bf16.vlgmr.msra.gmra.mxu3 %v3163_v28  ;;  %v10967_v28 = vld [vmem:[#allocation8 + $0x4e0] sm:$0xff] }
 0x17a   :  { %4951 = vmatpush.bf16.msrb.mxu3 %v10938_v24  ;;  %v10943_v24 = vld [vmem:[#allocation8 + $0x420] sm:$0xff] }
 0x17b   :  { %4913 = vmatpush.bf16.msrb.mxu0 %v10913_v29  ;;  %v3079_v49 = vpop.f32.mrf.mxu2  ;;  %v3055_v52 = vpop.f32.mrf.mxu0 }
 0x17c   :  { %4926 = vmatpush.bf16.msrb.mxu1 %v10921_v30  ;;  %v3080_v50 = vadd.f32 %v3079_v49, %v3067_v44  ;;  %v3092_v51 = vpop.f32.mrf.mxu3  ;;  %v3068_v56 = vpop.f32.mrf.mxu1  ;;  %v10942_v30 = vld [vmem:[#allocation8 + $0x418] sm:$0xff]  ;;  %v10940_v44 = vld [vmem:[#allocation8 + $0x408] sm:$0xff]  ;;  %v10955_v52 = vld [vmem:[#allocation8 + $0x480] sm:$0xff] }
 0x17d   :  { %4939 = vmatpush.bf16.msrb.mxu2 %v10929_v31  ;;  %v10950_v31 = vld [vmem:[#allocation8 + $0x458] sm:$0xff] }
 0x17e   :  { %4952 = vmatpush.bf16.msrb.mxu3 %v10937_v32  ;;  %v11802_v53 = vadd.f32 %v3092_v51, %v3080_v50  ;;  %v10958_v32 = vld [vmem:[#allocation8 + $0x498] sm:$0xff]  ;;  %v10939_v50 = vld [vmem:[#allocation8 + $0x400] sm:$0xff] }
 0x17f   :  { %4914 = vmatpush.bf16.msrb.mxu0 %v10912_v33  ;;  %v10966_v33 = vld [vmem:[#allocation8 + $0x4d8] sm:$0xff]  ;;  %v10947_v51 = vld [vmem:[#allocation8 + $0x440] sm:$0xff] }
 0x180   :  { %4927 = vmatpush.bf16.msrb.mxu1 %v10920_v34  ;;  %v10994_v56 = vld [vmem:[#allocation8 + $0x5b8] sm:$0xff] }
 0x181   :  { %4940 = vmatpush.bf16.msrb.mxu2 %v10928_v35 }
 0x182   :  { %4953 = vmatpush.bf16.msrb.mxu3 %v10936_v36 }
 0x183   :  { %4915 = vmatpush.bf16.msrb.mxu0 %v10911_v39  ;;  %v3081_v1 = vpop.f32.mrf.mxu2  ;;  %v10941_v39 = vld [vmem:[#allocation8 + $0x410] sm:$0xff] }
 0x184   :  { %4928 = vmatpush.bf16.msrb.mxu1 %v10919_v40  ;;  %v3094_v4 = vpop.f32.mrf.mxu3  ;;  %v10949_v40 = vld [vmem:[#allocation8 + $0x450] sm:$0xff] }
 0x185   :  { %4941 = vmatpush.bf16.msrb.mxu2 %v10927_v42  ;;  %v10957_v42 = vld [vmem:[#allocation8 + $0x490] sm:$0xff]  ;;  %v10992_v4 = vld [vmem:[#allocation8 + $0x5a8] sm:$0xff] }
 0x186   :  { %4954 = vmatpush.bf16.msrb.mxu3 %v10935_v43  ;;  %v10965_v43 = vld [vmem:[#allocation8 + $0x4d0] sm:$0xff] }
 0x187   :  { %4916 = vmatpush.bf16.msrb.mxu0 %v10910_v45  ;;  %v10948_v45 = vld [vmem:[#allocation8 + $0x448] sm:$0xff]  ;;  %v11001_v1 = vld [vmem:[#allocation8 + $0x5f0] sm:$0xff] }
 0x188   :  { %4929 = vmatpush.bf16.msrb.mxu1 %v10918_v46  ;;  %v10956_v46 = vld [vmem:[#allocation8 + $0x488] sm:$0xff] }
 0x189   :  { %4942 = vmatpush.bf16.msrb.mxu2 %v10926_v47  ;;  %v10964_v47 = vld [vmem:[#allocation8 + $0x4c8] sm:$0xff] }
 0x18a   :  { %4955 = vmatpush.bf16.msrb.mxu3 %v10934_v48 }
 0x18b   :  { %4917 = vmatpush.bf16.msrb.mxu0 %v10909_v54  ;;  %v10978_v54 = vld [vmem:[#allocation8 + $0x538] sm:$0xff] }
 0x18c   :  { %4930 = vmatpush.bf16.msrb.mxu1 %v10917_v55  ;;  %v10986_v55 = vld [vmem:[#allocation8 + $0x578] sm:$0xff] }
 0x18d   :  { %4943 = vmatpush.bf16.msrb.mxu2 %v10925_v57  ;;  %v11002_v57 = vld [vmem:[#allocation8 + $0x5f8] sm:$0xff] }
 0x18e   :  { %4956 = vmatpush.bf16.msrb.mxu3 %v10933_v58  ;;  %v3170_v58 = vld [vmem:[#allocation1] sm:$0xff] }
 0x18f   :  { %4918 = vmatpush.bf16.msrb.mxu0 %v10908_v59  ;;  %v3172_v59 = vld [vmem:[#allocation1 + $0x12] sm:$0xff] }
 0x190   :  { %4931 = vmatpush.bf16.msrb.mxu1 %v10916_v60  ;;  %v3171_v60 = vld [vmem:[#allocation1 + $0x9] sm:$0xff] }
 0x191   :  { %4944 = vmatpush.bf16.msrb.mxu2 %v10924_v61  ;;  %v3173_v61 = vld [vmem:[#allocation1 + $0x1b] sm:$0xff] }
 0x192   :  { %4957 = vmatpush.bf16.msrb.mxu3 %v10932_v62  ;;  %v10977_v62 = vld [vmem:[#allocation8 + $0x530] sm:$0xff] }
 0x193   :  { %4919 = vmatpush.bf16.msrb.mxu0 %v10907_v6  ;;  %v3105_v22 = vpop.f32.mrf.mxu0 }
 0x194   :  { %4932 = vmatpush.bf16.msrb.mxu1 %v10915_v7  ;;  %v3106_v23 = vadd.f32 %v3105_v22, %v11802_v53  ;;  %v3118_v26 = vpop.f32.mrf.mxu1  ;;  %v10963_v53 = vld [vmem:[#allocation8 + $0x4c0] sm:$0xff] }
 0x195   :  { %4945 = vmatpush.bf16.msrb.mxu2 %v10923_v8  ;;  %v10975_v8 = vld [vmem:[#allocation8 + $0x520] sm:$0xff] }
 0x196   :  { %4958 = vmatpush.bf16.msrb.mxu3 %v10931_v9  ;;  %4920 = vmatmul.bf16.vlgmr.msrb.gmra.mxu0 %v3164_v63  ;;  %v3119_v29 = vadd.f32 %v3118_v26, %v3106_v23  ;;  %v10985_v63 = vld [vmem:[#allocation8 + $0x570] sm:$0xff]  ;;  %v10983_v9 = vld [vmem:[#allocation8 + $0x560] sm:$0xff] }
 0x197   :  { %4964 = vmatpush.bf16.msra.mxu0 %v10946_v10  ;;  %4933 = vmatmul.bf16.vlgmr.msrb.gmra.mxu1 %v3165_v2  ;;  %v10976_v2 = vld [vmem:[#allocation8 + $0x528] sm:$0xff]  ;;  %v10973_v23 = vld [vmem:[#allocation8 + $0x510] sm:$0xff] }
 0x198   :  { %4977 = vmatpush.bf16.msra.mxu1 %v10954_v11  ;;  %4946 = vmatmul.bf16.vlgmr.msrb.gmra.mxu2 %v3166_v0  ;;  %v10993_v0 = vld [vmem:[#allocation8 + $0x5b0] sm:$0xff]  ;;  %v10991_v11 = vld [vmem:[#allocation8 + $0x5a0] sm:$0xff] }
 0x199   :  { %4990 = vmatpush.bf16.msra.mxu2 %v10962_v12  ;;  %4959 = vmatmul.bf16.vlgmr.msrb.gmra.mxu3 %v3167_v3  ;;  %v10984_v3 = vld [vmem:[#allocation8 + $0x568] sm:$0xff]  ;;  %v10999_v12 = vld [vmem:[#allocation8 + $0x5e0] sm:$0xff]  ;;  %v10989_v26 = vld [vmem:[#allocation8 + $0x590] sm:$0xff] }
 0x19a   :  { %5003 = vmatpush.bf16.msra.mxu3 %v10970_v13 }
 0x19b   :  { %4965 = vmatpush.bf16.msra.mxu0 %v10945_v14  ;;  %v3131_v34 = vpop.f32.mrf.mxu2  ;;  %v3107_v37 = vpop.f32.mrf.mxu0  ;;  %v10974_v14 = vld [vmem:[#allocation8 + $0x518] sm:$0xff] }
 0x19c   :  { %4978 = vmatpush.bf16.msra.mxu1 %v10953_v15  ;;  %v3132_v35 = vadd.f32 %v3131_v34, %v3119_v29  ;;  %v3144_v36 = vpop.f32.mrf.mxu3  ;;  %v3120_v41 = vpop.f32.mrf.mxu1  ;;  %v10982_v15 = vld [vmem:[#allocation8 + $0x558] sm:$0xff]  ;;  %v10980_v29 = vld [vmem:[#allocation8 + $0x548] sm:$0xff] }
 0x19d   :  { %4991 = vmatpush.bf16.msra.mxu2 %v10961_v16  ;;  %v10990_v16 = vld [vmem:[#allocation8 + $0x598] sm:$0xff]  ;;  %v10987_v41 = vld [vmem:[#allocation8 + $0x580] sm:$0xff] }
 0x19e   :  { %5004 = vmatpush.bf16.msra.mxu3 %v10969_v17  ;;  %v3145_v38 = vadd.f32 %v3144_v36, %v3132_v35  ;;  %v10998_v17 = vld [vmem:[#allocation8 + $0x5d8] sm:$0xff]  ;;  %v3175_v35 = vld [vmem:[#allocation1 + $0x2d] sm:$0xff] }
 0x19f   :  { %4966 = vmatpush.bf16.msra.mxu0 %v10944_v18  ;;  %v3177_v36 = vld [vmem:[#allocation1 + $0x3f] sm:$0xff] }
 0x1a0   :  { %4979 = vmatpush.bf16.msra.mxu1 %v10952_v19 }
 0x1a1   :  { %4992 = vmatpush.bf16.msra.mxu2 %v10960_v20 }
 0x1a2   :  { %5005 = vmatpush.bf16.msra.mxu3 %v10968_v21 }
 0x1a3   :  { %4967 = vmatpush.bf16.msra.mxu0 %v10943_v24  ;;  %v3133_v48 = vpop.f32.mrf.mxu2  ;;  %v10981_v24 = vld [vmem:[#allocation8 + $0x550] sm:$0xff] }
 0x1a4   :  { %4980 = vmatpush.bf16.msra.mxu1 %v10951_v25  ;;  %v3146_v49 = vpop.f32.mrf.mxu3  ;;  %v11017_v48 = vld [vmem:[#allocation8 + $0x670] sm:$0xff] }
 0x1a5   :  { %4993 = vmatpush.bf16.msra.mxu2 %v10959_v27  ;;  %v10997_v27 = vld [vmem:[#allocation8 + $0x5d0] sm:$0xff] }
 0x1a6   :  { %5006 = vmatpush.bf16.msra.mxu3 %v10967_v28  ;;  %v10972_v28 = vld [vmem:[#allocation8 + $0x508] sm:$0xff]  ;;  %v11025_v49 = vld [vmem:[#allocation8 + $0x6b0] sm:$0xff] }
 0x1a7   :  { %4968 = vmatpush.bf16.msra.mxu0 %v10942_v30  ;;  %v10988_v30 = vld [vmem:[#allocation8 + $0x588] sm:$0xff] }
 0x1a8   :  { %4981 = vmatpush.bf16.msra.mxu1 %v10950_v31  ;;  %v10996_v31 = vld [vmem:[#allocation8 + $0x5c8] sm:$0xff] }
 0x1a9   :  { %4994 = vmatpush.bf16.msra.mxu2 %v10958_v32  ;;  %v3174_v32 = vld [vmem:[#allocation1 + $0x24] sm:$0xff] }
 0x1aa   :  { %5007 = vmatpush.bf16.msra.mxu3 %v10966_v33  ;;  %v3176_v33 = vld [vmem:[#allocation1 + $0x36] sm:$0xff] }
 0x1ab   :  { %4969 = vmatpush.bf16.msra.mxu0 %v10941_v39  ;;  %v10971_v39 = vld [vmem:[#allocation8 + $0x500] sm:$0xff] }
 0x1ac   :  { %4982 = vmatpush.bf16.msra.mxu1 %v10949_v40  ;;  %v10979_v40 = vld [vmem:[#allocation8 + $0x540] sm:$0xff] }
 0x1ad   :  { %4995 = vmatpush.bf16.msra.mxu2 %v10957_v42  ;;  %v10995_v42 = vld [vmem:[#allocation8 + $0x5c0] sm:$0xff] }
 0x1ae   :  { %5008 = vmatpush.bf16.msra.mxu3 %v10965_v43  ;;  %v11010_v43 = vld [vmem:[#allocation8 + $0x638] sm:$0xff] }
 0x1af   :  { %4970 = vmatpush.bf16.msra.mxu0 %v10940_v44  ;;  %v11018_v44 = vld [vmem:[#allocation8 + $0x678] sm:$0xff] }
 0x1b0   :  { %4983 = vmatpush.bf16.msra.mxu1 %v10948_v45  ;;  %v11026_v45 = vld [vmem:[#allocation8 + $0x6b8] sm:$0xff] }
 0x1b1   :  { %4996 = vmatpush.bf16.msra.mxu2 %v10956_v46  ;;  %v11034_v46 = vld [vmem:[#allocation8 + $0x6f8] sm:$0xff] }
 0x1b2   :  { %5009 = vmatpush.bf16.msra.mxu3 %v10964_v47  ;;  %v11009_v47 = vld [vmem:[#allocation8 + $0x630] sm:$0xff] }
 0x1b3   :  { %4971 = vmatpush.bf16.msra.mxu0 %v10939_v50  ;;  %v4765_v6 = vpop.f32.mrf.mxu0  ;;  %v11033_v50 = vld [vmem:[#allocation8 + $0x6f0] sm:$0xff] }
 0x1b4   :  { %4984 = vmatpush.bf16.msra.mxu1 %v10947_v51  ;;  %v4766_v7 = vadd.f32 %v4765_v6, %v3145_v38  ;;  %v4778_v10 = vpop.f32.mrf.mxu1  ;;  %v94_v38 = vld [vmem:[#allocation2 + $0x18] sm:$0xff]  ;;  %v11008_v51 = vld [vmem:[#allocation8 + $0x628] sm:$0xff] }
 0x1b5   :  { %4997 = vmatpush.bf16.msra.mxu2 %v10955_v52  ;;  %3179 = vst [vmem:[#allocation1] ss:$9 sm:$0xff] %v94_v38  ;;  %v11016_v52 = vld [vmem:[#allocation8 + $0x668] sm:$0xff] }
 0x1b6   :  { %5010 = vmatpush.bf16.msra.mxu3 %v10963_v53  ;;  %4972 = vmatmul.bf16.vlgmr.msra.gmra.mxu0 %v3170_v58  ;;  %v4779_v13 = vadd.f32 %v4778_v10, %v4766_v7  ;;  %v11024_v53 = vld [vmem:[#allocation8 + $0x6a8] sm:$0xff]  ;;  %v11015_v58 = vld [vmem:[#allocation8 + $0x660] sm:$0xff] }
 0x1b7   :  { %5016 = vmatpush.bf16.msrb.mxu0 %v10978_v54  ;;  %4985 = vmatmul.bf16.vlgmr.msra.gmra.mxu1 %v3171_v60  ;;  %v11032_v54 = vld [vmem:[#allocation8 + $0x6e8] sm:$0xff]  ;;  %v11023_v60 = vld [vmem:[#allocation8 + $0x6a0] sm:$0xff] }
 0x1b8   :  { %5029 = vmatpush.bf16.msrb.mxu1 %v10986_v55  ;;  %4998 = vmatmul.bf16.vlgmr.msra.gmra.mxu2 %v3172_v59  ;;  %v11064_v38 = vld [vmem:[#allocation8 + $0x7e8] sm:$0xff] }
 0x1b9   :  { %5042 = vmatpush.bf16.msrb.mxu2 %v10994_v56  ;;  %5011 = vmatmul.bf16.vlgmr.msra.gmra.mxu3 %v3173_v61  ;;  %v11031_v61 = vld [vmem:[#allocation8 + $0x6e0] sm:$0xff] }
 0x1ba   :  { %5055 = vmatpush.bf16.msrb.mxu3 %v11002_v57  ;;  %v11007_v57 = vld [vmem:[#allocation8 + $0x620] sm:$0xff] }
 0x1bb   :  { %5017 = vmatpush.bf16.msrb.mxu0 %v10977_v62  ;;  %v4791_v18 = vpop.f32.mrf.mxu2  ;;  %v4767_v21 = vpop.f32.mrf.mxu0 }
 0x1bc   :  { %5030 = vmatpush.bf16.msrb.mxu1 %v10985_v63  ;;  %v4792_v19 = vadd.f32 %v4791_v18, %v4779_v13  ;;  %v4804_v20 = vpop.f32.mrf.mxu3  ;;  %v4780_v25 = vpop.f32.mrf.mxu1  ;;  %v11006_v63 = vld [vmem:[#allocation8 + $0x618] sm:$0xff]  ;;  %v11004_v13 = vld [vmem:[#allocation8 + $0x608] sm:$0xff]  ;;  %v11019_v21 = vld [vmem:[#allocation8 + $0x680] sm:$0xff] }
 0x1bd   :  { %5043 = vmatpush.bf16.msrb.mxu2 %v10993_v0  ;;  %v11014_v0 = vld [vmem:[#allocation8 + $0x658] sm:$0xff] }
 0x1be   :  { %5056 = vmatpush.bf16.msrb.mxu3 %v11001_v1  ;;  %v11805_v22 = vadd.f32 %v4804_v20, %v4792_v19  ;;  %v11022_v1 = vld [vmem:[#allocation8 + $0x698] sm:$0xff]  ;;  %v11003_v19 = vld [vmem:[#allocation8 + $0x600] sm:$0xff] }
 0x1bf   :  { %5018 = vmatpush.bf16.msrb.mxu0 %v10976_v2  ;;  %v11030_v2 = vld [vmem:[#allocation8 + $0x6d8] sm:$0xff]  ;;  %v11011_v20 = vld [vmem:[#allocation8 + $0x640] sm:$0xff] }
 0x1c0   :  { %5031 = vmatpush.bf16.msrb.mxu1 %v10984_v3  ;;  %v11058_v25 = vld [vmem:[#allocation8 + $0x7b8] sm:$0xff] }
 0x1c1   :  { %5044 = vmatpush.bf16.msrb.mxu2 %v10992_v4 }
 0x1c2   :  { %5057 = vmatpush.bf16.msrb.mxu3 %v11000_v5 }
 0x1c3   :  { %5019 = vmatpush.bf16.msrb.mxu0 %v10975_v8  ;;  %v4793_v34 = vpop.f32.mrf.mxu2  ;;  %v11005_v8 = vld [vmem:[#allocation8 + $0x610] sm:$0xff] }
 0x1c4   :  { %5032 = vmatpush.bf16.msrb.mxu1 %v10983_v9  ;;  %v4806_v37 = vpop.f32.mrf.mxu3  ;;  %v11013_v9 = vld [vmem:[#allocation8 + $0x650] sm:$0xff] }
 0x1c5   :  { %5045 = vmatpush.bf16.msrb.mxu2 %v10991_v11  ;;  %v11021_v11 = vld [vmem:[#allocation8 + $0x690] sm:$0xff]  ;;  %v11056_v37 = vld [vmem:[#allocation8 + $0x7a8] sm:$0xff] }
 0x1c6   :  { %5058 = vmatpush.bf16.msrb.mxu3 %v10999_v12  ;;  %v11029_v12 = vld [vmem:[#allocation8 + $0x6d0] sm:$0xff] }
 0x1c7   :  { %5020 = vmatpush.bf16.msrb.mxu0 %v10974_v14  ;;  %v11012_v14 = vld [vmem:[#allocation8 + $0x648] sm:$0xff]  ;;  %v11065_v34 = vld [vmem:[#allocation8 + $0x7f0] sm:$0xff] }
 0x1c8   :  { %5033 = vmatpush.bf16.msrb.mxu1 %v10982_v15  ;;  %v11020_v15 = vld [vmem:[#allocation8 + $0x688] sm:$0xff] }
 0x1c9   :  { %5046 = vmatpush.bf16.msrb.mxu2 %v10990_v16  ;;  %v11028_v16 = vld [vmem:[#allocation8 + $0x6c8] sm:$0xff] }
 0x1ca   :  { %5059 = vmatpush.bf16.msrb.mxu3 %v10998_v17 }
 0x1cb   :  { %5021 = vmatpush.bf16.msrb.mxu0 %v10973_v23  ;;  %v11042_v23 = vld [vmem:[#allocation8 + $0x738] sm:$0xff] }
 0x1cc   :  { %5034 = vmatpush.bf16.msrb.mxu1 %v10981_v24  ;;  %v11050_v24 = vld [vmem:[#allocation8 + $0x778] sm:$0xff] }
 0x1cd   :  { %5047 = vmatpush.bf16.msrb.mxu2 %v10989_v26  ;;  %v11066_v26 = vld [vmem:[#allocation8 + $0x7f8] sm:$0xff] }
 0x1ce   :  { %5060 = vmatpush.bf16.msrb.mxu3 %v10997_v27  ;;  %v3180_v27 = vld [vmem:[#allocation1] sm:$0xff] }
 0x1cf   :  { %5022 = vmatpush.bf16.msrb.mxu0 %v10972_v28  ;;  %v3182_v28 = vld [vmem:[#allocation1 + $0x12] sm:$0xff] }
 0x1d0   :  { %5035 = vmatpush.bf16.msrb.mxu1 %v10980_v29  ;;  %v3181_v29 = vld [vmem:[#allocation1 + $0x9] sm:$0xff] }
 0x1d1   :  { %5048 = vmatpush.bf16.msrb.mxu2 %v10988_v30  ;;  %v3183_v30 = vld [vmem:[#allocation1 + $0x1b] sm:$0xff] }
 0x1d2   :  { %5061 = vmatpush.bf16.msrb.mxu3 %v10996_v31  ;;  %v11041_v31 = vld [vmem:[#allocation8 + $0x730] sm:$0xff] }
 0x1d3   :  { %5023 = vmatpush.bf16.msrb.mxu0 %v10971_v39  ;;  %v4817_v55 = vpop.f32.mrf.mxu0 }
 0x1d4   :  { %5036 = vmatpush.bf16.msrb.mxu1 %v10979_v40  ;;  %v4818_v56 = vadd.f32 %v4817_v55, %v11805_v22  ;;  %v4830_v59 = vpop.f32.mrf.mxu1  ;;  %v11027_v22 = vld [vmem:[#allocation8 + $0x6c0] sm:$0xff] }
 0x1d5   :  { %5049 = vmatpush.bf16.msrb.mxu2 %v10987_v41  ;;  %v11039_v41 = vld [vmem:[#allocation8 + $0x720] sm:$0xff] }
 0x1d6   :  { %5062 = vmatpush.bf16.msrb.mxu3 %v10995_v42  ;;  %5024 = vmatmul.bf16.vlgmr.msrb.gmra.mxu0 %v3174_v32  ;;  %v4831_v62 = vadd.f32 %v4830_v59, %v4818_v56  ;;  %v11049_v32 = vld [vmem:[#allocation8 + $0x770] sm:$0xff]  ;;  %v11047_v42 = vld [vmem:[#allocation8 + $0x760] sm:$0xff] }
 0x1d7   :  { %5068 = vmatpush.bf16.msra.mxu0 %v11010_v43  ;;  %5037 = vmatmul.bf16.vlgmr.msrb.gmra.mxu1 %v3175_v35  ;;  %v11040_v35 = vld [vmem:[#allocation8 + $0x728] sm:$0xff]  ;;  %v11037_v56 = vld [vmem:[#allocation8 + $0x710] sm:$0xff] }
 0x1d8   :  { %5081 = vmatpush.bf16.msra.mxu1 %v11018_v44  ;;  %5050 = vmatmul.bf16.vlgmr.msrb.gmra.mxu2 %v3176_v33  ;;  %v11057_v33 = vld [vmem:[#allocation8 + $0x7b0] sm:$0xff]  ;;  %v11055_v44 = vld [vmem:[#allocation8 + $0x7a0] sm:$0xff] }
 0x1d9   :  { %5094 = vmatpush.bf16.msra.mxu2 %v11026_v45  ;;  %5063 = vmatmul.bf16.vlgmr.msrb.gmra.mxu3 %v3177_v36  ;;  %v11048_v36 = vld [vmem:[#allocation8 + $0x768] sm:$0xff]  ;;  %v11063_v45 = vld [vmem:[#allocation8 + $0x7e0] sm:$0xff]  ;;  %v11053_v59 = vld [vmem:[#allocation8 + $0x790] sm:$0xff] }
 0x1da   :  { %5107 = vmatpush.bf16.msra.mxu3 %v11034_v46 }
 0x1db   :  { %5069 = vmatpush.bf16.msra.mxu0 %v11009_v47  ;;  %v4843_v3 = vpop.f32.mrf.mxu2  ;;  %v4819_v6 = vpop.f32.mrf.mxu0  ;;  %v11038_v47 = vld [vmem:[#allocation8 + $0x718] sm:$0xff] }
 0x1dc   :  { %5082 = vmatpush.bf16.msra.mxu1 %v11017_v48  ;;  %v4844_v4 = vadd.f32 %v4843_v3, %v4831_v62  ;;  %v4856_v5 = vpop.f32.mrf.mxu3  ;;  %v4832_v10 = vpop.f32.mrf.mxu1  ;;  %v11046_v48 = vld [vmem:[#allocation8 + $0x758] sm:$0xff]  ;;  %v11044_v62 = vld [vmem:[#allocation8 + $0x748] sm:$0xff]  ;;  %v11035_v3 = vld [vmem:[#allocation8 + $0x700] sm:$0xff] }
 0x1dd   :  { %5095 = vmatpush.bf16.msra.mxu2 %v11025_v49  ;;  %v11054_v49 = vld [vmem:[#allocation8 + $0x798] sm:$0xff]  ;;  %v11059_v6 = vld [vmem:[#allocation8 + $0x7c0] sm:$0xff] }
 0x1de   :  { %5108 = vmatpush.bf16.msra.mxu3 %v11033_v50  ;;  %v4857_v7 = vadd.f32 %v4856_v5, %v4844_v4  ;;  %v11062_v50 = vld [vmem:[#allocation8 + $0x7d8] sm:$0xff]  ;;  %v11043_v4 = vld [vmem:[#allocation8 + $0x740] sm:$0xff] }
 0x1df   :  { %5070 = vmatpush.bf16.msra.mxu0 %v11008_v51  ;;  %v11051_v5 = vld [vmem:[#allocation8 + $0x780] sm:$0xff]  ;;  %v11354_v10 = vld [vmem:[#allocation8 + $0x10f8] sm:$0xff] }
 0x1e0   :  { %5083 = vmatpush.bf16.msra.mxu1 %v11016_v52 }
 0x1e1   :  { %5096 = vmatpush.bf16.msra.mxu2 %v11024_v53 }
 0x1e2   :  { %5109 = vmatpush.bf16.msra.mxu3 %v11032_v54 }
 0x1e3   :  { %5071 = vmatpush.bf16.msra.mxu0 %v11007_v57  ;;  %v4845_v17 = vpop.f32.mrf.mxu2  ;;  %v11045_v57 = vld [vmem:[#allocation8 + $0x750] sm:$0xff] }
 0x1e4   :  { %5084 = vmatpush.bf16.msra.mxu1 %v11015_v58  ;;  %v4858_v18 = vpop.f32.mrf.mxu3  ;;  %v11345_v17 = vld [vmem:[#allocation8 + $0x10b0] sm:$0xff] }
 0x1e5   :  { %5097 = vmatpush.bf16.msra.mxu2 %v11023_v60  ;;  %v11061_v60 = vld [vmem:[#allocation8 + $0x7d0] sm:$0xff] }
 0x1e6   :  { %5110 = vmatpush.bf16.msra.mxu3 %v11031_v61  ;;  %v11036_v61 = vld [vmem:[#allocation8 + $0x708] sm:$0xff]  ;;  %v11353_v18 = vld [vmem:[#allocation8 + $0x10f0] sm:$0xff] }
 0x1e7   :  { %5072 = vmatpush.bf16.msra.mxu0 %v11006_v63  ;;  %v11052_v63 = vld [vmem:[#allocation8 + $0x788] sm:$0xff] }
 0x1e8   :  { %5085 = vmatpush.bf16.msra.mxu1 %v11014_v0  ;;  %v11060_v0 = vld [vmem:[#allocation8 + $0x7c8] sm:$0xff] }
 0x1e9   :  { %5098 = vmatpush.bf16.msra.mxu2 %v11022_v1 }
 0x1ea   :  { %5111 = vmatpush.bf16.msra.mxu3 %v11030_v2 }
 0x1eb   :  { %5073 = vmatpush.bf16.msra.mxu0 %v11005_v8  ;;  %v11338_v8 = vld [vmem:[#allocation8 + $0x1078] sm:$0xff] }
 0x1ec   :  { %5086 = vmatpush.bf16.msra.mxu1 %v11013_v9  ;;  %v11346_v9 = vld [vmem:[#allocation8 + $0x10b8] sm:$0xff] }
 0x1ed   :  { %5099 = vmatpush.bf16.msra.mxu2 %v11021_v11  ;;  %v3184_v11 = vld [vmem:[#allocation1 + $0x24] sm:$0xff] }
 0x1ee   :  { %5112 = vmatpush.bf16.msra.mxu3 %v11029_v12  ;;  %v3186_v12 = vld [vmem:[#allocation1 + $0x36] sm:$0xff] }
 0x1ef   :  { %5074 = vmatpush.bf16.msra.mxu0 %v11004_v13  ;;  %v3185_v13 = vld [vmem:[#allocation1 + $0x2d] sm:$0xff] }
 0x1f0   :  { %5087 = vmatpush.bf16.msra.mxu1 %v11012_v14  ;;  %v3187_v14 = vld [vmem:[#allocation1 + $0x3f] sm:$0xff] }
 0x1f1   :  { %5100 = vmatpush.bf16.msra.mxu2 %v11020_v15  ;;  %v11329_v15 = vld [vmem:[#allocation8 + $0x1030] sm:$0xff] }
 0x1f2   :  { %5113 = vmatpush.bf16.msra.mxu3 %v11028_v16  ;;  %v11337_v16 = vld [vmem:[#allocation8 + $0x1070] sm:$0xff] }
 0x1f3   :  { %5075 = vmatpush.bf16.msra.mxu0 %v11003_v19  ;;  %v4869_v39 = vpop.f32.mrf.mxu0  ;;  %v11328_v19 = vld [vmem:[#allocation8 + $0x1028] sm:$0xff] }
 0x1f4   :  { %5088 = vmatpush.bf16.msra.mxu1 %v11011_v20  ;;  %v4870_v40 = vadd.f32 %v4869_v39, %v4857_v7  ;;  %v4882_v43 = vpop.f32.mrf.mxu1  ;;  %v11330_v7 = vld [vmem:[#allocation8 + $0x1038] sm:$0xff]  ;;  %v11336_v20 = vld [vmem:[#allocation8 + $0x1068] sm:$0xff] }
 0x1f5   :  { %5101 = vmatpush.bf16.msra.mxu2 %v11019_v21  ;;  %v11344_v21 = vld [vmem:[#allocation8 + $0x10a8] sm:$0xff] }
 0x1f6   :  { %5114 = vmatpush.bf16.msra.mxu3 %v11027_v22  ;;  %5076 = vmatmul.bf16.vlgmr.msra.gmra.mxu0 %v3180_v27  ;;  %v4883_v46 = vadd.f32 %v4882_v43, %v4870_v40  ;;  %v11352_v22 = vld [vmem:[#allocation8 + $0x10e8] sm:$0xff] }
 0x1f7   :  { %5120 = vmatpush.bf16.msrb.mxu0 %v11042_v23  ;;  %5089 = vmatmul.bf16.vlgmr.msra.gmra.mxu1 %v3181_v29  ;;  %v11351_v29 = vld [vmem:[#allocation8 + $0x10e0] sm:$0xff] }
 0x1f8   :  { %5133 = vmatpush.bf16.msrb.mxu1 %v11050_v24  ;;  %5102 = vmatmul.bf16.vlgmr.msra.gmra.mxu2 %v3182_v28  ;;  %v11343_v28 = vld [vmem:[#allocation8 + $0x10a0] sm:$0xff] }
 0x1f9   :  { %5146 = vmatpush.bf16.msrb.mxu2 %v11058_v25  ;;  %5115 = vmatmul.bf16.vlgmr.msra.gmra.mxu3 %v3183_v30  ;;  %v11327_v25 = vld [vmem:[#allocation8 + $0x1020] sm:$0xff] }
 0x1fa   :  { %5159 = vmatpush.bf16.msrb.mxu3 %v11066_v26  ;;  %v11335_v26 = vld [vmem:[#allocation8 + $0x1060] sm:$0xff] }
 0x1fb   :  { %5121 = vmatpush.bf16.msrb.mxu0 %v11041_v31  ;;  %v4895_v51 = vpop.f32.mrf.mxu2  ;;  %v4871_v54 = vpop.f32.mrf.mxu0  ;;  %v5172_v31 = vld [vmem:[#allocation7] sm:$0xff] }
 0x1fc   :  { %5134 = vmatpush.bf16.msrb.mxu1 %v11049_v32  ;;  %v4896_v52 = vadd.f32 %v4895_v51, %v4883_v46  ;;  %v4908_v53 = vpop.f32.mrf.mxu3  ;;  %v4884_v58 = vpop.f32.mrf.mxu1  ;;  %5690 = vst [vmem:[#allocation1] ss:$9 sm:$0xff] %v5172_v31  ;;  %v11326_v32 = vld [vmem:[#allocation8 + $0x1018] sm:$0xff]  ;;  %v11324_v46 = vld [vmem:[#allocation8 + $0x1008] sm:$0xff]  ;;  %v11339_v54 = vld [vmem:[#allocation8 + $0x1080] sm:$0xff] }
 0x1fd   :  { %5147 = vmatpush.bf16.msrb.mxu2 %v11057_v33  ;;  %v11334_v33 = vld [vmem:[#allocation8 + $0x1058] sm:$0xff]  ;;  %v11364_v31 = vld [vmem:[#allocation8 + $0x1148] sm:$0xff] }
 0x1fe   :  { %5160 = vmatpush.bf16.msrb.mxu3 %v11065_v34  ;;  %v4909_v55 = vadd.f32 %v4908_v53, %v4896_v52  ;;  %v11342_v34 = vld [vmem:[#allocation8 + $0x1098] sm:$0xff]  ;;  %v11323_v52 = vld [vmem:[#allocation8 + $0x1000] sm:$0xff] }
 0x1ff   :  { %5122 = vmatpush.bf16.msrb.mxu0 %v11040_v35  ;;  %v11350_v35 = vld [vmem:[#allocation8 + $0x10d8] sm:$0xff]  ;;  %v11331_v53 = vld [vmem:[#allocation8 + $0x1040] sm:$0xff] }
 0x200   :  { %5135 = vmatpush.bf16.msrb.mxu1 %v11048_v36  ;;  %v11378_v58 = vld [vmem:[#allocation8 + $0x11b8] sm:$0xff] }
 0x201   :  { %5148 = vmatpush.bf16.msrb.mxu2 %v11056_v37 }
 0x202   :  { %5161 = vmatpush.bf16.msrb.mxu3 %v11064_v38 }
 0x203   :  { %5123 = vmatpush.bf16.msrb.mxu0 %v11039_v41  ;;  %v4897_v1 = vpop.f32.mrf.mxu2  ;;  %v11325_v41 = vld [vmem:[#allocation8 + $0x1010] sm:$0xff] }
 0x204   :  { %5136 = vmatpush.bf16.msrb.mxu1 %v11047_v42  ;;  %v4910_v2 = vpop.f32.mrf.mxu3  ;;  %v11333_v42 = vld [vmem:[#allocation8 + $0x1050] sm:$0xff]  ;;  %v5692_v1 = vld [vmem:[#allocation1 + $0x9] sm:$0xff] }
 0x205   :  { %5149 = vmatpush.bf16.msrb.mxu2 %v11055_v44  ;;  %v11341_v44 = vld [vmem:[#allocation8 + $0x1090] sm:$0xff] }
 0x206   :  { %5162 = vmatpush.bf16.msrb.mxu3 %v11063_v45  ;;  %v11349_v45 = vld [vmem:[#allocation8 + $0x10d0] sm:$0xff] }
 0x207   :  { %5124 = vmatpush.bf16.msrb.mxu0 %v11038_v47  ;;  %v11332_v47 = vld [vmem:[#allocation8 + $0x1048] sm:$0xff]  ;;  %v11377_v2 = vld [vmem:[#allocation8 + $0x11b0] sm:$0xff] }
 0x208   :  { %5137 = vmatpush.bf16.msrb.mxu1 %v11046_v48  ;;  %v11340_v48 = vld [vmem:[#allocation8 + $0x1088] sm:$0xff] }
 0x209   :  { %5150 = vmatpush.bf16.msrb.mxu2 %v11054_v49  ;;  %v11348_v49 = vld [vmem:[#allocation8 + $0x10c8] sm:$0xff] }
 0x20a   :  { %5163 = vmatpush.bf16.msrb.mxu3 %v11062_v50 }
 0x20b   :  { %5125 = vmatpush.bf16.msrb.mxu0 %v11037_v56  ;;  %v11362_v56 = vld [vmem:[#allocation8 + $0x1138] sm:$0xff] }
 0x20c   :  { %5138 = vmatpush.bf16.msrb.mxu1 %v11045_v57  ;;  %v11370_v57 = vld [vmem:[#allocation8 + $0x1178] sm:$0xff] }
 0x20d   :  { %5151 = vmatpush.bf16.msrb.mxu2 %v11053_v59  ;;  %v11386_v59 = vld [vmem:[#allocation8 + $0x11f8] sm:$0xff] }
 0x20e   :  { %5164 = vmatpush.bf16.msrb.mxu3 %v11061_v60  ;;  %v11361_v60 = vld [vmem:[#allocation8 + $0x1130] sm:$0xff] }
 0x20f   :  { %5126 = vmatpush.bf16.msrb.mxu0 %v11036_v61  ;;  %v5693_v61 = vld [vmem:[#allocation1 + $0x12] sm:$0xff] }
 0x210   :  { %5139 = vmatpush.bf16.msrb.mxu1 %v11044_v62  ;;  %v5691_v62 = vld [vmem:[#allocation1] sm:$0xff] }
 0x211   :  { %5152 = vmatpush.bf16.msrb.mxu2 %v11052_v63  ;;  %v11369_v63 = vld [vmem:[#allocation8 + $0x1170] sm:$0xff] }
 0x212   :  { %5165 = vmatpush.bf16.msrb.mxu3 %v11060_v0  ;;  %v5694_v0 = vld [vmem:[#allocation1 + $0x1b] sm:$0xff] }
 0x213   :  { %5127 = vmatpush.bf16.msrb.mxu0 %v11035_v3  ;;  %v4921_v23 = vpop.f32.mrf.mxu0  ;;  %v11385_v3 = vld [vmem:[#allocation8 + $0x11f0] sm:$0xff] }
 0x214   :  { %5140 = vmatpush.bf16.msrb.mxu1 %v11043_v4  ;;  %v4922_v24 = vadd.f32 %v4921_v23, %v4909_v55  ;;  %v4934_v27 = vpop.f32.mrf.mxu1  ;;  %v11347_v55 = vld [vmem:[#allocation8 + $0x10c0] sm:$0xff]  ;;  %v11360_v4 = vld [vmem:[#allocation8 + $0x1128] sm:$0xff] }
 0x215   :  { %5153 = vmatpush.bf16.msrb.mxu2 %v11051_v5  ;;  %v11368_v5 = vld [vmem:[#allocation8 + $0x1168] sm:$0xff] }
 0x216   :  { %5166 = vmatpush.bf16.msrb.mxu3 %v11059_v6  ;;  %5128 = vmatmul.bf16.vlgmr.msrb.gmra.mxu0 %v3184_v11  ;;  %v4935_v30 = vadd.f32 %v4934_v27, %v4922_v24  ;;  %v11376_v6 = vld [vmem:[#allocation8 + $0x11a8] sm:$0xff]  ;;  %v11367_v11 = vld [vmem:[#allocation8 + $0x1160] sm:$0xff] }
 0x217   :  { %7297 = vmatpush.bf16.msra.mxu0 %v11330_v7  ;;  %5141 = vmatmul.bf16.vlgmr.msrb.gmra.mxu1 %v3185_v13  ;;  %v11384_v7 = vld [vmem:[#allocation8 + $0x11e8] sm:$0xff]  ;;  %v11375_v13 = vld [vmem:[#allocation8 + $0x11a0] sm:$0xff] }
 0x218   :  { %7310 = vmatpush.bf16.msra.mxu1 %v11338_v8  ;;  %5154 = vmatmul.bf16.vlgmr.msrb.gmra.mxu2 %v3186_v12 }
 0x219   :  { %7323 = vmatpush.bf16.msra.mxu2 %v11346_v9  ;;  %5167 = vmatmul.bf16.vlgmr.msrb.gmra.mxu3 %v3187_v14  ;;  %v11383_v14 = vld [vmem:[#allocation8 + $0x11e0] sm:$0xff] }
 0x21a   :  { %7336 = vmatpush.bf16.msra.mxu3 %v11354_v10  ;;  %v11359_v10 = vld [vmem:[#allocation8 + $0x1120] sm:$0xff] }
 0x21b   :  { %7298 = vmatpush.bf16.msra.mxu0 %v11329_v15  ;;  %v4947_v36 = vpop.f32.mrf.mxu2  ;;  %v4923_v39 = vpop.f32.mrf.mxu0 }
 0x21c   :  { %7311 = vmatpush.bf16.msra.mxu1 %v11337_v16  ;;  %v4948_v37 = vadd.f32 %v4947_v36, %v4935_v30  ;;  %v4960_v38 = vpop.f32.mrf.mxu3  ;;  %v4936_v43 = vpop.f32.mrf.mxu1  ;;  %v11358_v16 = vld [vmem:[#allocation8 + $0x1118] sm:$0xff]  ;;  %v11356_v30 = vld [vmem:[#allocation8 + $0x1108] sm:$0xff] }
 0x21d   :  { %7324 = vmatpush.bf16.msra.mxu2 %v11345_v17  ;;  %v11366_v17 = vld [vmem:[#allocation8 + $0x1158] sm:$0xff]  ;;  %v11371_v43 = vld [vmem:[#allocation8 + $0x1180] sm:$0xff] }
 0x21e   :  { %7337 = vmatpush.bf16.msra.mxu3 %v11353_v18  ;;  %v4961_v40 = vadd.f32 %v4960_v38, %v4948_v37  ;;  %v11374_v18 = vld [vmem:[#allocation8 + $0x1198] sm:$0xff]  ;;  %v5696_v38 = vld [vmem:[#allocation1 + $0x2d] sm:$0xff] }
 0x21f   :  { %7299 = vmatpush.bf16.msra.mxu0 %v11328_v19  ;;  %v11382_v19 = vld [vmem:[#allocation8 + $0x11d8] sm:$0xff] }
 0x220   :  { %7312 = vmatpush.bf16.msra.mxu1 %v11336_v20  ;;  %v5698_v37 = vld [vmem:[#allocation1 + $0x3f] sm:$0xff] }
 0x221   :  { %7325 = vmatpush.bf16.msra.mxu2 %v11344_v21 }
 0x222   :  { %7338 = vmatpush.bf16.msra.mxu3 %v11352_v22 }
 0x223   :  { %7300 = vmatpush.bf16.msra.mxu0 %v11327_v25  ;;  %v4949_v50 = vpop.f32.mrf.mxu2  ;;  %v11357_v25 = vld [vmem:[#allocation8 + $0x1110] sm:$0xff] }
 0x224   :  { %7313 = vmatpush.bf16.msra.mxu1 %v11335_v26  ;;  %v4962_v51 = vpop.f32.mrf.mxu3  ;;  %v11365_v26 = vld [vmem:[#allocation8 + $0x1150] sm:$0xff] }
 0x225   :  { %7326 = vmatpush.bf16.msra.mxu2 %v11343_v28  ;;  %v11373_v28 = vld [vmem:[#allocation8 + $0x1190] sm:$0xff] }
 0x226   :  { %7339 = vmatpush.bf16.msra.mxu3 %v11351_v29  ;;  %v11381_v29 = vld [vmem:[#allocation8 + $0x11d0] sm:$0xff] }
 0x227   :  { %7301 = vmatpush.bf16.msra.mxu0 %v11326_v32  ;;  %v11372_v32 = vld [vmem:[#allocation8 + $0x1188] sm:$0xff]  ;;  %v11401_v50 = vld [vmem:[#allocation8 + $0x1270] sm:$0xff] }
 0x228   :  { %7314 = vmatpush.bf16.msra.mxu1 %v11334_v33  ;;  %v11380_v33 = vld [vmem:[#allocation8 + $0x11c8] sm:$0xff]  ;;  %v11409_v51 = vld [vmem:[#allocation8 + $0x12b0] sm:$0xff] }
 0x229   :  { %7327 = vmatpush.bf16.msra.mxu2 %v11342_v34  ;;  %v5697_v34 = vld [vmem:[#allocation1 + $0x36] sm:$0xff] }
 0x22a   :  { %7340 = vmatpush.bf16.msra.mxu3 %v11350_v35  ;;  %v5695_v35 = vld [vmem:[#allocation1 + $0x24] sm:$0xff] }
 0x22b   :  { %7302 = vmatpush.bf16.msra.mxu0 %v11325_v41  ;;  %v11355_v41 = vld [vmem:[#allocation8 + $0x1100] sm:$0xff] }
 0x22c   :  { %7315 = vmatpush.bf16.msra.mxu1 %v11333_v42  ;;  %v11363_v42 = vld [vmem:[#allocation8 + $0x1140] sm:$0xff] }
 0x22d   :  { %7328 = vmatpush.bf16.msra.mxu2 %v11341_v44  ;;  %v11379_v44 = vld [vmem:[#allocation8 + $0x11c0] sm:$0xff] }
 0x22e   :  { %7341 = vmatpush.bf16.msra.mxu3 %v11349_v45  ;;  %v11394_v45 = vld [vmem:[#allocation8 + $0x1238] sm:$0xff] }
 0x22f   :  { %7303 = vmatpush.bf16.msra.mxu0 %v11324_v46  ;;  %v11402_v46 = vld [vmem:[#allocation8 + $0x1278] sm:$0xff] }
 0x230   :  { %7316 = vmatpush.bf16.msra.mxu1 %v11332_v47  ;;  %v11410_v47 = vld [vmem:[#allocation8 + $0x12b8] sm:$0xff] }
 0x231   :  { %7329 = vmatpush.bf16.msra.mxu2 %v11340_v48  ;;  %v11418_v48 = vld [vmem:[#allocation8 + $0x12f8] sm:$0xff] }
 0x232   :  { %7342 = vmatpush.bf16.msra.mxu3 %v11348_v49  ;;  %v11393_v49 = vld [vmem:[#allocation8 + $0x1230] sm:$0xff] }
 0x233   :  { %7304 = vmatpush.bf16.msra.mxu0 %v11323_v52  ;;  %v4973_v8 = vpop.f32.mrf.mxu0  ;;  %v11417_v52 = vld [vmem:[#allocation8 + $0x12f0] sm:$0xff] }
 0x234   :  { %7317 = vmatpush.bf16.msra.mxu1 %v11331_v53  ;;  %v4974_v9 = vadd.f32 %v4973_v8, %v4961_v40  ;;  %v4986_v12 = vpop.f32.mrf.mxu1  ;;  %v5173_v40 = vld [vmem:[#allocation7 + $0x8] sm:$0xff] }
 0x235   :  { %7330 = vmatpush.bf16.msra.mxu2 %v11339_v54  ;;  %5700 = vst [vmem:[#allocation1] ss:$9 sm:$0xff] %v5173_v40  ;;  %v11392_v53 = vld [vmem:[#allocation8 + $0x1228] sm:$0xff] }
 0x236   :  { %7343 = vmatpush.bf16.msra.mxu3 %v11347_v55  ;;  %7305 = vmatmul.bf16.vlgmr.msra.gmra.mxu0 %v5691_v62  ;;  %v4987_v15 = vadd.f32 %v4986_v12, %v4974_v9  ;;  %v11400_v54 = vld [vmem:[#allocation8 + $0x1268] sm:$0xff]  ;;  %v11407_v62 = vld [vmem:[#allocation8 + $0x12a0] sm:$0xff] }
 0x237   :  { %7349 = vmatpush.bf16.msrb.mxu0 %v11362_v56  ;;  %7318 = vmatmul.bf16.vlgmr.msra.gmra.mxu1 %v5692_v1  ;;  %v11408_v55 = vld [vmem:[#allocation8 + $0x12a8] sm:$0xff]  ;;  %v11390_v1 = vld [vmem:[#allocation8 + $0x1218] sm:$0xff] }
 0x238   :  { %7362 = vmatpush.bf16.msrb.mxu1 %v11370_v57  ;;  %7331 = vmatmul.bf16.vlgmr.msra.gmra.mxu2 %v5693_v61  ;;  %v11416_v56 = vld [vmem:[#allocation8 + $0x12e8] sm:$0xff] }
 0x239   :  { %7375 = vmatpush.bf16.msrb.mxu2 %v11378_v58  ;;  %7344 = vmatmul.bf16.vlgmr.msra.gmra.mxu3 %v5694_v0  ;;  %v11448_v40 = vld [vmem:[#allocation8 + $0x13e8] sm:$0xff] }
 0x23a   :  { %7388 = vmatpush.bf16.msrb.mxu3 %v11386_v59  ;;  %v11391_v59 = vld [vmem:[#allocation8 + $0x1220] sm:$0xff] }
 0x23b   :  { %7350 = vmatpush.bf16.msrb.mxu0 %v11361_v60  ;;  %v4999_v20 = vpop.f32.mrf.mxu2  ;;  %v4975_v23 = vpop.f32.mrf.mxu0  ;;  %v11399_v60 = vld [vmem:[#allocation8 + $0x1260] sm:$0xff] }
 0x23c   :  { %7363 = vmatpush.bf16.msrb.mxu1 %v11369_v63  ;;  %v5000_v21 = vadd.f32 %v4999_v20, %v4987_v15  ;;  %v5012_v22 = vpop.f32.mrf.mxu3  ;;  %v4988_v27 = vpop.f32.mrf.mxu1  ;;  %v11415_v63 = vld [vmem:[#allocation8 + $0x12e0] sm:$0xff]  ;;  %v11388_v15 = vld [vmem:[#allocation8 + $0x1208] sm:$0xff] }
 0x23d   :  { %7376 = vmatpush.bf16.msrb.mxu2 %v11377_v2  ;;  %v11398_v2 = vld [vmem:[#allocation8 + $0x1258] sm:$0xff]  ;;  %v11403_v23 = vld [vmem:[#allocation8 + $0x1280] sm:$0xff] }
 0x23e   :  { %7389 = vmatpush.bf16.msrb.mxu3 %v11385_v3  ;;  %v11808_v24 = vadd.f32 %v5012_v22, %v5000_v21  ;;  %v11406_v3 = vld [vmem:[#allocation8 + $0x1298] sm:$0xff]  ;;  %v11387_v21 = vld [vmem:[#allocation8 + $0x1200] sm:$0xff] }
 0x23f   :  { %7351 = vmatpush.bf16.msrb.mxu0 %v11360_v4  ;;  %v11414_v4 = vld [vmem:[#allocation8 + $0x12d8] sm:$0xff]  ;;  %v11395_v22 = vld [vmem:[#allocation8 + $0x1240] sm:$0xff] }
 0x240   :  { %7364 = vmatpush.bf16.msrb.mxu1 %v11368_v5  ;;  %v11442_v27 = vld [vmem:[#allocation8 + $0x13b8] sm:$0xff] }
 0x241   :  { %7377 = vmatpush.bf16.msrb.mxu2 %v11376_v6 }
 0x242   :  { %7390 = vmatpush.bf16.msrb.mxu3 %v11384_v7 }
 0x243   :  { %7352 = vmatpush.bf16.msrb.mxu0 %v11359_v10  ;;  %v5001_v36 = vpop.f32.mrf.mxu2  ;;  %v11389_v10 = vld [vmem:[#allocation8 + $0x1210] sm:$0xff] }
 0x244   :  { %7365 = vmatpush.bf16.msrb.mxu1 %v11367_v11  ;;  %v5014_v39 = vpop.f32.mrf.mxu3  ;;  %v11397_v11 = vld [vmem:[#allocation8 + $0x1250] sm:$0xff] }
 0x245   :  { %7378 = vmatpush.bf16.msrb.mxu2 %v11375_v13  ;;  %v11405_v13 = vld [vmem:[#allocation8 + $0x1290] sm:$0xff]  ;;  %v11440_v39 = vld [vmem:[#allocation8 + $0x13a8] sm:$0xff] }
 0x246   :  { %7391 = vmatpush.bf16.msrb.mxu3 %v11383_v14  ;;  %v11413_v14 = vld [vmem:[#allocation8 + $0x12d0] sm:$0xff] }
 0x247   :  { %7353 = vmatpush.bf16.msrb.mxu0 %v11358_v16  ;;  %v11396_v16 = vld [vmem:[#allocation8 + $0x1248] sm:$0xff]  ;;  %v11449_v36 = vld [vmem:[#allocation8 + $0x13f0] sm:$0xff] }
 0x248   :  { %7366 = vmatpush.bf16.msrb.mxu1 %v11366_v17  ;;  %v11404_v17 = vld [vmem:[#allocation8 + $0x1288] sm:$0xff] }
 0x249   :  { %7379 = vmatpush.bf16.msrb.mxu2 %v11374_v18  ;;  %v11412_v18 = vld [vmem:[#allocation8 + $0x12c8] sm:$0xff] }
 0x24a   :  { %7392 = vmatpush.bf16.msrb.mxu3 %v11382_v19 }
 0x24b   :  { %7354 = vmatpush.bf16.msrb.mxu0 %v11357_v25  ;;  %v11426_v25 = vld [vmem:[#allocation8 + $0x1338] sm:$0xff] }
 0x24c   :  { %7367 = vmatpush.bf16.msrb.mxu1 %v11365_v26  ;;  %v11434_v26 = vld [vmem:[#allocation8 + $0x1378] sm:$0xff] }
 0x24d   :  { %7380 = vmatpush.bf16.msrb.mxu2 %v11373_v28  ;;  %v11450_v28 = vld [vmem:[#allocation8 + $0x13f8] sm:$0xff] }
 0x24e   :  { %7393 = vmatpush.bf16.msrb.mxu3 %v11381_v29  ;;  %v5701_v29 = vld [vmem:[#allocation1] sm:$0xff] }
 0x24f   :  { %7355 = vmatpush.bf16.msrb.mxu0 %v11356_v30  ;;  %v5703_v30 = vld [vmem:[#allocation1 + $0x12] sm:$0xff] }
 0x250   :  { %7368 = vmatpush.bf16.msrb.mxu1 %v11364_v31  ;;  %v5702_v31 = vld [vmem:[#allocation1 + $0x9] sm:$0xff] }
 0x251   :  { %7381 = vmatpush.bf16.msrb.mxu2 %v11372_v32  ;;  %v5704_v32 = vld [vmem:[#allocation1 + $0x1b] sm:$0xff] }
 0x252   :  { %7394 = vmatpush.bf16.msrb.mxu3 %v11380_v33  ;;  %v11425_v33 = vld [vmem:[#allocation8 + $0x1330] sm:$0xff] }
 0x253   :  { %7356 = vmatpush.bf16.msrb.mxu0 %v11355_v41  ;;  %v5025_v57 = vpop.f32.mrf.mxu0 }
 0x254   :  { %7369 = vmatpush.bf16.msrb.mxu1 %v11363_v42  ;;  %v5026_v58 = vadd.f32 %v5025_v57, %v11808_v24  ;;  %v5038_v61 = vpop.f32.mrf.mxu1  ;;  %v11411_v24 = vld [vmem:[#allocation8 + $0x12c0] sm:$0xff] }
 0x255   :  { %7382 = vmatpush.bf16.msrb.mxu2 %v11371_v43  ;;  %v11423_v43 = vld [vmem:[#allocation8 + $0x1320] sm:$0xff] }
 0x256   :  { %7395 = vmatpush.bf16.msrb.mxu3 %v11379_v44  ;;  %7357 = vmatmul.bf16.vlgmr.msrb.gmra.mxu0 %v5695_v35  ;;  %v5039_v0 = vadd.f32 %v5038_v61, %v5026_v58  ;;  %v11441_v35 = vld [vmem:[#allocation8 + $0x13b0] sm:$0xff]  ;;  %v11431_v44 = vld [vmem:[#allocation8 + $0x1360] sm:$0xff] }
 0x257   :  { %7401 = vmatpush.bf16.msra.mxu0 %v11394_v45  ;;  %7370 = vmatmul.bf16.vlgmr.msrb.gmra.mxu1 %v5696_v38  ;;  %v11432_v38 = vld [vmem:[#allocation8 + $0x1368] sm:$0xff]  ;;  %v11421_v58 = vld [vmem:[#allocation8 + $0x1310] sm:$0xff] }
 0x258   :  { %7414 = vmatpush.bf16.msra.mxu1 %v11402_v46  ;;  %7383 = vmatmul.bf16.vlgmr.msrb.gmra.mxu2 %v5697_v34  ;;  %v11433_v34 = vld [vmem:[#allocation8 + $0x1370] sm:$0xff]  ;;  %v11439_v46 = vld [vmem:[#allocation8 + $0x13a0] sm:$0xff] }
 0x259   :  { %7427 = vmatpush.bf16.msra.mxu2 %v11410_v47  ;;  %7396 = vmatmul.bf16.vlgmr.msrb.gmra.mxu3 %v5698_v37  ;;  %v11424_v37 = vld [vmem:[#allocation8 + $0x1328] sm:$0xff]  ;;  %v11447_v47 = vld [vmem:[#allocation8 + $0x13e0] sm:$0xff]  ;;  %v11437_v61 = vld [vmem:[#allocation8 + $0x1390] sm:$0xff] }
 0x25a   :  { %7440 = vmatpush.bf16.msra.mxu3 %v11418_v48 }
 0x25b   :  { %7402 = vmatpush.bf16.msra.mxu0 %v11393_v49  ;;  %v5051_v5 = vpop.f32.mrf.mxu2  ;;  %v5027_v8 = vpop.f32.mrf.mxu0  ;;  %v11422_v49 = vld [vmem:[#allocation8 + $0x1318] sm:$0xff] }
 0x25c   :  { %7415 = vmatpush.bf16.msra.mxu1 %v11401_v50  ;;  %v5052_v6 = vadd.f32 %v5051_v5, %v5039_v0  ;;  %v5064_v7 = vpop.f32.mrf.mxu3  ;;  %v5040_v12 = vpop.f32.mrf.mxu1  ;;  %v11430_v50 = vld [vmem:[#allocation8 + $0x1358] sm:$0xff]  ;;  %v11428_v0 = vld [vmem:[#allocation8 + $0x1348] sm:$0xff] }
 0x25d   :  { %7428 = vmatpush.bf16.msra.mxu2 %v11409_v51  ;;  %v11438_v51 = vld [vmem:[#allocation8 + $0x1398] sm:$0xff]  ;;  %v11435_v12 = vld [vmem:[#allocation8 + $0x1380] sm:$0xff] }
 0x25e   :  { %7441 = vmatpush.bf16.msra.mxu3 %v11417_v52  ;;  %v5065_v9 = vadd.f32 %v5064_v7, %v5052_v6  ;;  %v11446_v52 = vld [vmem:[#allocation8 + $0x13d8] sm:$0xff]  ;;  %v5706_v6 = vld [vmem:[#allocation1 + $0x2d] sm:$0xff] }
 0x25f   :  { %7403 = vmatpush.bf16.msra.mxu0 %v11392_v53  ;;  %v5708_v7 = vld [vmem:[#allocation1 + $0x3f] sm:$0xff] }
 0x260   :  { %7416 = vmatpush.bf16.msra.mxu1 %v11400_v54 }
 0x261   :  { %7429 = vmatpush.bf16.msra.mxu2 %v11408_v55 }
 0x262   :  { %7442 = vmatpush.bf16.msra.mxu3 %v11416_v56 }
 0x263   :  { %7404 = vmatpush.bf16.msra.mxu0 %v11391_v59  ;;  %v5053_v19 = vpop.f32.mrf.mxu2  ;;  %v11429_v59 = vld [vmem:[#allocation8 + $0x1350] sm:$0xff] }
 0x264   :  { %7417 = vmatpush.bf16.msra.mxu1 %v11399_v60  ;;  %v5066_v20 = vpop.f32.mrf.mxu3  ;;  %v11465_v19 = vld [vmem:[#allocation8 + $0x1470] sm:$0xff] }
 0x265   :  { %7430 = vmatpush.bf16.msra.mxu2 %v11407_v62  ;;  %v11445_v62 = vld [vmem:[#allocation8 + $0x13d0] sm:$0xff] }
 0x266   :  { %7443 = vmatpush.bf16.msra.mxu3 %v11415_v63  ;;  %v11420_v63 = vld [vmem:[#allocation8 + $0x1308] sm:$0xff]  ;;  %v11473_v20 = vld [vmem:[#allocation8 + $0x14b0] sm:$0xff] }
 0x267   :  { %7405 = vmatpush.bf16.msra.mxu0 %v11390_v1  ;;  %v11436_v1 = vld [vmem:[#allocation8 + $0x1388] sm:$0xff] }
 0x268   :  { %7418 = vmatpush.bf16.msra.mxu1 %v11398_v2  ;;  %v11444_v2 = vld [vmem:[#allocation8 + $0x13c8] sm:$0xff] }
 0x269   :  { %7431 = vmatpush.bf16.msra.mxu2 %v11406_v3  ;;  %v5705_v3 = vld [vmem:[#allocation1 + $0x24] sm:$0xff] }
 0x26a   :  { %7444 = vmatpush.bf16.msra.mxu3 %v11414_v4  ;;  %v5707_v4 = vld [vmem:[#allocation1 + $0x36] sm:$0xff] }
 0x26b   :  { %7406 = vmatpush.bf16.msra.mxu0 %v11389_v10  ;;  %v11419_v10 = vld [vmem:[#allocation8 + $0x1300] sm:$0xff] }
 0x26c   :  { %7419 = vmatpush.bf16.msra.mxu1 %v11397_v11  ;;  %v11427_v11 = vld [vmem:[#allocation8 + $0x1340] sm:$0xff] }
 0x26d   :  { %7432 = vmatpush.bf16.msra.mxu2 %v11405_v13  ;;  %v11443_v13 = vld [vmem:[#allocation8 + $0x13c0] sm:$0xff] }
 0x26e   :  { %7445 = vmatpush.bf16.msra.mxu3 %v11413_v14  ;;  %v11458_v14 = vld [vmem:[#allocation8 + $0x1438] sm:$0xff] }
 0x26f   :  { %7407 = vmatpush.bf16.msra.mxu0 %v11388_v15  ;;  %v11466_v15 = vld [vmem:[#allocation8 + $0x1478] sm:$0xff] }
 0x270   :  { %7420 = vmatpush.bf16.msra.mxu1 %v11396_v16  ;;  %v11474_v16 = vld [vmem:[#allocation8 + $0x14b8] sm:$0xff] }
 0x271   :  { %7433 = vmatpush.bf16.msra.mxu2 %v11404_v17  ;;  %v11482_v17 = vld [vmem:[#allocation8 + $0x14f8] sm:$0xff] }
 0x272   :  { %7446 = vmatpush.bf16.msra.mxu3 %v11412_v18  ;;  %v11457_v18 = vld [vmem:[#allocation8 + $0x1430] sm:$0xff] }
 0x273   :  { %7408 = vmatpush.bf16.msra.mxu0 %v11387_v21  ;;  %v5077_v41 = vpop.f32.mrf.mxu0  ;;  %v11481_v21 = vld [vmem:[#allocation8 + $0x14f0] sm:$0xff] }
 0x274   :  { %7421 = vmatpush.bf16.msra.mxu1 %v11395_v22  ;;  %v5078_v42 = vadd.f32 %v5077_v41, %v5065_v9  ;;  %v5090_v45 = vpop.f32.mrf.mxu1  ;;  %v5174_v9 = vld [vmem:[#allocation7 + $0x10] sm:$0xff]  ;;  %v11456_v22 = vld [vmem:[#allocation8 + $0x1428] sm:$0xff] }
 0x275   :  { %7434 = vmatpush.bf16.msra.mxu2 %v11403_v23  ;;  %5710 = vst [vmem:[#allocation1] ss:$9 sm:$0xff] %v5174_v9  ;;  %v11464_v23 = vld [vmem:[#allocation8 + $0x1468] sm:$0xff] }
 0x276   :  { %7447 = vmatpush.bf16.msra.mxu3 %v11411_v24  ;;  %7409 = vmatmul.bf16.vlgmr.msra.gmra.mxu0 %v5701_v29  ;;  %v5091_v48 = vadd.f32 %v5090_v45, %v5078_v42  ;;  %v11472_v24 = vld [vmem:[#allocation8 + $0x14a8] sm:$0xff]  ;;  %v11463_v29 = vld [vmem:[#allocation8 + $0x1460] sm:$0xff] }
 0x277   :  { %7453 = vmatpush.bf16.msrb.mxu0 %v11426_v25  ;;  %7422 = vmatmul.bf16.vlgmr.msra.gmra.mxu1 %v5702_v31  ;;  %v11480_v25 = vld [vmem:[#allocation8 + $0x14e8] sm:$0xff]  ;;  %v11471_v31 = vld [vmem:[#allocation8 + $0x14a0] sm:$0xff] }
 0x278   :  { %7466 = vmatpush.bf16.msrb.mxu1 %v11434_v26  ;;  %7435 = vmatmul.bf16.vlgmr.msra.gmra.mxu2 %v5703_v30  ;;  %v11512_v9 = vld [vmem:[#allocation8 + $0x15e8] sm:$0xff] }
 0x279   :  { %7479 = vmatpush.bf16.msrb.mxu2 %v11442_v27  ;;  %7448 = vmatmul.bf16.vlgmr.msra.gmra.mxu3 %v5704_v32  ;;  %v11479_v32 = vld [vmem:[#allocation8 + $0x14e0] sm:$0xff] }
 0x27a   :  { %7492 = vmatpush.bf16.msrb.mxu3 %v11450_v28  ;;  %v11455_v28 = vld [vmem:[#allocation8 + $0x1420] sm:$0xff] }
 0x27b   :  { %7454 = vmatpush.bf16.msrb.mxu0 %v11425_v33  ;;  %v5103_v53 = vpop.f32.mrf.mxu2  ;;  %v5079_v56 = vpop.f32.mrf.mxu0 }
 0x27c   :  { %7467 = vmatpush.bf16.msrb.mxu1 %v11433_v34  ;;  %v5104_v54 = vadd.f32 %v5103_v53, %v5091_v48  ;;  %v5116_v55 = vpop.f32.mrf.mxu3  ;;  %v5092_v60 = vpop.f32.mrf.mxu1  ;;  %v11454_v34 = vld [vmem:[#allocation8 + $0x1418] sm:$0xff]  ;;  %v11452_v48 = vld [vmem:[#allocation8 + $0x1408] sm:$0xff]  ;;  %v11467_v56 = vld [vmem:[#allocation8 + $0x1480] sm:$0xff] }
 0x27d   :  { %7480 = vmatpush.bf16.msrb.mxu2 %v11441_v35  ;;  %v11462_v35 = vld [vmem:[#allocation8 + $0x1458] sm:$0xff] }
 0x27e   :  { %7493 = vmatpush.bf16.msrb.mxu3 %v11449_v36  ;;  %v11811_v57 = vadd.f32 %v5116_v55, %v5104_v54  ;;  %v11470_v36 = vld [vmem:[#allocation8 + $0x1498] sm:$0xff]  ;;  %v11451_v54 = vld [vmem:[#allocation8 + $0x1400] sm:$0xff] }
 0x27f   :  { %7455 = vmatpush.bf16.msrb.mxu0 %v11424_v37  ;;  %v11478_v37 = vld [vmem:[#allocation8 + $0x14d8] sm:$0xff]  ;;  %v11459_v55 = vld [vmem:[#allocation8 + $0x1440] sm:$0xff] }
 0x280   :  { %7468 = vmatpush.bf16.msrb.mxu1 %v11432_v38  ;;  %v11506_v60 = vld [vmem:[#allocation8 + $0x15b8] sm:$0xff] }
 0x281   :  { %7481 = vmatpush.bf16.msrb.mxu2 %v11440_v39 }
 0x282   :  { %7494 = vmatpush.bf16.msrb.mxu3 %v11448_v40 }
 0x283   :  { %7456 = vmatpush.bf16.msrb.mxu0 %v11423_v43  ;;  %v5105_v5 = vpop.f32.mrf.mxu2  ;;  %v11453_v43 = vld [vmem:[#allocation8 + $0x1410] sm:$0xff] }
 0x284   :  { %7469 = vmatpush.bf16.msrb.mxu1 %v11431_v44  ;;  %v5118_v8 = vpop.f32.mrf.mxu3  ;;  %v11461_v44 = vld [vmem:[#allocation8 + $0x1450] sm:$0xff] }
 0x285   :  { %7482 = vmatpush.bf16.msrb.mxu2 %v11439_v46  ;;  %v11469_v46 = vld [vmem:[#allocation8 + $0x1490] sm:$0xff]  ;;  %v11504_v8 = vld [vmem:[#allocation8 + $0x15a8] sm:$0xff] }
 0x286   :  { %7495 = vmatpush.bf16.msrb.mxu3 %v11447_v47  ;;  %v11477_v47 = vld [vmem:[#allocation8 + $0x14d0] sm:$0xff] }
 0x287   :  { %7457 = vmatpush.bf16.msrb.mxu0 %v11422_v49  ;;  %v11460_v49 = vld [vmem:[#allocation8 + $0x1448] sm:$0xff]  ;;  %v11513_v5 = vld [vmem:[#allocation8 + $0x15f0] sm:$0xff] }
 0x288   :  { %7470 = vmatpush.bf16.msrb.mxu1 %v11430_v50  ;;  %v11468_v50 = vld [vmem:[#allocation8 + $0x1488] sm:$0xff] }
 0x289   :  { %7483 = vmatpush.bf16.msrb.mxu2 %v11438_v51  ;;  %v11476_v51 = vld [vmem:[#allocation8 + $0x14c8] sm:$0xff] }
 0x28a   :  { %7496 = vmatpush.bf16.msrb.mxu3 %v11446_v52 }
 0x28b   :  { %7458 = vmatpush.bf16.msrb.mxu0 %v11421_v58  ;;  %v11490_v58 = vld [vmem:[#allocation8 + $0x1538] sm:$0xff] }
 0x28c   :  { %7471 = vmatpush.bf16.msrb.mxu1 %v11429_v59  ;;  %v11498_v59 = vld [vmem:[#allocation8 + $0x1578] sm:$0xff] }
 0x28d   :  { %7484 = vmatpush.bf16.msrb.mxu2 %v11437_v61  ;;  %v11514_v61 = vld [vmem:[#allocation8 + $0x15f8] sm:$0xff] }
 0x28e   :  { %7497 = vmatpush.bf16.msrb.mxu3 %v11445_v62  ;;  %v5711_v62 = vld [vmem:[#allocation1] sm:$0xff] }
 0x28f   :  { %7459 = vmatpush.bf16.msrb.mxu0 %v11420_v63  ;;  %v5713_v63 = vld [vmem:[#allocation1 + $0x12] sm:$0xff] }
 0x290   :  { %7472 = vmatpush.bf16.msrb.mxu1 %v11428_v0  ;;  %v5712_v0 = vld [vmem:[#allocation1 + $0x9] sm:$0xff] }
 0x291   :  { %7485 = vmatpush.bf16.msrb.mxu2 %v11436_v1  ;;  %v5714_v1 = vld [vmem:[#allocation1 + $0x1b] sm:$0xff] }
 0x292   :  { %7498 = vmatpush.bf16.msrb.mxu3 %v11444_v2  ;;  %v11489_v2 = vld [vmem:[#allocation8 + $0x1530] sm:$0xff] }
 0x293   :  { %7460 = vmatpush.bf16.msrb.mxu0 %v11419_v10  ;;  %v5129_v26 = vpop.f32.mrf.mxu0 }
 0x294   :  { %7473 = vmatpush.bf16.msrb.mxu1 %v11427_v11  ;;  %v5130_v27 = vadd.f32 %v5129_v26, %v11811_v57  ;;  %v5142_v30 = vpop.f32.mrf.mxu1  ;;  %v11475_v57 = vld [vmem:[#allocation8 + $0x14c0] sm:$0xff]  ;;  %v11493_v26 = vld [vmem:[#allocation8 + $0x1550] sm:$0xff] }
 0x295   :  { %7486 = vmatpush.bf16.msrb.mxu2 %v11435_v12  ;;  %v11487_v11 = vld [vmem:[#allocation8 + $0x1520] sm:$0xff] }
 0x296   :  { %7499 = vmatpush.bf16.msrb.mxu3 %v11443_v13  ;;  %7461 = vmatmul.bf16.vlgmr.msrb.gmra.mxu0 %v5705_v3  ;;  %v5143_v33 = vadd.f32 %v5142_v30, %v5130_v27  ;;  %v11497_v3 = vld [vmem:[#allocation8 + $0x1570] sm:$0xff]  ;;  %v11495_v12 = vld [vmem:[#allocation8 + $0x1560] sm:$0xff] }
 0x297   :  { %7505 = vmatpush.bf16.msra.mxu0 %v11458_v14  ;;  %7474 = vmatmul.bf16.vlgmr.msrb.gmra.mxu1 %v5706_v6  ;;  %v11488_v6 = vld [vmem:[#allocation8 + $0x1528] sm:$0xff]  ;;  %v11503_v14 = vld [vmem:[#allocation8 + $0x15a0] sm:$0xff]  ;;  %v11509_v30 = vld [vmem:[#allocation8 + $0x15d0] sm:$0xff] }
 0x298   :  { %7518 = vmatpush.bf16.msra.mxu1 %v11466_v15  ;;  %7487 = vmatmul.bf16.vlgmr.msrb.gmra.mxu2 %v5707_v4  ;;  %v11505_v4 = vld [vmem:[#allocation8 + $0x15b0] sm:$0xff]  ;;  %v11511_v15 = vld [vmem:[#allocation8 + $0x15e0] sm:$0xff] }
 0x299   :  { %7531 = vmatpush.bf16.msra.mxu2 %v11474_v16  ;;  %7500 = vmatmul.bf16.vlgmr.msrb.gmra.mxu3 %v5708_v7  ;;  %v11496_v7 = vld [vmem:[#allocation8 + $0x1568] sm:$0xff] }
 0x29a   :  { %7544 = vmatpush.bf16.msra.mxu3 %v11482_v17  ;;  %v11486_v17 = vld [vmem:[#allocation8 + $0x1518] sm:$0xff] }
 0x29b   :  { %7506 = vmatpush.bf16.msra.mxu0 %v11457_v18  ;;  %v5155_v38 = vpop.f32.mrf.mxu2  ;;  %v5131_v41 = vpop.f32.mrf.mxu0  ;;  %v11494_v18 = vld [vmem:[#allocation8 + $0x1558] sm:$0xff] }
 0x29c   :  { %7519 = vmatpush.bf16.msra.mxu1 %v11465_v19  ;;  %v5156_v39 = vadd.f32 %v5155_v38, %v5143_v33  ;;  %v5168_v40 = vpop.f32.mrf.mxu3  ;;  %v5144_v45 = vpop.f32.mrf.mxu1  ;;  %v11502_v19 = vld [vmem:[#allocation8 + $0x1598] sm:$0xff]  ;;  %v11500_v33 = vld [vmem:[#allocation8 + $0x1588] sm:$0xff] }
 0x29d   :  { %7532 = vmatpush.bf16.msra.mxu2 %v11473_v20  ;;  %v11510_v20 = vld [vmem:[#allocation8 + $0x15d8] sm:$0xff]  ;;  %v5716_v38 = vld [vmem:[#allocation1 + $0x2d] sm:$0xff] }
 0x29e   :  { %7545 = vmatpush.bf16.msra.mxu3 %v11481_v21  ;;  %v11814_v42 = vadd.f32 %v5168_v40, %v5156_v39  ;;  %v5718_v39 = vld [vmem:[#allocation1 + $0x3f] sm:$0xff]  ;;  %v11499_v45 = vld [vmem:[#allocation8 + $0x1580] sm:$0xff] }
 0x29f   :  { %7507 = vmatpush.bf16.msra.mxu0 %v11456_v22  ;;  %v5175_v41 = vld [vmem:[#allocation7 + $0x18] sm:$0xff] }
 0x2a0   :  { %7520 = vmatpush.bf16.msra.mxu1 %v11464_v23 }
 0x2a1   :  { %7533 = vmatpush.bf16.msra.mxu2 %v11472_v24 }
 0x2a2   :  { %7546 = vmatpush.bf16.msra.mxu3 %v11480_v25  ;;  %v11485_v25 = vld [vmem:[#allocation8 + $0x1510] sm:$0xff] }
 0x2a3   :  { %7508 = vmatpush.bf16.msra.mxu0 %v11455_v28  ;;  %v5157_v52 = vpop.f32.mrf.mxu2 }
 0x2a4   :  { %7521 = vmatpush.bf16.msra.mxu1 %v11463_v29  ;;  %v5170_v53 = vpop.f32.mrf.mxu3  ;;  %v11501_v29 = vld [vmem:[#allocation8 + $0x1590] sm:$0xff] }
 0x2a5   :  { %7534 = vmatpush.bf16.msra.mxu2 %v11471_v31  ;;  %v11484_v31 = vld [vmem:[#allocation8 + $0x1508] sm:$0xff]  ;;  %v11529_v52 = vld [vmem:[#allocation8 + $0x1670] sm:$0xff] }
 0x2a6   :  { %7547 = vmatpush.bf16.msra.mxu3 %v11479_v32  ;;  %v11492_v32 = vld [vmem:[#allocation8 + $0x1548] sm:$0xff]  ;;  %v11537_v53 = vld [vmem:[#allocation8 + $0x16b0] sm:$0xff] }
 0x2a7   :  { %7509 = vmatpush.bf16.msra.mxu0 %v11454_v34  ;;  %v11508_v34 = vld [vmem:[#allocation8 + $0x15c8] sm:$0xff] }
 0x2a8   :  { %7522 = vmatpush.bf16.msra.mxu1 %v11462_v35  ;;  %v5715_v35 = vld [vmem:[#allocation1 + $0x24] sm:$0xff] }
 0x2a9   :  { %7535 = vmatpush.bf16.msra.mxu2 %v11470_v36  ;;  %v5717_v36 = vld [vmem:[#allocation1 + $0x36] sm:$0xff] }
 0x2aa   :  { %7548 = vmatpush.bf16.msra.mxu3 %v11478_v37  ;;  %5720 = vst [vmem:[#allocation1] ss:$9 sm:$0xff] %v5175_v41  ;;  %v11568_v41 = vld [vmem:[#allocation8 + $0x17a8] sm:$0xff] }
 0x2ab   :  { %7510 = vmatpush.bf16.msra.mxu0 %v11453_v43  ;;  %v11483_v43 = vld [vmem:[#allocation8 + $0x1500] sm:$0xff] }
 0x2ac   :  { %7523 = vmatpush.bf16.msra.mxu1 %v11461_v44  ;;  %v11491_v44 = vld [vmem:[#allocation8 + $0x1540] sm:$0xff] }
 0x2ad   :  { %7536 = vmatpush.bf16.msra.mxu2 %v11469_v46  ;;  %v11507_v46 = vld [vmem:[#allocation8 + $0x15c0] sm:$0xff] }
 0x2ae   :  { %7549 = vmatpush.bf16.msra.mxu3 %v11477_v47  ;;  %v11522_v47 = vld [vmem:[#allocation8 + $0x1638] sm:$0xff] }
 0x2af   :  { %7511 = vmatpush.bf16.msra.mxu0 %v11452_v48  ;;  %v11530_v48 = vld [vmem:[#allocation8 + $0x1678] sm:$0xff] }
 0x2b0   :  { %7524 = vmatpush.bf16.msra.mxu1 %v11460_v49  ;;  %v11538_v49 = vld [vmem:[#allocation8 + $0x16b8] sm:$0xff] }
 0x2b1   :  { %7537 = vmatpush.bf16.msra.mxu2 %v11468_v50  ;;  %v11546_v50 = vld [vmem:[#allocation8 + $0x16f8] sm:$0xff] }
 0x2b2   :  { %7550 = vmatpush.bf16.msra.mxu3 %v11476_v51  ;;  %v11521_v51 = vld [vmem:[#allocation8 + $0x1630] sm:$0xff] }
 0x2b3   :  { %7512 = vmatpush.bf16.msra.mxu0 %v11451_v54  ;;  %v7306_v10 = vpop.f32.mrf.mxu0  ;;  %v11545_v54 = vld [vmem:[#allocation8 + $0x16f0] sm:$0xff] }
 0x2b4   :  { %7525 = vmatpush.bf16.msra.mxu1 %v11459_v55  ;;  %v7319_v13 = vpop.f32.mrf.mxu1  ;;  %v11520_v55 = vld [vmem:[#allocation8 + $0x1628] sm:$0xff] }
 0x2b5   :  { %7538 = vmatpush.bf16.msra.mxu2 %v11467_v56  ;;  %v7320_v16 = vadd.f32 %v7319_v13, %v7306_v10  ;;  %v11528_v56 = vld [vmem:[#allocation8 + $0x1668] sm:$0xff] }
 0x2b6   :  { %7551 = vmatpush.bf16.msra.mxu3 %v11475_v57  ;;  %7513 = vmatmul.bf16.vlgmr.msra.gmra.mxu0 %v5711_v62  ;;  %v11536_v57 = vld [vmem:[#allocation8 + $0x16a8] sm:$0xff] }
 0x2b7   :  { %7557 = vmatpush.bf16.msrb.mxu0 %v11490_v58  ;;  %7526 = vmatmul.bf16.vlgmr.msra.gmra.mxu1 %v5712_v0  ;;  %v11544_v58 = vld [vmem:[#allocation8 + $0x16e8] sm:$0xff]  ;;  %v11535_v0 = vld [vmem:[#allocation8 + $0x16a0] sm:$0xff] }
 0x2b8   :  { %7570 = vmatpush.bf16.msrb.mxu1 %v11498_v59  ;;  %7539 = vmatmul.bf16.vlgmr.msra.gmra.mxu2 %v5713_v63 }
 0x2b9   :  { %7583 = vmatpush.bf16.msrb.mxu2 %v11506_v60  ;;  %7552 = vmatmul.bf16.vlgmr.msra.gmra.mxu3 %v5714_v1  ;;  %v11519_v60 = vld [vmem:[#allocation8 + $0x1620] sm:$0xff] }
 0x2ba   :  { %7596 = vmatpush.bf16.msrb.mxu3 %v11514_v61  ;;  %v11527_v61 = vld [vmem:[#allocation8 + $0x1660] sm:$0xff] }
 0x2bb   :  { %7558 = vmatpush.bf16.msrb.mxu0 %v11489_v2  ;;  %v7332_v21 = vpop.f32.mrf.mxu2  ;;  %v7308_v24 = vpop.f32.mrf.mxu0  ;;  %v11543_v1 = vld [vmem:[#allocation8 + $0x16e0] sm:$0xff] }
 0x2bc   :  { %7571 = vmatpush.bf16.msrb.mxu1 %v11497_v3  ;;  %v7333_v22 = vadd.f32 %v7332_v21, %v7320_v16  ;;  %v7345_v23 = vpop.f32.mrf.mxu3  ;;  %v7321_v28 = vpop.f32.mrf.mxu1  ;;  %v11518_v3 = vld [vmem:[#allocation8 + $0x1618] sm:$0xff]  ;;  %v11541_v16 = vld [vmem:[#allocation8 + $0x16d0] sm:$0xff]  ;;  %v11523_v24 = vld [vmem:[#allocation8 + $0x1640] sm:$0xff] }
 0x2bd   :  { %7584 = vmatpush.bf16.msrb.mxu2 %v11505_v4  ;;  %v11526_v4 = vld [vmem:[#allocation8 + $0x1658] sm:$0xff] }
 0x2be   :  { %7597 = vmatpush.bf16.msrb.mxu3 %v11513_v5  ;;  %v11816_v27 = vadd.f32 %v7345_v23, %v7333_v22  ;;  %v11534_v5 = vld [vmem:[#allocation8 + $0x1698] sm:$0xff]  ;;  %v11515_v23 = vld [vmem:[#allocation8 + $0x1600] sm:$0xff] }
 0x2bf   :  { %7559 = vmatpush.bf16.msrb.mxu0 %v11488_v6  ;;  %v11542_v6 = vld [vmem:[#allocation8 + $0x16d8] sm:$0xff] }
 0x2c0   :  { %7572 = vmatpush.bf16.msrb.mxu1 %v11496_v7  ;;  %v11562_v28 = vld [vmem:[#allocation8 + $0x1778] sm:$0xff] }
 0x2c1   :  { %7585 = vmatpush.bf16.msrb.mxu2 %v11504_v8 }
 0x2c2   :  { %7598 = vmatpush.bf16.msrb.mxu3 %v11512_v9 }
 0x2c3   :  { %7560 = vmatpush.bf16.msrb.mxu0 %v11487_v11  ;;  %v7334_v37 = vpop.f32.mrf.mxu2  ;;  %v11517_v11 = vld [vmem:[#allocation8 + $0x1610] sm:$0xff] }
 0x2c4   :  { %7573 = vmatpush.bf16.msrb.mxu1 %v11495_v12  ;;  %v7347_v40 = vpop.f32.mrf.mxu3  ;;  %v11525_v12 = vld [vmem:[#allocation8 + $0x1650] sm:$0xff] }
 0x2c5   :  { %7586 = vmatpush.bf16.msrb.mxu2 %v11503_v14  ;;  %v11569_v37 = vld [vmem:[#allocation8 + $0x17b0] sm:$0xff]  ;;  %v11560_v40 = vld [vmem:[#allocation8 + $0x1768] sm:$0xff] }
 0x2c6   :  { %7599 = vmatpush.bf16.msrb.mxu3 %v11511_v15  ;;  %v11533_v15 = vld [vmem:[#allocation8 + $0x1690] sm:$0xff] }
 0x2c7   :  { %7561 = vmatpush.bf16.msrb.mxu0 %v11486_v17  ;;  %v11516_v17 = vld [vmem:[#allocation8 + $0x1608] sm:$0xff] }
 0x2c8   :  { %7574 = vmatpush.bf16.msrb.mxu1 %v11494_v18  ;;  %v11524_v18 = vld [vmem:[#allocation8 + $0x1648] sm:$0xff] }
 0x2c9   :  { %7587 = vmatpush.bf16.msrb.mxu2 %v11502_v19  ;;  %v11532_v19 = vld [vmem:[#allocation8 + $0x1688] sm:$0xff] }
 0x2ca   :  { %7600 = vmatpush.bf16.msrb.mxu3 %v11510_v20  ;;  %v11540_v20 = vld [vmem:[#allocation8 + $0x16c8] sm:$0xff] }
 0x2cb   :  { %7562 = vmatpush.bf16.msrb.mxu0 %v11485_v25  ;;  %v11531_v25 = vld [vmem:[#allocation8 + $0x1680] sm:$0xff] }
 0x2cc   :  { %7575 = vmatpush.bf16.msrb.mxu1 %v11493_v26  ;;  %v11539_v26 = vld [vmem:[#allocation8 + $0x16c0] sm:$0xff] }
 0x2cd   :  { %7588 = vmatpush.bf16.msrb.mxu2 %v11501_v29  ;;  %v11570_v29 = vld [vmem:[#allocation8 + $0x17b8] sm:$0xff] }
 0x2ce   :  { %7601 = vmatpush.bf16.msrb.mxu3 %v11509_v30  ;;  %v11578_v30 = vld [vmem:[#allocation8 + $0x17f8] sm:$0xff] }
 0x2cf   :  { %7563 = vmatpush.bf16.msrb.mxu0 %v11484_v31  ;;  %v5721_v31 = vld [vmem:[#allocation1] sm:$0xff] }
 0x2d0   :  { %7576 = vmatpush.bf16.msrb.mxu1 %v11492_v32  ;;  %v5723_v32 = vld [vmem:[#allocation1 + $0x12] sm:$0xff] }
 0x2d1   :  { %7589 = vmatpush.bf16.msrb.mxu2 %v11500_v33  ;;  %v5722_v33 = vld [vmem:[#allocation1 + $0x9] sm:$0xff] }
 0x2d2   :  { %7602 = vmatpush.bf16.msrb.mxu3 %v11508_v34  ;;  %v5724_v34 = vld [vmem:[#allocation1 + $0x1b] sm:$0xff] }
 0x2d3   :  { %7564 = vmatpush.bf16.msrb.mxu0 %v11483_v43  ;;  %v7358_v59 = vpop.f32.mrf.mxu0  ;;  %v11576_v43 = vld [vmem:[#allocation8 + $0x17e8] sm:$0xff] }
 0x2d4   :  { %7577 = vmatpush.bf16.msrb.mxu1 %v11491_v44  ;;  %v7359_v62 = vadd.f32 %v7358_v59, %v11816_v27  ;;  %v7371_v63 = vpop.f32.mrf.mxu1  ;;  %v11554_v27 = vld [vmem:[#allocation8 + $0x1738] sm:$0xff] }
 0x2d5   :  { %7590 = vmatpush.bf16.msrb.mxu2 %v11499_v45 }
 0x2d6   :  { %7603 = vmatpush.bf16.msrb.mxu3 %v11507_v46  ;;  %7565 = vmatmul.bf16.vlgmr.msrb.gmra.mxu0 %v5715_v35  ;;  %v7372_v2 = vadd.f32 %v7371_v63, %v7359_v62  ;;  %v11553_v35 = vld [vmem:[#allocation8 + $0x1730] sm:$0xff]  ;;  %v11551_v46 = vld [vmem:[#allocation8 + $0x1720] sm:$0xff] }
 0x2d7   :  { %7609 = vmatpush.bf16.msra.mxu0 %v11522_v47  ;;  %7578 = vmatmul.bf16.vlgmr.msrb.gmra.mxu1 %v5716_v38  ;;  %v11577_v38 = vld [vmem:[#allocation8 + $0x17f0] sm:$0xff]  ;;  %v11559_v47 = vld [vmem:[#allocation8 + $0x1760] sm:$0xff] }
 0x2d8   :  { %7622 = vmatpush.bf16.msra.mxu1 %v11530_v48  ;;  %7591 = vmatmul.bf16.vlgmr.msrb.gmra.mxu2 %v5717_v36  ;;  %v11561_v36 = vld [vmem:[#allocation8 + $0x1770] sm:$0xff] }
 0x2d9   :  { %7635 = vmatpush.bf16.msra.mxu2 %v11538_v49  ;;  %7604 = vmatmul.bf16.vlgmr.msrb.gmra.mxu3 %v5718_v39  ;;  %v11552_v39 = vld [vmem:[#allocation8 + $0x1728] sm:$0xff]  ;;  %v11567_v49 = vld [vmem:[#allocation8 + $0x17a0] sm:$0xff]  ;;  %v11557_v62 = vld [vmem:[#allocation8 + $0x1750] sm:$0xff] }
 0x2da   :  { %7648 = vmatpush.bf16.msra.mxu3 %v11546_v50  ;;  %v11575_v50 = vld [vmem:[#allocation8 + $0x17e0] sm:$0xff] }
 0x2db   :  { %7610 = vmatpush.bf16.msra.mxu0 %v11521_v51  ;;  %v7384_v7 = vpop.f32.mrf.mxu2  ;;  %v7360_v10 = vpop.f32.mrf.mxu0 }
 0x2dc   :  { %7623 = vmatpush.bf16.msra.mxu1 %v11529_v52  ;;  %v7385_v8 = vadd.f32 %v7384_v7, %v7372_v2  ;;  %v7397_v9 = vpop.f32.mrf.mxu3  ;;  %v7373_v14 = vpop.f32.mrf.mxu1  ;;  %v11550_v52 = vld [vmem:[#allocation8 + $0x1718] sm:$0xff]  ;;  %v11548_v2 = vld [vmem:[#allocation8 + $0x1708] sm:$0xff]  ;;  %v11563_v10 = vld [vmem:[#allocation8 + $0x1780] sm:$0xff] }
 0x2dd   :  { %7636 = vmatpush.bf16.msra.mxu2 %v11537_v53  ;;  %v11558_v53 = vld [vmem:[#allocation8 + $0x1758] sm:$0xff]  ;;  %v5727_v14 = vld [vmem:[#allocation1 + $0x36] sm:$0xff] }
 0x2de   :  { %7649 = vmatpush.bf16.msra.mxu3 %v11545_v54  ;;  %v7398_v13 = vadd.f32 %v7397_v9, %v7385_v8  ;;  %v11566_v54 = vld [vmem:[#allocation8 + $0x1798] sm:$0xff]  ;;  %v11547_v8 = vld [vmem:[#allocation8 + $0x1700] sm:$0xff] }
 0x2df   :  { %7611 = vmatpush.bf16.msra.mxu0 %v11520_v55  ;;  %v11574_v55 = vld [vmem:[#allocation8 + $0x17d8] sm:$0xff]  ;;  %v11555_v9 = vld [vmem:[#allocation8 + $0x1740] sm:$0xff] }
 0x2e0   :  { %7624 = vmatpush.bf16.msra.mxu1 %v11528_v56 }
 0x2e1   :  { %7637 = vmatpush.bf16.msra.mxu2 %v11536_v57 }
 0x2e2   :  { %7650 = vmatpush.bf16.msra.mxu3 %v11544_v58 }
 0x2e3   :  { %7612 = vmatpush.bf16.msra.mxu0 %v11519_v60  ;;  %v7386_v21 = vpop.f32.mrf.mxu2 }
 0x2e4   :  { %7625 = vmatpush.bf16.msra.mxu1 %v11527_v61  ;;  %v7399_v22 = vpop.f32.mrf.mxu3  ;;  %v11549_v61 = vld [vmem:[#allocation8 + $0x1710] sm:$0xff] }
 0x2e5   :  { %7638 = vmatpush.bf16.msra.mxu2 %v11535_v0  ;;  %v11565_v0 = vld [vmem:[#allocation8 + $0x1790] sm:$0xff] }
 0x2e6   :  { %7651 = vmatpush.bf16.msra.mxu3 %v11543_v1  ;;  %v11573_v1 = vld [vmem:[#allocation8 + $0x17d0] sm:$0xff] }
 0x2e7   :  { %7613 = vmatpush.bf16.msra.mxu0 %v11518_v3  ;;  %v11556_v3 = vld [vmem:[#allocation8 + $0x1748] sm:$0xff] }
 0x2e8   :  { %7626 = vmatpush.bf16.msra.mxu1 %v11526_v4  ;;  %v11564_v4 = vld [vmem:[#allocation8 + $0x1788] sm:$0xff] }
 0x2e9   :  { %7639 = vmatpush.bf16.msra.mxu2 %v11534_v5  ;;  %v11572_v5 = vld [vmem:[#allocation8 + $0x17c8] sm:$0xff] }
 0x2ea   :  { %7652 = vmatpush.bf16.msra.mxu3 %v11542_v6 }
 0x2eb   :  { %7614 = vmatpush.bf16.msra.mxu0 %v11517_v11  ;;  %v11571_v11 = vld [vmem:[#allocation8 + $0x17c0] sm:$0xff] }
 0x2ec   :  { %7627 = vmatpush.bf16.msra.mxu1 %v11525_v12  ;;  %v5725_v12 = vld [vmem:[#allocation1 + $0x24] sm:$0xff] }
 0x2ed   :  { %7640 = vmatpush.bf16.msra.mxu2 %v11533_v15  ;;  %v5728_v15 = vld [vmem:[#allocation1 + $0x3f] sm:$0xff] }
 0x2ee   :  { %7653 = vmatpush.bf16.msra.mxu3 %v11541_v16 }
 0x2ef   :  { %7615 = vmatpush.bf16.msra.mxu0 %v11516_v17 }
 0x2f0   :  { %7628 = vmatpush.bf16.msra.mxu1 %v11524_v18 }
 0x2f1   :  { %7641 = vmatpush.bf16.msra.mxu2 %v11532_v19 }
 0x2f2   :  { %7654 = vmatpush.bf16.msra.mxu3 %v11540_v20 }
 0x2f3   :  { %7616 = vmatpush.bf16.msra.mxu0 %v11515_v23  ;;  %v7410_v44 = vpop.f32.mrf.mxu0 }
 0x2f4   :  { %7629 = vmatpush.bf16.msra.mxu1 %v11523_v24  ;;  %v7411_v45 = vadd.f32 %v7410_v44, %v7398_v13  ;;  %v7423_v48 = vpop.f32.mrf.mxu1  ;;  %v5726_v13 = vld [vmem:[#allocation1 + $0x2d] sm:$0xff] }
 0x2f5   :  { %7642 = vmatpush.bf16.msra.mxu2 %v11531_v25 }
 0x2f6   :  { %7655 = vmatpush.bf16.msra.mxu3 %v11539_v26  ;;  %7617 = vmatmul.bf16.vlgmr.msra.gmra.mxu0 %v5721_v31  ;;  %v7424_v51 = vadd.f32 %v7423_v48, %v7411_v45 }
 0x2f7   :  { %7661 = vmatpush.bf16.msrb.mxu0 %v11554_v27  ;;  %7630 = vmatmul.bf16.vlgmr.msra.gmra.mxu1 %v5722_v33 }
 0x2f8   :  { %7674 = vmatpush.bf16.msrb.mxu1 %v11562_v28  ;;  %7643 = vmatmul.bf16.vlgmr.msra.gmra.mxu2 %v5723_v32 }
 0x2f9   :  { %7687 = vmatpush.bf16.msrb.mxu2 %v11570_v29  ;;  %7656 = vmatmul.bf16.vlgmr.msra.gmra.mxu3 %v5724_v34 }
 0x2fa   :  { %7700 = vmatpush.bf16.msrb.mxu3 %v11578_v30 }
 0x2fb   :  { %7662 = vmatpush.bf16.msrb.mxu0 %v11553_v35  ;;  %v7436_v56 = vpop.f32.mrf.mxu2  ;;  %v7412_v59 = vpop.f32.mrf.mxu0 }
 0x2fc   :  { %7675 = vmatpush.bf16.msrb.mxu1 %v11561_v36  ;;  %v7437_v57 = vadd.f32 %v7436_v56, %v7424_v51  ;;  %v7449_v58 = vpop.f32.mrf.mxu3  ;;  %v7425_v63 = vpop.f32.mrf.mxu1 }
 0x2fd   :  { %7688 = vmatpush.bf16.msrb.mxu2 %v11569_v37 }
 0x2fe   :  { %7701 = vmatpush.bf16.msrb.mxu3 %v11577_v38  ;;  %v7450_v60 = vadd.f32 %v7449_v58, %v7437_v57 }
 0x2ff   :  { %7663 = vmatpush.bf16.msrb.mxu0 %v11552_v39 }
 0x300   :  { %7676 = vmatpush.bf16.msrb.mxu1 %v11560_v40 }
 0x301   :  { %7689 = vmatpush.bf16.msrb.mxu2 %v11568_v41 }
 0x302   :  { %7702 = vmatpush.bf16.msrb.mxu3 %v11576_v43 }
 0x303   :  { %7664 = vmatpush.bf16.msrb.mxu0 %v11551_v46  ;;  %v7438_v6 = vpop.f32.mrf.mxu2 }
 0x304   :  { %7677 = vmatpush.bf16.msrb.mxu1 %v11559_v47  ;;  %v7451_v7 = vpop.f32.mrf.mxu3 }
 0x305   :  { %7690 = vmatpush.bf16.msrb.mxu2 %v11567_v49 }
 0x306   :  { %7703 = vmatpush.bf16.msrb.mxu3 %v11575_v50 }
 0x307   :  { %7665 = vmatpush.bf16.msrb.mxu0 %v11550_v52 }
 0x308   :  { %7678 = vmatpush.bf16.msrb.mxu1 %v11558_v53 }
 0x309   :  { %7691 = vmatpush.bf16.msrb.mxu2 %v11566_v54 }
 0x30a   :  { %7704 = vmatpush.bf16.msrb.mxu3 %v11574_v55 }
 0x30b   :  { %7666 = vmatpush.bf16.msrb.mxu0 %v11549_v61 }
 0x30c   :  { %7679 = vmatpush.bf16.msrb.mxu1 %v11557_v62 }
 0x30d   :  { %7692 = vmatpush.bf16.msrb.mxu2 %v11565_v0 }
 0x30e   :  { %7705 = vmatpush.bf16.msrb.mxu3 %v11573_v1 }
 0x30f   :  { %7667 = vmatpush.bf16.msrb.mxu0 %v11548_v2 }
 0x310   :  { %7680 = vmatpush.bf16.msrb.mxu1 %v11556_v3 }
 0x311   :  { %7693 = vmatpush.bf16.msrb.mxu2 %v11564_v4 }
 0x312   :  { %7706 = vmatpush.bf16.msrb.mxu3 %v11572_v5 }
 0x313   :  { %7668 = vmatpush.bf16.msrb.mxu0 %v11547_v8  ;;  %v7462_v16 = vpop.f32.mrf.mxu0 }
 0x314   :  { %7681 = vmatpush.bf16.msrb.mxu1 %v11555_v9  ;;  %v7463_v17 = vadd.f32 %v7462_v16, %v7450_v60  ;;  %v7475_v18 = vpop.f32.mrf.mxu1 }
 0x315   :  { %7694 = vmatpush.bf16.msrb.mxu2 %v11563_v10 }
 0x316   :  { %7707 = vmatpush.bf16.msrb.mxu3 %v11571_v11  ;;  %7669 = vmatmul.bf16.vlgmr.msrb.gmra.mxu0 %v5725_v12  ;;  %v7476_v19 = vadd.f32 %v7475_v18, %v7463_v17  ;;  %v11587_v11 = vld [vmem:[#allocation10] ss:$0 sm:$0xff] }
 0x317   :  { %7682 = vmatmul.bf16.vlgmr.msrb.gmra.mxu1 %v5726_v13 }
 0x318   :  { %7695 = vmatmul.bf16.vlgmr.msrb.gmra.mxu2 %v5727_v14 }
 0x319   :  { %7708 = vmatmul.bf16.vlgmr.msrb.gmra.mxu3 %v5728_v15 }
 0x31b   :  { %v7488_v20 = vpop.f32.mrf.mxu2  ;;  %v7464_v23 = vpop.f32.mrf.mxu0 }
 0x31c   :  { %v7489_v21 = vadd.f32 %v7488_v20, %v7476_v19  ;;  %v7501_v22 = vpop.f32.mrf.mxu3  ;;  %v7477_v25 = vpop.f32.mrf.mxu1 }
 0x31e   :  { %v7502_v24 = vadd.f32 %v7501_v22, %v7489_v21 }
 0x323   :  { %v7490_v26 = vpop.f32.mrf.mxu2 }
 0x324   :  { %v7503_v27 = vpop.f32.mrf.mxu3 }
 0x333   :  { %v7514_v28 = vpop.f32.mrf.mxu0 }
 0x334   :  { %v7515_v29 = vadd.f32 %v7514_v28, %v7502_v24  ;;  %v7527_v30 = vpop.f32.mrf.mxu1 }
 0x336   :  { %v7528_v31 = vadd.f32 %v7527_v30, %v7515_v29 }
 0x33b   :  { %v7540_v32 = vpop.f32.mrf.mxu2  ;;  %v7516_v35 = vpop.f32.mrf.mxu0 }
 0x33c   :  { %v7541_v33 = vadd.f32 %v7540_v32, %v7528_v31  ;;  %v7553_v34 = vpop.f32.mrf.mxu3  ;;  %v7529_v37 = vpop.f32.mrf.mxu1 }
 0x33e   :  { %v7554_v36 = vadd.f32 %v7553_v34, %v7541_v33 }
 0x343   :  { %v7542_v38 = vpop.f32.mrf.mxu2 }
 0x344   :  { %v7555_v39 = vpop.f32.mrf.mxu3 }
 0x353   :  { %v7566_v40 = vpop.f32.mrf.mxu0 }
 0x354   :  { %v7579_v41 = vpop.f32.mrf.mxu1  ;;  %v7567_v52 = vadd.f32 %v7566_v40, %v7554_v36 }
 0x356   :  { %v7580_v56 = vadd.f32 %v7579_v41, %v7567_v52 }
 0x35b   :  { %v7592_v43 = vpop.f32.mrf.mxu2  ;;  %v7568_v45 = vpop.f32.mrf.mxu0 }
 0x35c   :  { %v7605_v44 = vpop.f32.mrf.mxu3  ;;  %v7581_v46 = vpop.f32.mrf.mxu1  ;;  %v7593_v57 = vadd.f32 %v7592_v43, %v7580_v56 }
 0x35e   :  { %v7606_v60 = vadd.f32 %v7605_v44, %v7593_v57 }
 0x363   :  { %v7594_v47 = vpop.f32.mrf.mxu2 }
 0x364   :  { %v7607_v48 = vpop.f32.mrf.mxu3 }
 0x373   :  { %v7618_v49 = vpop.f32.mrf.mxu0 }
 0x374   :  { %v7631_v50 = vpop.f32.mrf.mxu1  ;;  %v7619_v61 = vadd.f32 %v7618_v49, %v7606_v60 }
 0x376   :  { %v7632_v62 = vadd.f32 %v7631_v50, %v7619_v61 }
 0x37b   :  { %v7644_v51 = vpop.f32.mrf.mxu2  ;;  %v7620_v54 = vpop.f32.mrf.mxu0 }
 0x37c   :  { %v7657_v53 = vpop.f32.mrf.mxu3  ;;  %v7633_v55 = vpop.f32.mrf.mxu1  ;;  %v7645_v63 = vadd.f32 %v7644_v51, %v7632_v62 }
 0x37e   :  { %v7658_v0 = vadd.f32 %v7657_v53, %v7645_v63 }
 0x383   :  { %v7646_v58 = vpop.f32.mrf.mxu2 }
 0x384   :  { %v7659_v59 = vpop.f32.mrf.mxu3 }
 0x393   :  { %v7670_v1 = vpop.f32.mrf.mxu0 }
 0x394   :  { %v7683_v2 = vpop.f32.mrf.mxu1  ;;  %v7671_v3 = vadd.f32 %v7670_v1, %v7658_v0 }
 0x396   :  { %v7684_v4 = vadd.f32 %v7683_v2, %v7671_v3 }
 0x39b   :  { %v7696_v5 = vpop.f32.mrf.mxu2  ;;  %v7672_v8 = vpop.f32.mrf.mxu0 }
 0x39c   :  { %v7709_v6 = vpop.f32.mrf.mxu3  ;;  %v7697_v7 = vadd.f32 %v7696_v5, %v7684_v4  ;;  %v7685_v9 = vpop.f32.mrf.mxu1 }
 0x39e   :  { %v7710_v10 = vadd.f32 %v7709_v6, %v7697_v7 }
 0x3a0   :  { %v7713_v12 = vadd.f32 %v7710_v10, %v11814_v42 }
 0x3a2   :  { %v7718_v13 = vadd.f32 %v11587_v11, %v7713_v12 }
 0x3a3   :  { %v7698_v14 = vpop.f32.mrf.mxu2 }
 0x3a4   :  { %v7711_v15 = vpop.f32.mrf.mxu3  ;;  %7719 = vst [vmem:[#allocation11] sm:$0x3] %v7718_v13 }
 0x3a5   :  { %7730 = dma.vmem_to_hbm [thread:$0]  %s7726_s4, 32, %s7728_s19, [#allocation4]  }
 0x3a6   :  { %11738 = dma.done.wait [#allocation4], 32  }
 0x3a7   :  { %11739 = vsyncadd [#allocation4], 4294967264 }
 0x3a8   :  { %7735 = vsyncpa [#allocation3], 1 }
 0x3a9   :  { %7736 = vsyncpa [#allocation6], 1 }
 0x3aa   :  { %7737 = vsyncpa [#allocation9], 1 }
 0x3ab   :  { %7738 = vsyncpa [#allocation4], 1 }

</bundles_post_ra>
